<compile_context>
chip_gen: v5e
topology: v5e:2x2
jax: 0.10.0
libtpu: 0.0.40
codegen_flags: <defaults>
</compile_context>

<pallas_src>
import jax
import jax.numpy as jnp
from jax.experimental import pallas as pl
from jax.experimental.pallas import tpu as pltpu

# ---- dims ----
BATCH = 2
IMG = 28            # 28x28 image -> 4x4/stride-4 patch conv -> 7x7 feature map
PATCH = 4
GRID_HW = IMG // PATCH           # 7
P_PIX = GRID_HW * GRID_HW        # 49 valid "pixels" fed to the sentence attention
P_PAD = 56                       # 49 padded to a multiple of 8 (sublane alignment)
K_RAW = PATCH * PATCH * 3        # 48 raw patch features
K_PAD = 64                       # padded K for aligned loads
FEAT = 64          # encoder.out_channels[-1]
INTER = 16         # SCM inter_channels
HIDDEN = 32        # sentence / word LSTM hidden size
ATTN = 32          # attention_dim
VOCAB = 40         # Flags.word_map_len
NCLASS = 5         # Flags.n_class
N_SENT = 2
N_WORD = 3
LANES = 128        # lane-dense padded output width
NPIX = BATCH * P_PAD

PARAM_NAMES = (
    'enc_w', 'enc_b',                      # stand-in patch-conv encoder
    'scm_w', 'scm_b',                      # SCM 1x1 cross projection (stand-in)
    'nor_w', 'nor_b',                      # conv_nor 1x1, rows = [feat part ; inter part]
    'fc_w', 'fc_b',                        # fc_scm, rows fused the same way, out padded 5->128
    'enc_att_w', 'enc_att_b',
    'dec_att_w', 'dec_att_b',
    'full_att_w', 'full_att_b',
    's_l0_w', 's_l0_b',                    # sentence LSTM layer 0, [W_ih ; W_hh] fused rows
    's_l1_w', 's_l1_b',                    # sentence LSTM layer 1, fused
    't_fused_w', 't_fused_b',              # rows = [W_t_h ; W_t_ctx]
    'topic_w', 'topic_b',
    'stop_s_w', 'stop_s_b',
    'stop_w', 'stop_b',                    # out padded 2 -> 128
    'init_word_w', 'init_word_b',          # cols = [init_wordh | init_wordc]
    'w_w', 'w_b',                          # word LSTM, [W_ih ; W_hh] fused rows
    'w_lin_w', 'w_lin_b',                  # out padded VOCAB -> 128
)


def _mm(a, b):
    return jnp.dot(a, b, preferred_element_type=jnp.float32)


def _lstm_cell(x, h, c, w_ref, b_ref):
    """PyTorch LSTM cell (gate order i, f, g, o) with fused [W_ih ; W_hh] weight.

    ONE matmul on the lane-concatenated [x | h] input, ONE sigmoid over the full
    128-lane gate vreg, tanh only on the g slice (3 EUP pushes / cell)."""
    xh = jnp.concatenate([x, h], axis=-1)                       # (M, x_dim + HIDDEN)
    gates = _mm(xh, w_ref[...]) + b_ref[...]                    # (M, 4H) ; 4H = 128 lanes
    sg = jax.nn.sigmoid(gates)                                  # one lane-dense EUP pass
    i = sg[:, 0 * HIDDEN:1 * HIDDEN]
    f = sg[:, 1 * HIDDEN:2 * HIDDEN]
    o = sg[:, 3 * HIDDEN:4 * HIDDEN]
    g = jnp.tanh(gates[:, 2 * HIDDEN:3 * HIDDEN])
    c_new = f * c + i * g
    h_new = o * jnp.tanh(c_new)
    return h_new, c_new


def _caption4_kernel(p_ref, emb_ref, *refs):
    w = {name: refs[idx] for idx, name in enumerate(PARAM_NAMES)}
    n_par = len(PARAM_NAMES)
    cls_ref, stop_ref, word_ref = refs[n_par], refs[n_par + 1], refs[n_par + 2]

    f32 = jnp.float32

    # ---------- encoder + SCM: one matmul each over the row-STACKED (img1;img2) patches ----
    # TODO(synk): smp.FPN ImageNet-pretrained encoder replaced by one 4x4/stride-4 patch conv.
    feat = jnp.maximum(_mm(p_ref[...], w['enc_w'][...]) + w['enc_b'][...], 0.0)   # (2N, FEAT)
    # TODO(synk): SCM class is not defined in the source; stand-in = cross 1x1 projection.
    pr = jnp.maximum(_mm(feat, w['scm_w'][...]) + w['scm_b'][...], 0.0)           # (2N, INTER)
    # xx1 = [feat1 | pr2], xx2 = [feat2 | pr1]  =>  xx1 + xx2 = [feat1+feat2 | pr1+pr2]
    sum_f = feat[:NPIX] + feat[NPIX:]                                             # (N, FEAT)
    sum_i = pr[:NPIX] + pr[NPIX:]                                                 # (N, INTER)
    sum_cat = jnp.concatenate([sum_f, sum_i], axis=-1)                            # (N, FEAT+INTER)

    # conv_nor (1x1): ONE matmul against the row-fused [feat-part ; inter-part] weight.
    enc_out = _mm(sum_cat, w['nor_w'][...]) + w['nor_b'][...]                     # (N, FEAT)
    vis = enc_out.reshape(BATCH, P_PAD, FEAT)          # AdaptiveAvgPool2d((7,7)) is identity here

    # masked global average pools + fc_scm classifier (one fused matmul)
    pix3 = jax.lax.broadcasted_iota(jnp.int32, (1, P_PAD, 1), 1)
    valid3 = (pix3 < P_PIX).astype(f32)                # mask out padded pixels
    pooled = jnp.sum(sum_cat.reshape(BATCH, P_PAD, FEAT + INTER) * valid3,
                     axis=1) * (1.0 / P_PIX)                                      # (B, FEAT+INTER)
    cls_ref[...] = _mm(pooled, w['fc_w'][...]) + w['fc_b'][...]                   # (B,128); [:, :NCLASS]

    # ---------- sentence decode: serial chain = attention + 2 LSTM cells only ----------
    # loop-invariant hoists (encoder_att(visual), masks, small params/broadcasts)
    att1 = (_mm(enc_out, w['enc_att_w'][...]) + w['enc_att_b'][...]).reshape(BATCH, P_PAD, ATTN)
    pix2 = jax.lax.broadcasted_iota(jnp.int32, (BATCH, P_PAD), 1)
    pmask = pix2 < P_PIX
    neg_big = jnp.float32(-1e30)
    dec_att_w = w['dec_att_w'][...]
    dec_att_b = w['dec_att_b'][...]
    wfb = w['full_att_w'][...].reshape(1, 1, ATTN)
    full_att_b = w['full_att_b'][...]

    prev_hidden = jnp.zeros((BATCH, HIDDEN), f32)
    h_l0 = jnp.zeros((BATCH, HIDDEN), f32)
    c_l0 = jnp.zeros((BATCH, HIDDEN), f32)
    h_l1 = jnp.zeros((BATCH, HIDDEN), f32)
    c_l1 = jnp.zeros((BATCH, HIDDEN), f32)

    h_list = []
    ctx_list = []
    for s in range(N_SENT):
        # --- visual attention ---
        att2 = _mm(prev_hidden, dec_att_w) + dec_att_b                            # (B, ATTN)
        e = jnp.maximum(att1 + att2.reshape(BATCH, 1, ATTN), 0.0)                 # (B, P_PAD, ATTN)
        att = jnp.sum(e * wfb, axis=-1) + full_att_b                              # (B, P_PAD)
        att = jnp.where(pmask, att, neg_big)
        m = jnp.max(att, axis=1, keepdims=True)
        ex = jnp.exp(att - m)
        denom = jnp.sum(ex, axis=1, keepdims=True)
        alpha = ex * pl.reciprocal(denom, approx=True)                            # softmax(dim=1)
        ctx = jnp.sum(vis * alpha[:, :, None], axis=1)                            # (B, FEAT)

        # --- 2-layer sentence LSTM over a length-1 sequence (eval: dropout = identity) ---
        h_l0, c_l0 = _lstm_cell(ctx, h_l0, c_l0, w['s_l0_w'], w['s_l0_b'])
        h_l1, c_l1 = _lstm_cell(h_l0, h_l1, c_l1, w['s_l1_w'], w['s_l1_b'])
        prev_hidden = h_l1
        h_list.append(h_l1)
        ctx_list.append(ctx)

    # ---------- heads, batched across sentences (off the serial chain) ----------
    h_all = jnp.concatenate(h_list, axis=0)            # (N_SENT*B, HIDDEN)
    ctx_all = jnp.concatenate(ctx_list, axis=0)        # (N_SENT*B, FEAT)

    # topic = W_topic(tanh(W_t_h(h) + W_t_ctx(ctx))) -> one matmul on the lane-concat [h | ctx]
    hc = jnp.concatenate([h_all, ctx_all], axis=-1)    # (N_SENT*B, HIDDEN+FEAT)
    t = jnp.tanh(_mm(hc, w['t_fused_w'][...]) + w['t_fused_b'][...])
    topic = _mm(t, w['topic_w'][...]) + w['topic_b'][...]                         # (N_SENT*B, HIDDEN)

    # p_stop = W_stop(tanh(W_stop_s(hidden))) -> one flat lane-dense slab store
    stop_s = jnp.tanh(_mm(h_all, w['stop_s_w'][...]) + w['stop_s_b'][...])
    stop_ref[...] = _mm(stop_s, w['stop_w'][...]) + w['stop_b'][...]              # (N_SENT*B, 128)

    # h0/c0_word = tanh(init_word*(dropout(topic)))   (dropout identity in eval)
    iw = jnp.tanh(_mm(topic, w['init_word_w'][...]) + w['init_word_b'][...])      # (N_SENT*B, 2H)
    wh = iw[:, :HIDDEN]
    wc = iw[:, HIDDEN:]

    # ---------- word LSTM, batched across sentences (M = N_SENT*B) ----------
    # each word step runs the 2-step sequence [topic, embed(token)]
    wh_steps = []
    for t_w in range(N_WORD - 1):
        wh, wc = _lstm_cell(topic, wh, wc, w['w_w'], w['w_b'])
        wh, wc = _lstm_cell(emb_ref[t_w], wh, wc, w['w_w'], w['w_b'])
        wh_steps.append(wh)
    wh_all = jnp.concatenate(wh_steps, axis=0)         # ((N_WORD-1)*N_SENT*B, HIDDEN) = (8, 32)
    # ONE logits matmul + ONE unmasked (8,128) store = exactly one vreg
    word_ref[...] = _mm(wh_all, w['w_lin_w'][...]) + w['w_lin_b'][...]            # (8, 128)


def _full_spec(shape):
    nd = len(shape)
    return pl.BlockSpec(shape, lambda i, _nd=nd: (0,) * _nd)


@jax.jit
def caption4_forward(params, x1, x2, context):
    B = x1.shape[0]

    def to_patches(x_nchw):
        # NCHW -> NHWC -> non-overlapping 4x4 patches, padded to (P_PAD, K_PAD)
        x = jnp.transpose(x_nchw, (0, 2, 3, 1)).astype(jnp.float32)
        g = GRID_HW
        p = x.reshape(B, g, PATCH, g, PATCH, 3).transpose(0, 1, 3, 2, 4, 5)
        p = p.reshape(B, g * g, K_RAW)
        p = jnp.pad(p, ((0, 0), (0, P_PAD - P_PIX), (0, K_PAD - K_RAW)))
        return p.reshape(B * P_PAD, K_PAD)

    # row-stack the two streams so encoder/SCM run as ONE matmul each in the kernel
    p_all = jnp.concatenate([to_patches(x1), to_patches(x2)], axis=0)   # (2*B*P_PAD, K_PAD)

    # embedding lookup stays as a plain JAX gather (glue); layout (word_step, sent*B, H)
    emb = jnp.take(params['w_embed'], context[:, :, :N_WORD - 1], axis=0)   # (B, S, W-1, H)
    emb = jnp.transpose(emb, (2, 1, 0, 3)).astype(jnp.float32)              # (W-1, S, B, H)
    emb = emb.reshape(N_WORD - 1, N_SENT * B, HIDDEN)

    ins = [p_all, emb] + [params[n] for n in PARAM_NAMES]

    out_shapes = (
        jax.ShapeDtypeStruct((B, LANES), jnp.float32),                           # classify (padded)
        jax.ShapeDtypeStruct((N_SENT * B, LANES), jnp.float32),                  # stop (padded)
        jax.ShapeDtypeStruct(((N_WORD - 1) * N_SENT * B, LANES), jnp.float32),   # words (padded)
    )

    # TODO(synk): grid=(1,) full-block specs are double-buffered with nothing to pipeline;
    # irrelevant at ~60 KB of inputs, revisit (single-buffer / real grid) at scaled dims.
    cls_pad, stop_pad, word_pad = pl.pallas_call(
        _caption4_kernel,
        out_shape=out_shapes,
        grid=(1,),
        in_specs=[_full_spec(a.shape) for a in ins],
        out_specs=tuple(_full_spec(s.shape) for s in out_shapes),
        compiler_params=pltpu.CompilerParams(dimension_semantics=("arbitrary",)),
    )(*ins)

    classify_out = cls_pad[:, :NCLASS]
    stop_mat = stop_pad.reshape(N_SENT, B, LANES)
    stop_out = [stop_mat[s, :, :2] for s in range(N_SENT)]
    word_mat = word_pad.reshape(N_WORD - 1, N_SENT, B, LANES)
    word_out = [[word_mat[w_i, s, :, :VOCAB] for w_i in range(N_WORD - 1)]
                for s in range(N_SENT)]
    return {'classify_out': classify_out, 'stop_out': stop_out, 'word_out': word_out}


def init_params(key):
    ks = iter(jax.random.split(key, 64))

    def u(shape, a=0.1):
        return jax.random.uniform(next(ks), shape, jnp.float32, -a, a)

    def pad_cols(x, width):
        return jnp.pad(x, ((0, 0), (0, width - x.shape[1])))

    zeros = lambda shape: jnp.zeros(shape, jnp.float32)
    p = {}
    # padded K rows stay zero so padded pixels contribute nothing beyond the (masked) bias
    p['enc_w'] = jnp.pad(u((K_RAW, FEAT)), ((0, K_PAD - K_RAW), (0, 0)))
    p['enc_b'] = u((1, FEAT))
    p['scm_w'] = u((FEAT, INTER)); p['scm_b'] = u((1, INTER))
    # conv_nor (1x1), rows fused [feat part ; inter part]
    p['nor_w'] = u((FEAT + INTER, FEAT)); p['nor_b'] = u((1, FEAT))
    # fc_scm fused the same way; output padded 5 -> 128 lanes (zero-padded cols)
    p['fc_w'] = pad_cols(u((FEAT + INTER, NCLASS)), LANES)
    p['fc_b'] = pad_cols(u((1, NCLASS)), LANES)
    # SentenceLSTM attention
    p['enc_att_w'] = u((FEAT, ATTN)); p['enc_att_b'] = u((1, ATTN))
    p['dec_att_w'] = u((HIDDEN, ATTN)); p['dec_att_b'] = u((1, ATTN))
    p['full_att_w'] = u((1, ATTN)); p['full_att_b'] = u((1, 1))
    # sentence LSTM (2 layers): [W_ih ; W_hh] fused along input rows, bias = b_ih + b_hh
    p['s_l0_w'] = u((FEAT + HIDDEN, 4 * HIDDEN)); p['s_l0_b'] = u((1, 4 * HIDDEN))
    p['s_l1_w'] = u((HIDDEN + HIDDEN, 4 * HIDDEN)); p['s_l1_b'] = u((1, 4 * HIDDEN))
    # W_t_h / W_t_ctx fused along input rows: rows [0:H] = W_t_h, rows [H:H+FEAT] = W_t_ctx
    p['t_fused_w'] = u((HIDDEN + FEAT, HIDDEN)); p['t_fused_b'] = zeros((1, HIDDEN))
    p['topic_w'] = u((HIDDEN, HIDDEN)); p['topic_b'] = zeros((1, HIDDEN))
    p['stop_s_w'] = u((HIDDEN, FEAT)); p['stop_s_b'] = zeros((1, FEAT))
    p['stop_w'] = pad_cols(u((FEAT, 2)), LANES); p['stop_b'] = zeros((1, LANES))
    # init_wordh / init_wordc fused along the output dim
    p['init_word_w'] = u((HIDDEN, 2 * HIDDEN)); p['init_word_b'] = zeros((1, 2 * HIDDEN))
    # WordLSTM
    p['w_embed'] = u((VOCAB, HIDDEN))
    p['w_w'] = u((HIDDEN + HIDDEN, 4 * HIDDEN)); p['w_b'] = u((1, 4 * HIDDEN))
    p['w_lin_w'] = pad_cols(u((HIDDEN, VOCAB)), LANES); p['w_lin_b'] = zeros((1, LANES))
    return p


if __name__ == "__main__":
    key = jax.random.PRNGKey(0)
    k1, k2, k3, kp = jax.random.split(key, 4)
    params = init_params(kp)
    x1 = jax.random.normal(k1, (BATCH, 3, IMG, IMG), jnp.float32)      # NCHW like PyTorch
    x2 = jax.random.normal(k2, (BATCH, 3, IMG, IMG), jnp.float32)
    context = jax.random.randint(k3, (BATCH, N_SENT, N_WORD), 0, VOCAB, jnp.int32)

    out = caption4_forward(params, x1, x2, context)
    jax.block_until_ready(out['classify_out'])
    for ps in out['stop_out']:
        jax.block_until_ready(ps)
    for s_words in out['word_out']:
        for wv in s_words:
            jax.block_until_ready(wv)

    assert out['classify_out'].shape == (BATCH, NCLASS)
    assert out['stop_out'][0].shape == (BATCH, 2)
    assert len(out['word_out']) == N_SENT and len(out['word_out'][0]) == N_WORD - 1
    assert out['word_out'][0][0].shape == (BATCH, VOCAB)
    print("KERNEL_OK")
</pallas_src>

<mosaic_0001>
module attributes {stable_mosaic.version = 11 : i64} {
  func.func @_caption4_kernel(%arg0: i32, %arg1: memref<224x64xf32, #tpu.memory_space<vmem>>, %arg2: memref<2x4x32xf32, #tpu.memory_space<vmem>>, %arg3: memref<64x64xf32, #tpu.memory_space<vmem>>, %arg4: memref<1x64xf32, #tpu.memory_space<vmem>>, %arg5: memref<64x16xf32, #tpu.memory_space<vmem>>, %arg6: memref<1x16xf32, #tpu.memory_space<vmem>>, %arg7: memref<80x64xf32, #tpu.memory_space<vmem>>, %arg8: memref<1x64xf32, #tpu.memory_space<vmem>>, %arg9: memref<80x128xf32, #tpu.memory_space<vmem>>, %arg10: memref<1x128xf32, #tpu.memory_space<vmem>>, %arg11: memref<64x32xf32, #tpu.memory_space<vmem>>, %arg12: memref<1x32xf32, #tpu.memory_space<vmem>>, %arg13: memref<32x32xf32, #tpu.memory_space<vmem>>, %arg14: memref<1x32xf32, #tpu.memory_space<vmem>>, %arg15: memref<1x32xf32, #tpu.memory_space<vmem>>, %arg16: memref<1x1xf32, #tpu.memory_space<vmem>>, %arg17: memref<96x128xf32, #tpu.memory_space<vmem>>, %arg18: memref<1x128xf32, #tpu.memory_space<vmem>>, %arg19: memref<64x128xf32, #tpu.memory_space<vmem>>, %arg20: memref<1x128xf32, #tpu.memory_space<vmem>>, %arg21: memref<96x32xf32, #tpu.memory_space<vmem>>, %arg22: memref<1x32xf32, #tpu.memory_space<vmem>>, %arg23: memref<32x32xf32, #tpu.memory_space<vmem>>, %arg24: memref<1x32xf32, #tpu.memory_space<vmem>>, %arg25: memref<32x64xf32, #tpu.memory_space<vmem>>, %arg26: memref<1x64xf32, #tpu.memory_space<vmem>>, %arg27: memref<64x128xf32, #tpu.memory_space<vmem>>, %arg28: memref<1x128xf32, #tpu.memory_space<vmem>>, %arg29: memref<32x64xf32, #tpu.memory_space<vmem>>, %arg30: memref<1x64xf32, #tpu.memory_space<vmem>>, %arg31: memref<64x128xf32, #tpu.memory_space<vmem>>, %arg32: memref<1x128xf32, #tpu.memory_space<vmem>>, %arg33: memref<32x128xf32, #tpu.memory_space<vmem>>, %arg34: memref<1x128xf32, #tpu.memory_space<vmem>>, %arg35: memref<2x128xf32, #tpu.memory_space<vmem>>, %arg36: memref<4x128xf32, #tpu.memory_space<vmem>>, %arg37: memref<8x128xf32, #tpu.memory_space<vmem>>) attributes {dimension_semantics = [#tpu.dimension_semantics<arbitrary>], iteration_bounds = array<i64: 1>, scalar_prefetch = 0 : i64, scratch_operands = 0 : i64, tpu.core_type = #tpu.core_type<tc>, window_params = [{pipeline_mode = #tpu.pipeline_mode<synchronous>, transform_indices = @transform_0, window_bounds = array<i64: 224, 64>}, {pipeline_mode = #tpu.pipeline_mode<synchronous>, transform_indices = @transform_1, window_bounds = array<i64: 2, 4, 32>}, {pipeline_mode = #tpu.pipeline_mode<synchronous>, transform_indices = @transform_2, window_bounds = array<i64: 64, 64>}, {pipeline_mode = #tpu.pipeline_mode<synchronous>, transform_indices = @transform_3, window_bounds = array<i64: 1, 64>}, {pipeline_mode = #tpu.pipeline_mode<synchronous>, transform_indices = @transform_4, window_bounds = array<i64: 64, 16>}, {pipeline_mode = #tpu.pipeline_mode<synchronous>, transform_indices = @transform_5, window_bounds = array<i64: 1, 16>}, {pipeline_mode = #tpu.pipeline_mode<synchronous>, transform_indices = @transform_6, window_bounds = array<i64: 80, 64>}, {pipeline_mode = #tpu.pipeline_mode<synchronous>, transform_indices = @transform_7, window_bounds = array<i64: 1, 64>}, {pipeline_mode = #tpu.pipeline_mode<synchronous>, transform_indices = @transform_8, window_bounds = array<i64: 80, 128>}, {pipeline_mode = #tpu.pipeline_mode<synchronous>, transform_indices = @transform_9, window_bounds = array<i64: 1, 128>}, {pipeline_mode = #tpu.pipeline_mode<synchronous>, transform_indices = @transform_10, window_bounds = array<i64: 64, 32>}, {pipeline_mode = #tpu.pipeline_mode<synchronous>, transform_indices = @transform_11, window_bounds = array<i64: 1, 32>}, {pipeline_mode = #tpu.pipeline_mode<synchronous>, transform_indices = @transform_12, window_bounds = array<i64: 32, 32>}, {pipeline_mode = #tpu.pipeline_mode<synchronous>, transform_indices = @transform_13, window_bounds = array<i64: 1, 32>}, {pipeline_mode = #tpu.pipeline_mode<synchronous>, transform_indices = @transform_14, window_bounds = array<i64: 1, 32>}, {pipeline_mode = #tpu.pipeline_mode<synchronous>, transform_indices = @transform_15, window_bounds = array<i64: 1, 1>}, {pipeline_mode = #tpu.pipeline_mode<synchronous>, transform_indices = @transform_16, window_bounds = array<i64: 96, 128>}, {pipeline_mode = #tpu.pipeline_mode<synchronous>, transform_indices = @transform_17, window_bounds = array<i64: 1, 128>}, {pipeline_mode = #tpu.pipeline_mode<synchronous>, transform_indices = @transform_18, window_bounds = array<i64: 64, 128>}, {pipeline_mode = #tpu.pipeline_mode<synchronous>, transform_indices = @transform_19, window_bounds = array<i64: 1, 128>}, {pipeline_mode = #tpu.pipeline_mode<synchronous>, transform_indices = @transform_20, window_bounds = array<i64: 96, 32>}, {pipeline_mode = #tpu.pipeline_mode<synchronous>, transform_indices = @transform_21, window_bounds = array<i64: 1, 32>}, {pipeline_mode = #tpu.pipeline_mode<synchronous>, transform_indices = @transform_22, window_bounds = array<i64: 32, 32>}, {pipeline_mode = #tpu.pipeline_mode<synchronous>, transform_indices = @transform_23, window_bounds = array<i64: 1, 32>}, {pipeline_mode = #tpu.pipeline_mode<synchronous>, transform_indices = @transform_24, window_bounds = array<i64: 32, 64>}, {pipeline_mode = #tpu.pipeline_mode<synchronous>, transform_indices = @transform_25, window_bounds = array<i64: 1, 64>}, {pipeline_mode = #tpu.pipeline_mode<synchronous>, transform_indices = @transform_26, window_bounds = array<i64: 64, 128>}, {pipeline_mode = #tpu.pipeline_mode<synchronous>, transform_indices = @transform_27, window_bounds = array<i64: 1, 128>}, {pipeline_mode = #tpu.pipeline_mode<synchronous>, transform_indices = @transform_28, window_bounds = array<i64: 32, 64>}, {pipeline_mode = #tpu.pipeline_mode<synchronous>, transform_indices = @transform_29, window_bounds = array<i64: 1, 64>}, {pipeline_mode = #tpu.pipeline_mode<synchronous>, transform_indices = @transform_30, window_bounds = array<i64: 64, 128>}, {pipeline_mode = #tpu.pipeline_mode<synchronous>, transform_indices = @transform_31, window_bounds = array<i64: 1, 128>}, {pipeline_mode = #tpu.pipeline_mode<synchronous>, transform_indices = @transform_32, window_bounds = array<i64: 32, 128>}, {pipeline_mode = #tpu.pipeline_mode<synchronous>, transform_indices = @transform_33, window_bounds = array<i64: 1, 128>}, {pipeline_mode = #tpu.pipeline_mode<synchronous>, transform_indices = @transform_34, window_bounds = array<i64: 2, 128>}, {pipeline_mode = #tpu.pipeline_mode<synchronous>, transform_indices = @transform_35, window_bounds = array<i64: 4, 128>}, {pipeline_mode = #tpu.pipeline_mode<synchronous>, transform_indices = @transform_36, window_bounds = array<i64: 8, 128>}]} {
    %c0 = arith.constant 0 : index
    %c0_0 = arith.constant 0 : index
    %0 = vector.load %arg1[%c0, %c0_0] : memref<224x64xf32, #tpu.memory_space<vmem>>, vector<224x64xf32>
    %c0_1 = arith.constant 0 : index
    %c0_2 = arith.constant 0 : index
    %1 = vector.load %arg3[%c0_1, %c0_2] : memref<64x64xf32, #tpu.memory_space<vmem>>, vector<64x64xf32>
    %cst = arith.constant dense<0.000000e+00> : vector<224x64xf32>
    %2 = tpu.matmul %0, %1, %cst {dimension_numbers = #tpu.dot_dimension_numbers<[1], [0], [0], [1], [0, 0, 1, 1], [], []>} : vector<224x64xf32>, vector<64x64xf32>, vector<224x64xf32> -> vector<224x64xf32>
    %c0_3 = arith.constant 0 : index
    %c0_4 = arith.constant 0 : index
    %3 = vector.load %arg4[%c0_3, %c0_4] : memref<1x64xf32, #tpu.memory_space<vmem>>, vector<1x64xf32>
    %4 = vector.broadcast %3 : vector<1x64xf32> to vector<224x64xf32>
    %5 = arith.addf %2, %4 : vector<224x64xf32>
    %cst_5 = arith.constant 0.000000e+00 : f32
    %6 = vector.broadcast %cst_5 : f32 to vector<224x64xf32>
    %7 = arith.maximumf %5, %6 : vector<224x64xf32>
    %c0_6 = arith.constant 0 : index
    %c0_7 = arith.constant 0 : index
    %8 = vector.load %arg5[%c0_6, %c0_7] : memref<64x16xf32, #tpu.memory_space<vmem>>, vector<64x16xf32>
    %cst_8 = arith.constant dense<0.000000e+00> : vector<224x16xf32>
    %9 = tpu.matmul %7, %8, %cst_8 {dimension_numbers = #tpu.dot_dimension_numbers<[1], [0], [0], [1], [0, 0, 1, 1], [], []>} : vector<224x64xf32>, vector<64x16xf32>, vector<224x16xf32> -> vector<224x16xf32>
    %c0_9 = arith.constant 0 : index
    %c0_10 = arith.constant 0 : index
    %10 = vector.load %arg6[%c0_9, %c0_10] : memref<1x16xf32, #tpu.memory_space<vmem>>, vector<1x16xf32>
    %11 = vector.broadcast %10 : vector<1x16xf32> to vector<224x16xf32>
    %12 = arith.addf %9, %11 : vector<224x16xf32>
    %cst_11 = arith.constant 0.000000e+00 : f32
    %13 = vector.broadcast %cst_11 : f32 to vector<224x16xf32>
    %14 = arith.maximumf %12, %13 : vector<224x16xf32>
    %15 = vector.extract_strided_slice %7 {offsets = [0, 0], sizes = [112, 64], strides = [1, 1]} : vector<224x64xf32> to vector<112x64xf32>
    %16 = vector.extract_strided_slice %7 {offsets = [112, 0], sizes = [112, 64], strides = [1, 1]} : vector<224x64xf32> to vector<112x64xf32>
    %17 = arith.addf %15, %16 : vector<112x64xf32>
    %18 = vector.extract_strided_slice %14 {offsets = [0, 0], sizes = [112, 16], strides = [1, 1]} : vector<224x16xf32> to vector<112x16xf32>
    %19 = vector.extract_strided_slice %14 {offsets = [112, 0], sizes = [112, 16], strides = [1, 1]} : vector<224x16xf32> to vector<112x16xf32>
    %20 = arith.addf %18, %19 : vector<112x16xf32>
    %21 = tpu.concatenate %17, %20 in 1 : vector<112x64xf32>, vector<112x16xf32> -> vector<112x80xf32>
    %c0_12 = arith.constant 0 : index
    %c0_13 = arith.constant 0 : index
    %22 = vector.load %arg7[%c0_12, %c0_13] : memref<80x64xf32, #tpu.memory_space<vmem>>, vector<80x64xf32>
    %cst_14 = arith.constant dense<0.000000e+00> : vector<112x64xf32>
    %23 = tpu.matmul %21, %22, %cst_14 {dimension_numbers = #tpu.dot_dimension_numbers<[1], [0], [0], [1], [0, 0, 1, 1], [], []>} : vector<112x80xf32>, vector<80x64xf32>, vector<112x64xf32> -> vector<112x64xf32>
    %c0_15 = arith.constant 0 : index
    %c0_16 = arith.constant 0 : index
    %24 = vector.load %arg8[%c0_15, %c0_16] : memref<1x64xf32, #tpu.memory_space<vmem>>, vector<1x64xf32>
    %25 = vector.broadcast %24 : vector<1x64xf32> to vector<112x64xf32>
    %26 = arith.addf %23, %25 : vector<112x64xf32>
    %27 = vector.shape_cast %26 : vector<112x64xf32> to vector<2x56x64xf32>
    %28 = tpu.iota {dimensions = array<i32: 1>} : vector<1x56x1xi32>
    %c49_i32 = arith.constant 49 : i32
    %29 = vector.broadcast %c49_i32 : i32 to vector<1x56x1xi32>
    %30 = arith.cmpi slt, %28, %29 : vector<1x56x1xi32>
    %31 = arith.extui %30 : vector<1x56x1xi1> to vector<1x56x1xi32>
    %32 = arith.sitofp %31 : vector<1x56x1xi32> to vector<1x56x1xf32>
    %33 = vector.shape_cast %21 : vector<112x80xf32> to vector<2x56x80xf32>
    %34 = vector.broadcast %32 : vector<1x56x1xf32> to vector<2x56x80xf32>
    %35 = arith.mulf %33, %34 : vector<2x56x80xf32>
    %cst_17 = arith.constant dense<0.000000e+00> : vector<2x80xf32>
    %36 = vector.multi_reduction <add>, %35, %cst_17 [1] : vector<2x56x80xf32> to vector<2x80xf32>
    %cst_18 = arith.constant 0.0204081628 : f32
    %37 = vector.broadcast %cst_18 : f32 to vector<2x80xf32>
    %38 = arith.mulf %36, %37 : vector<2x80xf32>
    %c0_19 = arith.constant 0 : index
    %c0_20 = arith.constant 0 : index
    %39 = vector.load %arg9[%c0_19, %c0_20] : memref<80x128xf32, #tpu.memory_space<vmem>>, vector<80x128xf32>
    %cst_21 = arith.constant dense<0.000000e+00> : vector<2x128xf32>
    %40 = tpu.matmul %38, %39, %cst_21 {dimension_numbers = #tpu.dot_dimension_numbers<[1], [0], [0], [1], [0, 0, 1, 1], [], []>} : vector<2x80xf32>, vector<80x128xf32>, vector<2x128xf32> -> vector<2x128xf32>
    %c0_22 = arith.constant 0 : index
    %c0_23 = arith.constant 0 : index
    %41 = vector.load %arg10[%c0_22, %c0_23] : memref<1x128xf32, #tpu.memory_space<vmem>>, vector<1x128xf32>
    %42 = vector.broadcast %41 : vector<1x128xf32> to vector<2x128xf32>
    %43 = arith.addf %40, %42 : vector<2x128xf32>
    %c0_24 = arith.constant 0 : index
    %c0_25 = arith.constant 0 : index
    %44 = vector.load %arg35[%c0_24, %c0_25] : memref<2x128xf32, #tpu.memory_space<vmem>>, vector<2x128xf32>
    tpu.vector_store %arg35[%c0_24, %c0_25], %43 {strides = array<i32>} : memref<2x128xf32, #tpu.memory_space<vmem>>, vector<2x128xf32>,
    %c0_26 = arith.constant 0 : index
    %c0_27 = arith.constant 0 : index
    %45 = vector.load %arg11[%c0_26, %c0_27] : memref<64x32xf32, #tpu.memory_space<vmem>>, vector<64x32xf32>
    %cst_28 = arith.constant dense<0.000000e+00> : vector<112x32xf32>
    %46 = tpu.matmul %26, %45, %cst_28 {dimension_numbers = #tpu.dot_dimension_numbers<[1], [0], [0], [1], [0, 0, 1, 1], [], []>} : vector<112x64xf32>, vector<64x32xf32>, vector<112x32xf32> -> vector<112x32xf32>
    %c0_29 = arith.constant 0 : index
    %c0_30 = arith.constant 0 : index
    %47 = vector.load %arg12[%c0_29, %c0_30] : memref<1x32xf32, #tpu.memory_space<vmem>>, vector<1x32xf32>
    %48 = vector.broadcast %47 : vector<1x32xf32> to vector<112x32xf32>
    %49 = arith.addf %46, %48 : vector<112x32xf32>
    %50 = vector.shape_cast %49 : vector<112x32xf32> to vector<2x56x32xf32>
    %51 = tpu.iota {dimensions = array<i32: 1>} : vector<2x56xi32>
    %c49_i32_31 = arith.constant 49 : i32
    %52 = vector.broadcast %c49_i32_31 : i32 to vector<2x56xi32>
    %53 = arith.cmpi slt, %51, %52 : vector<2x56xi32>
    %c0_32 = arith.constant 0 : index
    %c0_33 = arith.constant 0 : index
    %54 = vector.load %arg13[%c0_32, %c0_33] : memref<32x32xf32, #tpu.memory_space<vmem>>, vector<32x32xf32>
    %c0_34 = arith.constant 0 : index
    %c0_35 = arith.constant 0 : index
    %55 = vector.load %arg14[%c0_34, %c0_35] : memref<1x32xf32, #tpu.memory_space<vmem>>, vector<1x32xf32>
    %c0_36 = arith.constant 0 : index
    %c0_37 = arith.constant 0 : index
    %56 = vector.load %arg15[%c0_36, %c0_37] : memref<1x32xf32, #tpu.memory_space<vmem>>, vector<1x32xf32>
    %57 = vector.shape_cast %56 : vector<1x32xf32> to vector<1x1x32xf32>
    %c0_38 = arith.constant 0 : index
    %c0_39 = arith.constant 0 : index
    %58 = vector.load %arg16[%c0_38, %c0_39] : memref<1x1xf32, #tpu.memory_space<vmem>>, vector<1x1xf32>
    %cst_40 = arith.constant 0.000000e+00 : f32
    %59 = vector.broadcast %cst_40 : f32 to vector<2x32xf32>
    %cst_41 = arith.constant 0.000000e+00 : f32
    %60 = vector.broadcast %cst_41 : f32 to vector<2x32xf32>
    %cst_42 = arith.constant 0.000000e+00 : f32
    %61 = vector.broadcast %cst_42 : f32 to vector<2x32xf32>
    %cst_43 = arith.constant 0.000000e+00 : f32
    %62 = vector.broadcast %cst_43 : f32 to vector<2x32xf32>
    %cst_44 = arith.constant 0.000000e+00 : f32
    %63 = vector.broadcast %cst_44 : f32 to vector<2x32xf32>
    %cst_45 = arith.constant dense<0.000000e+00> : vector<2x32xf32>
    %64 = tpu.matmul %59, %54, %cst_45 {dimension_numbers = #tpu.dot_dimension_numbers<[1], [0], [0], [1], [0, 0, 1, 1], [], []>} : vector<2x32xf32>, vector<32x32xf32>, vector<2x32xf32> -> vector<2x32xf32>
    %65 = vector.broadcast %55 : vector<1x32xf32> to vector<2x32xf32>
    %66 = arith.addf %64, %65 : vector<2x32xf32>
    %67 = vector.shape_cast %66 : vector<2x32xf32> to vector<2x1x32xf32>
    %68 = vector.broadcast %67 : vector<2x1x32xf32> to vector<2x56x32xf32>
    %69 = arith.addf %50, %68 : vector<2x56x32xf32>
    %cst_46 = arith.constant 0.000000e+00 : f32
    %70 = vector.broadcast %cst_46 : f32 to vector<2x56x32xf32>
    %71 = arith.maximumf %69, %70 : vector<2x56x32xf32>
    %72 = vector.broadcast %57 : vector<1x1x32xf32> to vector<2x56x32xf32>
    %73 = arith.mulf %71, %72 : vector<2x56x32xf32>
    %cst_47 = arith.constant dense<0.000000e+00> : vector<2x56xf32>
    %74 = vector.multi_reduction <add>, %73, %cst_47 [2] : vector<2x56x32xf32> to vector<2x56xf32>
    %75 = vector.broadcast %58 : vector<1x1xf32> to vector<2x56xf32>
    %76 = arith.addf %74, %75 : vector<2x56xf32>
    %cst_48 = arith.constant -1.000000e+30 : f32
    %77 = vector.broadcast %cst_48 : f32 to vector<2x56xf32>
    %78 = arith.select %53, %76, %77 : vector<2x56xi1>, vector<2x56xf32>
    %cst_49 = arith.constant dense<0xFF800000> : vector<2xf32>
    %79 = vector.multi_reduction <maximumf>, %78, %cst_49 [1] : vector<2x56xf32> to vector<2xf32>
    %80 = vector.shape_cast %79 : vector<2xf32> to vector<2x1xf32>
    %81 = vector.broadcast %80 : vector<2x1xf32> to vector<2x56xf32>
    %82 = arith.subf %78, %81 : vector<2x56xf32>
    %83 = math.exp %82 : vector<2x56xf32>
    %cst_50 = arith.constant dense<0.000000e+00> : vector<2xf32>
    %84 = vector.multi_reduction <add>, %83, %cst_50 [1] : vector<2x56xf32> to vector<2xf32>
    %85 = vector.shape_cast %84 : vector<2xf32> to vector<2x1xf32>
    %86 = tpu.reciprocal %85 {approx = true} : vector<2x1xf32> -> vector<2x1xf32>
    %87 = vector.broadcast %86 : vector<2x1xf32> to vector<2x56xf32>
    %88 = arith.mulf %83, %87 : vector<2x56xf32>
    %89 = vector.shape_cast %88 : vector<2x56xf32> to vector<2x56x1xf32>
    %90 = vector.broadcast %89 : vector<2x56x1xf32> to vector<2x56x64xf32>
    %91 = arith.mulf %27, %90 : vector<2x56x64xf32>
    %cst_51 = arith.constant dense<0.000000e+00> : vector<2x64xf32>
    %92 = vector.multi_reduction <add>, %91, %cst_51 [1] : vector<2x56x64xf32> to vector<2x64xf32>
    %93 = tpu.concatenate %92, %60 in 1 : vector<2x64xf32>, vector<2x32xf32> -> vector<2x96xf32>
    %c0_52 = arith.constant 0 : index
    %c0_53 = arith.constant 0 : index
    %94 = vector.load %arg17[%c0_52, %c0_53] : memref<96x128xf32, #tpu.memory_space<vmem>>, vector<96x128xf32>
    %cst_54 = arith.constant dense<0.000000e+00> : vector<2x128xf32>
    %95 = tpu.matmul %93, %94, %cst_54 {dimension_numbers = #tpu.dot_dimension_numbers<[1], [0], [0], [1], [0, 0, 1, 1], [], []>} : vector<2x96xf32>, vector<96x128xf32>, vector<2x128xf32> -> vector<2x128xf32>
    %c0_55 = arith.constant 0 : index
    %c0_56 = arith.constant 0 : index
    %96 = vector.load %arg18[%c0_55, %c0_56] : memref<1x128xf32, #tpu.memory_space<vmem>>, vector<1x128xf32>
    %97 = vector.broadcast %96 : vector<1x128xf32> to vector<2x128xf32>
    %98 = arith.addf %95, %97 : vector<2x128xf32>
    %99 = arith.negf %98 : vector<2x128xf32>
    %100 = math.exp %99 : vector<2x128xf32>
    %cst_57 = arith.constant 1.000000e+00 : f32
    %101 = vector.broadcast %cst_57 : f32 to vector<2x128xf32>
    %102 = arith.addf %101, %100 : vector<2x128xf32>
    %103 = arith.divf %101, %102 : vector<2x128xf32>
    %104 = vector.extract_strided_slice %103 {offsets = [0, 0], sizes = [2, 32], strides = [1, 1]} : vector<2x128xf32> to vector<2x32xf32>
    %105 = vector.extract_strided_slice %103 {offsets = [0, 32], sizes = [2, 32], strides = [1, 1]} : vector<2x128xf32> to vector<2x32xf32>
    %106 = vector.extract_strided_slice %103 {offsets = [0, 96], sizes = [2, 32], strides = [1, 1]} : vector<2x128xf32> to vector<2x32xf32>
    %107 = vector.extract_strided_slice %98 {offsets = [0, 64], sizes = [2, 32], strides = [1, 1]} : vector<2x128xf32> to vector<2x32xf32>
    %108 = math.tanh %107 : vector<2x32xf32>
    %109 = arith.mulf %105, %61 : vector<2x32xf32>
    %110 = arith.mulf %104, %108 : vector<2x32xf32>
    %111 = arith.addf %109, %110 : vector<2x32xf32>
    %112 = math.tanh %111 : vector<2x32xf32>
    %113 = arith.mulf %106, %112 : vector<2x32xf32>
    %114 = tpu.concatenate %113, %62 in 1 : vector<2x32xf32>, vector<2x32xf32> -> vector<2x64xf32>
    %c0_58 = arith.constant 0 : index
    %c0_59 = arith.constant 0 : index
    %115 = vector.load %arg19[%c0_58, %c0_59] : memref<64x128xf32, #tpu.memory_space<vmem>>, vector<64x128xf32>
    %cst_60 = arith.constant dense<0.000000e+00> : vector<2x128xf32>
    %116 = tpu.matmul %114, %115, %cst_60 {dimension_numbers = #tpu.dot_dimension_numbers<[1], [0], [0], [1], [0, 0, 1, 1], [], []>} : vector<2x64xf32>, vector<64x128xf32>, vector<2x128xf32> -> vector<2x128xf32>
    %c0_61 = arith.constant 0 : index
    %c0_62 = arith.constant 0 : index
    %117 = vector.load %arg20[%c0_61, %c0_62] : memref<1x128xf32, #tpu.memory_space<vmem>>, vector<1x128xf32>
    %118 = vector.broadcast %117 : vector<1x128xf32> to vector<2x128xf32>
    %119 = arith.addf %116, %118 : vector<2x128xf32>
    %120 = arith.negf %119 : vector<2x128xf32>
    %121 = math.exp %120 : vector<2x128xf32>
    %cst_63 = arith.constant 1.000000e+00 : f32
    %122 = vector.broadcast %cst_63 : f32 to vector<2x128xf32>
    %123 = arith.addf %122, %121 : vector<2x128xf32>
    %124 = arith.divf %122, %123 : vector<2x128xf32>
    %125 = vector.extract_strided_slice %124 {offsets = [0, 0], sizes = [2, 32], strides = [1, 1]} : vector<2x128xf32> to vector<2x32xf32>
    %126 = vector.extract_strided_slice %124 {offsets = [0, 32], sizes = [2, 32], strides = [1, 1]} : vector<2x128xf32> to vector<2x32xf32>
    %127 = vector.extract_strided_slice %124 {offsets = [0, 96], sizes = [2, 32], strides = [1, 1]} : vector<2x128xf32> to vector<2x32xf32>
    %128 = vector.extract_strided_slice %119 {offsets = [0, 64], sizes = [2, 32], strides = [1, 1]} : vector<2x128xf32> to vector<2x32xf32>
    %129 = math.tanh %128 : vector<2x32xf32>
    %130 = arith.mulf %126, %63 : vector<2x32xf32>
    %131 = arith.mulf %125, %129 : vector<2x32xf32>
    %132 = arith.addf %130, %131 : vector<2x32xf32>
    %133 = math.tanh %132 : vector<2x32xf32>
    %134 = arith.mulf %127, %133 : vector<2x32xf32>
    %cst_64 = arith.constant dense<0.000000e+00> : vector<2x32xf32>
    %135 = tpu.matmul %134, %54, %cst_64 {dimension_numbers = #tpu.dot_dimension_numbers<[1], [0], [0], [1], [0, 0, 1, 1], [], []>} : vector<2x32xf32>, vector<32x32xf32>, vector<2x32xf32> -> vector<2x32xf32>
    %136 = vector.broadcast %55 : vector<1x32xf32> to vector<2x32xf32>
    %137 = arith.addf %135, %136 : vector<2x32xf32>
    %138 = vector.shape_cast %137 : vector<2x32xf32> to vector<2x1x32xf32>
    %139 = vector.broadcast %138 : vector<2x1x32xf32> to vector<2x56x32xf32>
    %140 = arith.addf %50, %139 : vector<2x56x32xf32>
    %cst_65 = arith.constant 0.000000e+00 : f32
    %141 = vector.broadcast %cst_65 : f32 to vector<2x56x32xf32>
    %142 = arith.maximumf %140, %141 : vector<2x56x32xf32>
    %143 = vector.broadcast %57 : vector<1x1x32xf32> to vector<2x56x32xf32>
    %144 = arith.mulf %142, %143 : vector<2x56x32xf32>
    %cst_66 = arith.constant dense<0.000000e+00> : vector<2x56xf32>
    %145 = vector.multi_reduction <add>, %144, %cst_66 [2] : vector<2x56x32xf32> to vector<2x56xf32>
    %146 = vector.broadcast %58 : vector<1x1xf32> to vector<2x56xf32>
    %147 = arith.addf %145, %146 : vector<2x56xf32>
    %cst_67 = arith.constant -1.000000e+30 : f32
    %148 = vector.broadcast %cst_67 : f32 to vector<2x56xf32>
    %149 = arith.select %53, %147, %148 : vector<2x56xi1>, vector<2x56xf32>
    %cst_68 = arith.constant dense<0xFF800000> : vector<2xf32>
    %150 = vector.multi_reduction <maximumf>, %149, %cst_68 [1] : vector<2x56xf32> to vector<2xf32>
    %151 = vector.shape_cast %150 : vector<2xf32> to vector<2x1xf32>
    %152 = vector.broadcast %151 : vector<2x1xf32> to vector<2x56xf32>
    %153 = arith.subf %149, %152 : vector<2x56xf32>
    %154 = math.exp %153 : vector<2x56xf32>
    %cst_69 = arith.constant dense<0.000000e+00> : vector<2xf32>
    %155 = vector.multi_reduction <add>, %154, %cst_69 [1] : vector<2x56xf32> to vector<2xf32>
    %156 = vector.shape_cast %155 : vector<2xf32> to vector<2x1xf32>
    %157 = tpu.reciprocal %156 {approx = true} : vector<2x1xf32> -> vector<2x1xf32>
    %158 = vector.broadcast %157 : vector<2x1xf32> to vector<2x56xf32>
    %159 = arith.mulf %154, %158 : vector<2x56xf32>
    %160 = vector.shape_cast %159 : vector<2x56xf32> to vector<2x56x1xf32>
    %161 = vector.broadcast %160 : vector<2x56x1xf32> to vector<2x56x64xf32>
    %162 = arith.mulf %27, %161 : vector<2x56x64xf32>
    %cst_70 = arith.constant dense<0.000000e+00> : vector<2x64xf32>
    %163 = vector.multi_reduction <add>, %162, %cst_70 [1] : vector<2x56x64xf32> to vector<2x64xf32>
    %164 = tpu.concatenate %163, %113 in 1 : vector<2x64xf32>, vector<2x32xf32> -> vector<2x96xf32>
    %c0_71 = arith.constant 0 : index
    %c0_72 = arith.constant 0 : index
    %165 = vector.load %arg17[%c0_71, %c0_72] : memref<96x128xf32, #tpu.memory_space<vmem>>, vector<96x128xf32>
    %cst_73 = arith.constant dense<0.000000e+00> : vector<2x128xf32>
    %166 = tpu.matmul %164, %165, %cst_73 {dimension_numbers = #tpu.dot_dimension_numbers<[1], [0], [0], [1], [0, 0, 1, 1], [], []>} : vector<2x96xf32>, vector<96x128xf32>, vector<2x128xf32> -> vector<2x128xf32>
    %c0_74 = arith.constant 0 : index
    %c0_75 = arith.constant 0 : index
    %167 = vector.load %arg18[%c0_74, %c0_75] : memref<1x128xf32, #tpu.memory_space<vmem>>, vector<1x128xf32>
    %168 = vector.broadcast %167 : vector<1x128xf32> to vector<2x128xf32>
    %169 = arith.addf %166, %168 : vector<2x128xf32>
    %170 = arith.negf %169 : vector<2x128xf32>
    %171 = math.exp %170 : vector<2x128xf32>
    %cst_76 = arith.constant 1.000000e+00 : f32
    %172 = vector.broadcast %cst_76 : f32 to vector<2x128xf32>
    %173 = arith.addf %172, %171 : vector<2x128xf32>
    %174 = arith.divf %172, %173 : vector<2x128xf32>
    %175 = vector.extract_strided_slice %174 {offsets = [0, 0], sizes = [2, 32], strides = [1, 1]} : vector<2x128xf32> to vector<2x32xf32>
    %176 = vector.extract_strided_slice %174 {offsets = [0, 32], sizes = [2, 32], strides = [1, 1]} : vector<2x128xf32> to vector<2x32xf32>
    %177 = vector.extract_strided_slice %174 {offsets = [0, 96], sizes = [2, 32], strides = [1, 1]} : vector<2x128xf32> to vector<2x32xf32>
    %178 = vector.extract_strided_slice %169 {offsets = [0, 64], sizes = [2, 32], strides = [1, 1]} : vector<2x128xf32> to vector<2x32xf32>
    %179 = math.tanh %178 : vector<2x32xf32>
    %180 = arith.mulf %176, %111 : vector<2x32xf32>
    %181 = arith.mulf %175, %179 : vector<2x32xf32>
    %182 = arith.addf %180, %181 : vector<2x32xf32>
    %183 = math.tanh %182 : vector<2x32xf32>
    %184 = arith.mulf %177, %183 : vector<2x32xf32>
    %185 = tpu.concatenate %184, %134 in 1 : vector<2x32xf32>, vector<2x32xf32> -> vector<2x64xf32>
    %c0_77 = arith.constant 0 : index
    %c0_78 = arith.constant 0 : index
    %186 = vector.load %arg19[%c0_77, %c0_78] : memref<64x128xf32, #tpu.memory_space<vmem>>, vector<64x128xf32>
    %cst_79 = arith.constant dense<0.000000e+00> : vector<2x128xf32>
    %187 = tpu.matmul %185, %186, %cst_79 {dimension_numbers = #tpu.dot_dimension_numbers<[1], [0], [0], [1], [0, 0, 1, 1], [], []>} : vector<2x64xf32>, vector<64x128xf32>, vector<2x128xf32> -> vector<2x128xf32>
    %c0_80 = arith.constant 0 : index
    %c0_81 = arith.constant 0 : index
    %188 = vector.load %arg20[%c0_80, %c0_81] : memref<1x128xf32, #tpu.memory_space<vmem>>, vector<1x128xf32>
    %189 = vector.broadcast %188 : vector<1x128xf32> to vector<2x128xf32>
    %190 = arith.addf %187, %189 : vector<2x128xf32>
    %191 = arith.negf %190 : vector<2x128xf32>
    %192 = math.exp %191 : vector<2x128xf32>
    %cst_82 = arith.constant 1.000000e+00 : f32
    %193 = vector.broadcast %cst_82 : f32 to vector<2x128xf32>
    %194 = arith.addf %193, %192 : vector<2x128xf32>
    %195 = arith.divf %193, %194 : vector<2x128xf32>
    %196 = vector.extract_strided_slice %195 {offsets = [0, 0], sizes = [2, 32], strides = [1, 1]} : vector<2x128xf32> to vector<2x32xf32>
    %197 = vector.extract_strided_slice %195 {offsets = [0, 32], sizes = [2, 32], strides = [1, 1]} : vector<2x128xf32> to vector<2x32xf32>
    %198 = vector.extract_strided_slice %195 {offsets = [0, 96], sizes = [2, 32], strides = [1, 1]} : vector<2x128xf32> to vector<2x32xf32>
    %199 = vector.extract_strided_slice %190 {offsets = [0, 64], sizes = [2, 32], strides = [1, 1]} : vector<2x128xf32> to vector<2x32xf32>
    %200 = math.tanh %199 : vector<2x32xf32>
    %201 = arith.mulf %197, %132 : vector<2x32xf32>
    %202 = arith.mulf %196, %200 : vector<2x32xf32>
    %203 = arith.addf %201, %202 : vector<2x32xf32>
    %204 = math.tanh %203 : vector<2x32xf32>
    %205 = arith.mulf %198, %204 : vector<2x32xf32>
    %206 = tpu.concatenate %134, %205 in 0 : vector<2x32xf32>, vector<2x32xf32> -> vector<4x32xf32>
    %207 = tpu.concatenate %92, %163 in 0 : vector<2x64xf32>, vector<2x64xf32> -> vector<4x64xf32>
    %208 = tpu.concatenate %206, %207 in 1 : vector<4x32xf32>, vector<4x64xf32> -> vector<4x96xf32>
    %c0_83 = arith.constant 0 : index
    %c0_84 = arith.constant 0 : index
    %209 = vector.load %arg21[%c0_83, %c0_84] : memref<96x32xf32, #tpu.memory_space<vmem>>, vector<96x32xf32>
    %cst_85 = arith.constant dense<0.000000e+00> : vector<4x32xf32>
    %210 = tpu.matmul %208, %209, %cst_85 {dimension_numbers = #tpu.dot_dimension_numbers<[1], [0], [0], [1], [0, 0, 1, 1], [], []>} : vector<4x96xf32>, vector<96x32xf32>, vector<4x32xf32> -> vector<4x32xf32>
    %c0_86 = arith.constant 0 : index
    %c0_87 = arith.constant 0 : index
    %211 = vector.load %arg22[%c0_86, %c0_87] : memref<1x32xf32, #tpu.memory_space<vmem>>, vector<1x32xf32>
    %212 = vector.broadcast %211 : vector<1x32xf32> to vector<4x32xf32>
    %213 = arith.addf %210, %212 : vector<4x32xf32>
    %214 = math.tanh %213 : vector<4x32xf32>
    %c0_88 = arith.constant 0 : index
    %c0_89 = arith.constant 0 : index
    %215 = vector.load %arg23[%c0_88, %c0_89] : memref<32x32xf32, #tpu.memory_space<vmem>>, vector<32x32xf32>
    %cst_90 = arith.constant dense<0.000000e+00> : vector<4x32xf32>
    %216 = tpu.matmul %214, %215, %cst_90 {dimension_numbers = #tpu.dot_dimension_numbers<[1], [0], [0], [1], [0, 0, 1, 1], [], []>} : vector<4x32xf32>, vector<32x32xf32>, vector<4x32xf32> -> vector<4x32xf32>
    %c0_91 = arith.constant 0 : index
    %c0_92 = arith.constant 0 : index
    %217 = vector.load %arg24[%c0_91, %c0_92] : memref<1x32xf32, #tpu.memory_space<vmem>>, vector<1x32xf32>
    %218 = vector.broadcast %217 : vector<1x32xf32> to vector<4x32xf32>
    %219 = arith.addf %216, %218 : vector<4x32xf32>
    %c0_93 = arith.constant 0 : index
    %c0_94 = arith.constant 0 : index
    %220 = vector.load %arg25[%c0_93, %c0_94] : memref<32x64xf32, #tpu.memory_space<vmem>>, vector<32x64xf32>
    %cst_95 = arith.constant dense<0.000000e+00> : vector<4x64xf32>
    %221 = tpu.matmul %206, %220, %cst_95 {dimension_numbers = #tpu.dot_dimension_numbers<[1], [0], [0], [1], [0, 0, 1, 1], [], []>} : vector<4x32xf32>, vector<32x64xf32>, vector<4x64xf32> -> vector<4x64xf32>
    %c0_96 = arith.constant 0 : index
    %c0_97 = arith.constant 0 : index
    %222 = vector.load %arg26[%c0_96, %c0_97] : memref<1x64xf32, #tpu.memory_space<vmem>>, vector<1x64xf32>
    %223 = vector.broadcast %222 : vector<1x64xf32> to vector<4x64xf32>
    %224 = arith.addf %221, %223 : vector<4x64xf32>
    %225 = math.tanh %224 : vector<4x64xf32>
    %c0_98 = arith.constant 0 : index
    %c0_99 = arith.constant 0 : index
    %226 = vector.load %arg27[%c0_98, %c0_99] : memref<64x128xf32, #tpu.memory_space<vmem>>, vector<64x128xf32>
    %cst_100 = arith.constant dense<0.000000e+00> : vector<4x128xf32>
    %227 = tpu.matmul %225, %226, %cst_100 {dimension_numbers = #tpu.dot_dimension_numbers<[1], [0], [0], [1], [0, 0, 1, 1], [], []>} : vector<4x64xf32>, vector<64x128xf32>, vector<4x128xf32> -> vector<4x128xf32>
    %c0_101 = arith.constant 0 : index
    %c0_102 = arith.constant 0 : index
    %228 = vector.load %arg28[%c0_101, %c0_102] : memref<1x128xf32, #tpu.memory_space<vmem>>, vector<1x128xf32>
    %229 = vector.broadcast %228 : vector<1x128xf32> to vector<4x128xf32>
    %230 = arith.addf %227, %229 : vector<4x128xf32>
    %c0_103 = arith.constant 0 : index
    %c0_104 = arith.constant 0 : index
    %231 = vector.load %arg36[%c0_103, %c0_104] : memref<4x128xf32, #tpu.memory_space<vmem>>, vector<4x128xf32>
    tpu.vector_store %arg36[%c0_103, %c0_104], %230 {strides = array<i32>} : memref<4x128xf32, #tpu.memory_space<vmem>>, vector<4x128xf32>,
    %c0_105 = arith.constant 0 : index
    %c0_106 = arith.constant 0 : index
    %232 = vector.load %arg29[%c0_105, %c0_106] : memref<32x64xf32, #tpu.memory_space<vmem>>, vector<32x64xf32>
    %cst_107 = arith.constant dense<0.000000e+00> : vector<4x64xf32>
    %233 = tpu.matmul %219, %232, %cst_107 {dimension_numbers = #tpu.dot_dimension_numbers<[1], [0], [0], [1], [0, 0, 1, 1], [], []>} : vector<4x32xf32>, vector<32x64xf32>, vector<4x64xf32> -> vector<4x64xf32>
    %c0_108 = arith.constant 0 : index
    %c0_109 = arith.constant 0 : index
    %234 = vector.load %arg30[%c0_108, %c0_109] : memref<1x64xf32, #tpu.memory_space<vmem>>, vector<1x64xf32>
    %235 = vector.broadcast %234 : vector<1x64xf32> to vector<4x64xf32>
    %236 = arith.addf %233, %235 : vector<4x64xf32>
    %237 = math.tanh %236 : vector<4x64xf32>
    %238 = vector.extract_strided_slice %237 {offsets = [0, 0], sizes = [4, 32], strides = [1, 1]} : vector<4x64xf32> to vector<4x32xf32>
    %239 = vector.extract_strided_slice %237 {offsets = [0, 32], sizes = [4, 32], strides = [1, 1]} : vector<4x64xf32> to vector<4x32xf32>
    %240 = tpu.concatenate %219, %238 in 1 : vector<4x32xf32>, vector<4x32xf32> -> vector<4x64xf32>
    %c0_110 = arith.constant 0 : index
    %c0_111 = arith.constant 0 : index
    %241 = vector.load %arg31[%c0_110, %c0_111] : memref<64x128xf32, #tpu.memory_space<vmem>>, vector<64x128xf32>
    %cst_112 = arith.constant dense<0.000000e+00> : vector<4x128xf32>
    %242 = tpu.matmul %240, %241, %cst_112 {dimension_numbers = #tpu.dot_dimension_numbers<[1], [0], [0], [1], [0, 0, 1, 1], [], []>} : vector<4x64xf32>, vector<64x128xf32>, vector<4x128xf32> -> vector<4x128xf32>
    %c0_113 = arith.constant 0 : index
    %c0_114 = arith.constant 0 : index
    %243 = vector.load %arg32[%c0_113, %c0_114] : memref<1x128xf32, #tpu.memory_space<vmem>>, vector<1x128xf32>
    %244 = vector.broadcast %243 : vector<1x128xf32> to vector<4x128xf32>
    %245 = arith.addf %242, %244 : vector<4x128xf32>
    %246 = arith.negf %245 : vector<4x128xf32>
    %247 = math.exp %246 : vector<4x128xf32>
    %cst_115 = arith.constant 1.000000e+00 : f32
    %248 = vector.broadcast %cst_115 : f32 to vector<4x128xf32>
    %249 = arith.addf %248, %247 : vector<4x128xf32>
    %250 = arith.divf %248, %249 : vector<4x128xf32>
    %251 = vector.extract_strided_slice %250 {offsets = [0, 0], sizes = [4, 32], strides = [1, 1]} : vector<4x128xf32> to vector<4x32xf32>
    %252 = vector.extract_strided_slice %250 {offsets = [0, 32], sizes = [4, 32], strides = [1, 1]} : vector<4x128xf32> to vector<4x32xf32>
    %253 = vector.extract_strided_slice %250 {offsets = [0, 96], sizes = [4, 32], strides = [1, 1]} : vector<4x128xf32> to vector<4x32xf32>
    %254 = vector.extract_strided_slice %245 {offsets = [0, 64], sizes = [4, 32], strides = [1, 1]} : vector<4x128xf32> to vector<4x32xf32>
    %255 = math.tanh %254 : vector<4x32xf32>
    %256 = arith.mulf %252, %239 : vector<4x32xf32>
    %257 = arith.mulf %251, %255 : vector<4x32xf32>
    %258 = arith.addf %256, %257 : vector<4x32xf32>
    %259 = math.tanh %258 : vector<4x32xf32>
    %260 = arith.mulf %253, %259 : vector<4x32xf32>
    %c0_116 = arith.constant 0 : index
    %c0_117 = arith.constant 0 : index
    %c0_118 = arith.constant 0 : index
    %261 = vector.load %arg2[%c0_116, %c0_117, %c0_118] : memref<2x4x32xf32, #tpu.memory_space<vmem>>, vector<1x4x32xf32>
    %262 = vector.shape_cast %261 : vector<1x4x32xf32> to vector<4x32xf32>
    %263 = tpu.concatenate %262, %260 in 1 : vector<4x32xf32>, vector<4x32xf32> -> vector<4x64xf32>
    %c0_119 = arith.constant 0 : index
    %c0_120 = arith.constant 0 : index
    %264 = vector.load %arg31[%c0_119, %c0_120] : memref<64x128xf32, #tpu.memory_space<vmem>>, vector<64x128xf32>
    %cst_121 = arith.constant dense<0.000000e+00> : vector<4x128xf32>
    %265 = tpu.matmul %263, %264, %cst_121 {dimension_numbers = #tpu.dot_dimension_numbers<[1], [0], [0], [1], [0, 0, 1, 1], [], []>} : vector<4x64xf32>, vector<64x128xf32>, vector<4x128xf32> -> vector<4x128xf32>
    %c0_122 = arith.constant 0 : index
    %c0_123 = arith.constant 0 : index
    %266 = vector.load %arg32[%c0_122, %c0_123] : memref<1x128xf32, #tpu.memory_space<vmem>>, vector<1x128xf32>
    %267 = vector.broadcast %266 : vector<1x128xf32> to vector<4x128xf32>
    %268 = arith.addf %265, %267 : vector<4x128xf32>
    %269 = arith.negf %268 : vector<4x128xf32>
    %270 = math.exp %269 : vector<4x128xf32>
    %cst_124 = arith.constant 1.000000e+00 : f32
    %271 = vector.broadcast %cst_124 : f32 to vector<4x128xf32>
    %272 = arith.addf %271, %270 : vector<4x128xf32>
    %273 = arith.divf %271, %272 : vector<4x128xf32>
    %274 = vector.extract_strided_slice %273 {offsets = [0, 0], sizes = [4, 32], strides = [1, 1]} : vector<4x128xf32> to vector<4x32xf32>
    %275 = vector.extract_strided_slice %273 {offsets = [0, 32], sizes = [4, 32], strides = [1, 1]} : vector<4x128xf32> to vector<4x32xf32>
    %276 = vector.extract_strided_slice %273 {offsets = [0, 96], sizes = [4, 32], strides = [1, 1]} : vector<4x128xf32> to vector<4x32xf32>
    %277 = vector.extract_strided_slice %268 {offsets = [0, 64], sizes = [4, 32], strides = [1, 1]} : vector<4x128xf32> to vector<4x32xf32>
    %278 = math.tanh %277 : vector<4x32xf32>
    %279 = arith.mulf %275, %258 : vector<4x32xf32>
    %280 = arith.mulf %274, %278 : vector<4x32xf32>
    %281 = arith.addf %279, %280 : vector<4x32xf32>
    %282 = math.tanh %281 : vector<4x32xf32>
    %283 = arith.mulf %276, %282 : vector<4x32xf32>
    %284 = tpu.concatenate %219, %283 in 1 : vector<4x32xf32>, vector<4x32xf32> -> vector<4x64xf32>
    %c0_125 = arith.constant 0 : index
    %c0_126 = arith.constant 0 : index
    %285 = vector.load %arg31[%c0_125, %c0_126] : memref<64x128xf32, #tpu.memory_space<vmem>>, vector<64x128xf32>
    %cst_127 = arith.constant dense<0.000000e+00> : vector<4x128xf32>
    %286 = tpu.matmul %284, %285, %cst_127 {dimension_numbers = #tpu.dot_dimension_numbers<[1], [0], [0], [1], [0, 0, 1, 1], [], []>} : vector<4x64xf32>, vector<64x128xf32>, vector<4x128xf32> -> vector<4x128xf32>
    %c0_128 = arith.constant 0 : index
    %c0_129 = arith.constant 0 : index
    %287 = vector.load %arg32[%c0_128, %c0_129] : memref<1x128xf32, #tpu.memory_space<vmem>>, vector<1x128xf32>
    %288 = vector.broadcast %287 : vector<1x128xf32> to vector<4x128xf32>
    %289 = arith.addf %286, %288 : vector<4x128xf32>
    %290 = arith.negf %289 : vector<4x128xf32>
    %291 = math.exp %290 : vector<4x128xf32>
    %cst_130 = arith.constant 1.000000e+00 : f32
    %292 = vector.broadcast %cst_130 : f32 to vector<4x128xf32>
    %293 = arith.addf %292, %291 : vector<4x128xf32>
    %294 = arith.divf %292, %293 : vector<4x128xf32>
    %295 = vector.extract_strided_slice %294 {offsets = [0, 0], sizes = [4, 32], strides = [1, 1]} : vector<4x128xf32> to vector<4x32xf32>
    %296 = vector.extract_strided_slice %294 {offsets = [0, 32], sizes = [4, 32], strides = [1, 1]} : vector<4x128xf32> to vector<4x32xf32>
    %297 = vector.extract_strided_slice %294 {offsets = [0, 96], sizes = [4, 32], strides = [1, 1]} : vector<4x128xf32> to vector<4x32xf32>
    %298 = vector.extract_strided_slice %289 {offsets = [0, 64], sizes = [4, 32], strides = [1, 1]} : vector<4x128xf32> to vector<4x32xf32>
    %299 = math.tanh %298 : vector<4x32xf32>
    %300 = arith.mulf %296, %281 : vector<4x32xf32>
    %301 = arith.mulf %295, %299 : vector<4x32xf32>
    %302 = arith.addf %300, %301 : vector<4x32xf32>
    %303 = math.tanh %302 : vector<4x32xf32>
    %304 = arith.mulf %297, %303 : vector<4x32xf32>
    %c1 = arith.constant 1 : index
    %c0_131 = arith.constant 0 : index
    %c0_132 = arith.constant 0 : index
    %305 = vector.load %arg2[%c1, %c0_131, %c0_132] : memref<2x4x32xf32, #tpu.memory_space<vmem>>, vector<1x4x32xf32>
    %306 = vector.shape_cast %305 : vector<1x4x32xf32> to vector<4x32xf32>
    %307 = tpu.concatenate %306, %304 in 1 : vector<4x32xf32>, vector<4x32xf32> -> vector<4x64xf32>
    %c0_133 = arith.constant 0 : index
    %c0_134 = arith.constant 0 : index
    %308 = vector.load %arg31[%c0_133, %c0_134] : memref<64x128xf32, #tpu.memory_space<vmem>>, vector<64x128xf32>
    %cst_135 = arith.constant dense<0.000000e+00> : vector<4x128xf32>
    %309 = tpu.matmul %307, %308, %cst_135 {dimension_numbers = #tpu.dot_dimension_numbers<[1], [0], [0], [1], [0, 0, 1, 1], [], []>} : vector<4x64xf32>, vector<64x128xf32>, vector<4x128xf32> -> vector<4x128xf32>
    %c0_136 = arith.constant 0 : index
    %c0_137 = arith.constant 0 : index
    %310 = vector.load %arg32[%c0_136, %c0_137] : memref<1x128xf32, #tpu.memory_space<vmem>>, vector<1x128xf32>
    %311 = vector.broadcast %310 : vector<1x128xf32> to vector<4x128xf32>
    %312 = arith.addf %309, %311 : vector<4x128xf32>
    %313 = arith.negf %312 : vector<4x128xf32>
    %314 = math.exp %313 : vector<4x128xf32>
    %cst_138 = arith.constant 1.000000e+00 : f32
    %315 = vector.broadcast %cst_138 : f32 to vector<4x128xf32>
    %316 = arith.addf %315, %314 : vector<4x128xf32>
    %317 = arith.divf %315, %316 : vector<4x128xf32>
    %318 = vector.extract_strided_slice %317 {offsets = [0, 0], sizes = [4, 32], strides = [1, 1]} : vector<4x128xf32> to vector<4x32xf32>
    %319 = vector.extract_strided_slice %317 {offsets = [0, 32], sizes = [4, 32], strides = [1, 1]} : vector<4x128xf32> to vector<4x32xf32>
    %320 = vector.extract_strided_slice %317 {offsets = [0, 96], sizes = [4, 32], strides = [1, 1]} : vector<4x128xf32> to vector<4x32xf32>
    %321 = vector.extract_strided_slice %312 {offsets = [0, 64], sizes = [4, 32], strides = [1, 1]} : vector<4x128xf32> to vector<4x32xf32>
    %322 = math.tanh %321 : vector<4x32xf32>
    %323 = arith.mulf %319, %302 : vector<4x32xf32>
    %324 = arith.mulf %318, %322 : vector<4x32xf32>
    %325 = arith.addf %323, %324 : vector<4x32xf32>
    %326 = math.tanh %325 : vector<4x32xf32>
    %327 = arith.mulf %320, %326 : vector<4x32xf32>
    %328 = tpu.concatenate %283, %327 in 0 : vector<4x32xf32>, vector<4x32xf32> -> vector<8x32xf32>
    %c0_139 = arith.constant 0 : index
    %c0_140 = arith.constant 0 : index
    %329 = vector.load %arg33[%c0_139, %c0_140] : memref<32x128xf32, #tpu.memory_space<vmem>>, vector<32x128xf32>
    %cst_141 = arith.constant dense<0.000000e+00> : vector<8x128xf32>
    %330 = tpu.matmul %328, %329, %cst_141 {dimension_numbers = #tpu.dot_dimension_numbers<[1], [0], [0], [1], [0, 0, 1, 1], [], []>} : vector<8x32xf32>, vector<32x128xf32>, vector<8x128xf32> -> vector<8x128xf32>
    %c0_142 = arith.constant 0 : index
    %c0_143 = arith.constant 0 : index
    %331 = vector.load %arg34[%c0_142, %c0_143] : memref<1x128xf32, #tpu.memory_space<vmem>>, vector<1x128xf32>
    %332 = vector.broadcast %331 : vector<1x128xf32> to vector<8x128xf32>
    %333 = arith.addf %330, %332 : vector<8x128xf32>
    %c0_144 = arith.constant 0 : index
    %c0_145 = arith.constant 0 : index
    %334 = vector.load %arg37[%c0_144, %c0_145] : memref<8x128xf32, #tpu.memory_space<vmem>>, vector<8x128xf32>
    tpu.vector_store %arg37[%c0_144, %c0_145], %333 {strides = array<i32>} : memref<8x128xf32, #tpu.memory_space<vmem>>, vector<8x128xf32>,
    return
  }
  func.func @transform_0(%arg0: i32) -> (i32, i32) {
    %c0_i32 = arith.constant 0 : i32
    %c0_i32_0 = arith.constant 0 : i32
    %c0_i32_1 = arith.constant 0 : i32
    return %c0_i32, %c0_i32_0 : i32, i32
  }
  func.func @transform_1(%arg0: i32) -> (i32, i32, i32) {
    %c0_i32 = arith.constant 0 : i32
    %c0_i32_0 = arith.constant 0 : i32
    %c0_i32_1 = arith.constant 0 : i32
    %c0_i32_2 = arith.constant 0 : i32
    return %c0_i32, %c0_i32_0, %c0_i32_1 : i32, i32, i32
  }
  func.func @transform_2(%arg0: i32) -> (i32, i32) {
    %c0_i32 = arith.constant 0 : i32
    %c0_i32_0 = arith.constant 0 : i32
    %c0_i32_1 = arith.constant 0 : i32
    return %c0_i32, %c0_i32_0 : i32, i32
  }
  func.func @transform_3(%arg0: i32) -> (i32, i32) {
    %c0_i32 = arith.constant 0 : i32
    %c0_i32_0 = arith.constant 0 : i32
    %c0_i32_1 = arith.constant 0 : i32
    return %c0_i32, %c0_i32_0 : i32, i32
  }
  func.func @transform_4(%arg0: i32) -> (i32, i32) {
    %c0_i32 = arith.constant 0 : i32
    %c0_i32_0 = arith.constant 0 : i32
    %c0_i32_1 = arith.constant 0 : i32
    return %c0_i32, %c0_i32_0 : i32, i32
  }
  func.func @transform_5(%arg0: i32) -> (i32, i32) {
    %c0_i32 = arith.constant 0 : i32
    %c0_i32_0 = arith.constant 0 : i32
    %c0_i32_1 = arith.constant 0 : i32
    return %c0_i32, %c0_i32_0 : i32, i32
  }
  func.func @transform_6(%arg0: i32) -> (i32, i32) {
    %c0_i32 = arith.constant 0 : i32
    %c0_i32_0 = arith.constant 0 : i32
    %c0_i32_1 = arith.constant 0 : i32
    return %c0_i32, %c0_i32_0 : i32, i32
  }
  func.func @transform_7(%arg0: i32) -> (i32, i32) {
    %c0_i32 = arith.constant 0 : i32
    %c0_i32_0 = arith.constant 0 : i32
    %c0_i32_1 = arith.constant 0 : i32
    return %c0_i32, %c0_i32_0 : i32, i32
  }
  func.func @transform_8(%arg0: i32) -> (i32, i32) {
    %c0_i32 = arith.constant 0 : i32
    %c0_i32_0 = arith.constant 0 : i32
    %c0_i32_1 = arith.constant 0 : i32
    return %c0_i32, %c0_i32_0 : i32, i32
  }
  func.func @transform_9(%arg0: i32) -> (i32, i32) {
    %c0_i32 = arith.constant 0 : i32
    %c0_i32_0 = arith.constant 0 : i32
    %c0_i32_1 = arith.constant 0 : i32
    return %c0_i32, %c0_i32_0 : i32, i32
  }
  func.func @transform_10(%arg0: i32) -> (i32, i32) {
    %c0_i32 = arith.constant 0 : i32
    %c0_i32_0 = arith.constant 0 : i32
    %c0_i32_1 = arith.constant 0 : i32
    return %c0_i32, %c0_i32_0 : i32, i32
  }
  func.func @transform_11(%arg0: i32) -> (i32, i32) {
    %c0_i32 = arith.constant 0 : i32
    %c0_i32_0 = arith.constant 0 : i32
    %c0_i32_1 = arith.constant 0 : i32
    return %c0_i32, %c0_i32_0 : i32, i32
  }
  func.func @transform_12(%arg0: i32) -> (i32, i32) {
    %c0_i32 = arith.constant 0 : i32
    %c0_i32_0 = arith.constant 0 : i32
    %c0_i32_1 = arith.constant 0 : i32
    return %c0_i32, %c0_i32_0 : i32, i32
  }
  func.func @transform_13(%arg0: i32) -> (i32, i32) {
    %c0_i32 = arith.constant 0 : i32
    %c0_i32_0 = arith.constant 0 : i32
    %c0_i32_1 = arith.constant 0 : i32
    return %c0_i32, %c0_i32_0 : i32, i32
  }
  func.func @transform_14(%arg0: i32) -> (i32, i32) {
    %c0_i32 = arith.constant 0 : i32
    %c0_i32_0 = arith.constant 0 : i32
    %c0_i32_1 = arith.constant 0 : i32
    return %c0_i32, %c0_i32_0 : i32, i32
  }
  func.func @transform_15(%arg0: i32) -> (i32, i32) {
    %c0_i32 = arith.constant 0 : i32
    %c0_i32_0 = arith.constant 0 : i32
    %c0_i32_1 = arith.constant 0 : i32
    return %c0_i32, %c0_i32_0 : i32, i32
  }
  func.func @transform_16(%arg0: i32) -> (i32, i32) {
    %c0_i32 = arith.constant 0 : i32
    %c0_i32_0 = arith.constant 0 : i32
    %c0_i32_1 = arith.constant 0 : i32
    return %c0_i32, %c0_i32_0 : i32, i32
  }
  func.func @transform_17(%arg0: i32) -> (i32, i32) {
    %c0_i32 = arith.constant 0 : i32
    %c0_i32_0 = arith.constant 0 : i32
    %c0_i32_1 = arith.constant 0 : i32
    return %c0_i32, %c0_i32_0 : i32, i32
  }
  func.func @transform_18(%arg0: i32) -> (i32, i32) {
    %c0_i32 = arith.constant 0 : i32
    %c0_i32_0 = arith.constant 0 : i32
    %c0_i32_1 = arith.constant 0 : i32
    return %c0_i32, %c0_i32_0 : i32, i32
  }
  func.func @transform_19(%arg0: i32) -> (i32, i32) {
    %c0_i32 = arith.constant 0 : i32
    %c0_i32_0 = arith.constant 0 : i32
    %c0_i32_1 = arith.constant 0 : i32
    return %c0_i32, %c0_i32_0 : i32, i32
  }
  func.func @transform_20(%arg0: i32) -> (i32, i32) {
    %c0_i32 = arith.constant 0 : i32
    %c0_i32_0 = arith.constant 0 : i32
    %c0_i32_1 = arith.constant 0 : i32
    return %c0_i32, %c0_i32_0 : i32, i32
  }
  func.func @transform_21(%arg0: i32) -> (i32, i32) {
    %c0_i32 = arith.constant 0 : i32
    %c0_i32_0 = arith.constant 0 : i32
    %c0_i32_1 = arith.constant 0 : i32
    return %c0_i32, %c0_i32_0 : i32, i32
  }
  func.func @transform_22(%arg0: i32) -> (i32, i32) {
    %c0_i32 = arith.constant 0 : i32
    %c0_i32_0 = arith.constant 0 : i32
    %c0_i32_1 = arith.constant 0 : i32
    return %c0_i32, %c0_i32_0 : i32, i32
  }
  func.func @transform_23(%arg0: i32) -> (i32, i32) {
    %c0_i32 = arith.constant 0 : i32
    %c0_i32_0 = arith.constant 0 : i32
    %c0_i32_1 = arith.constant 0 : i32
    return %c0_i32, %c0_i32_0 : i32, i32
  }
  func.func @transform_24(%arg0: i32) -> (i32, i32) {
    %c0_i32 = arith.constant 0 : i32
    %c0_i32_0 = arith.constant 0 : i32
    %c0_i32_1 = arith.constant 0 : i32
    return %c0_i32, %c0_i32_0 : i32, i32
  }
  func.func @transform_25(%arg0: i32) -> (i32, i32) {
    %c0_i32 = arith.constant 0 : i32
    %c0_i32_0 = arith.constant 0 : i32
    %c0_i32_1 = arith.constant 0 : i32
    return %c0_i32, %c0_i32_0 : i32, i32
  }
  func.func @transform_26(%arg0: i32) -> (i32, i32) {
    %c0_i32 = arith.constant 0 : i32
    %c0_i32_0 = arith.constant 0 : i32
    %c0_i32_1 = arith.constant 0 : i32
    return %c0_i32, %c0_i32_0 : i32, i32
  }
  func.func @transform_27(%arg0: i32) -> (i32, i32) {
    %c0_i32 = arith.constant 0 : i32
    %c0_i32_0 = arith.constant 0 : i32
    %c0_i32_1 = arith.constant 0 : i32
    return %c0_i32, %c0_i32_0 : i32, i32
  }
  func.func @transform_28(%arg0: i32) -> (i32, i32) {
    %c0_i32 = arith.constant 0 : i32
    %c0_i32_0 = arith.constant 0 : i32
    %c0_i32_1 = arith.constant 0 : i32
    return %c0_i32, %c0_i32_0 : i32, i32
  }
  func.func @transform_29(%arg0: i32) -> (i32, i32) {
    %c0_i32 = arith.constant 0 : i32
    %c0_i32_0 = arith.constant 0 : i32
    %c0_i32_1 = arith.constant 0 : i32
    return %c0_i32, %c0_i32_0 : i32, i32
  }
  func.func @transform_30(%arg0: i32) -> (i32, i32) {
    %c0_i32 = arith.constant 0 : i32
    %c0_i32_0 = arith.constant 0 : i32
    %c0_i32_1 = arith.constant 0 : i32
    return %c0_i32, %c0_i32_0 : i32, i32
  }
  func.func @transform_31(%arg0: i32) -> (i32, i32) {
    %c0_i32 = arith.constant 0 : i32
    %c0_i32_0 = arith.constant 0 : i32
    %c0_i32_1 = arith.constant 0 : i32
    return %c0_i32, %c0_i32_0 : i32, i32
  }
  func.func @transform_32(%arg0: i32) -> (i32, i32) {
    %c0_i32 = arith.constant 0 : i32
    %c0_i32_0 = arith.constant 0 : i32
    %c0_i32_1 = arith.constant 0 : i32
    return %c0_i32, %c0_i32_0 : i32, i32
  }
  func.func @transform_33(%arg0: i32) -> (i32, i32) {
    %c0_i32 = arith.constant 0 : i32
    %c0_i32_0 = arith.constant 0 : i32
    %c0_i32_1 = arith.constant 0 : i32
    return %c0_i32, %c0_i32_0 : i32, i32
  }
  func.func @transform_34(%arg0: i32) -> (i32, i32) {
    %c0_i32 = arith.constant 0 : i32
    %c0_i32_0 = arith.constant 0 : i32
    %c0_i32_1 = arith.constant 0 : i32
    return %c0_i32, %c0_i32_0 : i32, i32
  }
  func.func @transform_35(%arg0: i32) -> (i32, i32) {
    %c0_i32 = arith.constant 0 : i32
    %c0_i32_0 = arith.constant 0 : i32
    %c0_i32_1 = arith.constant 0 : i32
    return %c0_i32, %c0_i32_0 : i32, i32
  }
  func.func @transform_36(%arg0: i32) -> (i32, i32) {
    %c0_i32 = arith.constant 0 : i32
    %c0_i32_0 = arith.constant 0 : i32
    %c0_i32_1 = arith.constant 0 : i32
    return %c0_i32, %c0_i32_0 : i32, i32
  }
}

</mosaic_0001>

<bundles_post_ra>
// kernel: caption4_forward.1
= control target key start
LH: loop header
LB: loop body
LE: loop exit
PB: predicated region body
PF: predicated region fallthrough
CT: control target
= control target key end

     0   :  { %s2914_s6 = smov 1   ;;  %s2915_s10 = smov 2   ;;  %s4286_s0 = inlined_call_operand.smem [shape: u32[37], index: -1, kind: input, shape index: {}] }
   0x1   :  { %s2964_s5 = sld [smem:[%s4286_s0]]   ;;  %s2916_s14 = smov 3  }
   0x2   :  { %s2969_s9 = sld [smem:[%s4286_s0 + %s2914_s6]]   ;;  %s2917_s18 = smov 4  }
   0x3   :  { %s2974_s13 = sld [smem:[%s4286_s0 + %s2915_s10]]   ;;  %s2918_s22 = smov 5  }
   0x4   :  { %s2979_s17 = sld [smem:[%s4286_s0 + %s2916_s14]]   ;;  %s2919_s26 = smov 6  }
   0x5   :  { %s2984_s21 = sld [smem:[%s4286_s0 + %s2917_s18]]   ;;  %s2920_s30 = smov 7  }
   0x6   :  { %s2989_s25 = sld [smem:[%s4286_s0 + %s2918_s22]]   ;;  %s2921_s4 = smov 8  }
   0x7   :  { %s2994_s29 = sld [smem:[%s4286_s0 + %s2919_s26]]   ;;  %s2922_s10 = smov 9  }
   0x8   :  { %4342 = sst [smem:[#allocation6_spill]] %s2969_s9  ;;  %s2923_s15 = smov 10  }
   0x9   :  { %s2999_s3 = sld [smem:[%s4286_s0 + %s2920_s30]]   ;;  %s2924_s20 = smov 11  }
   0xa   :  { %s3004_s8 = sld [smem:[%s4286_s0 + %s2921_s4]]   ;;  %s2925_s26 = smov 12  }
   0xb   :  { %s3009_s14 = sld [smem:[%s4286_s0 + %s2922_s10]]   ;;  %s2926_s1 = smov 13  }
   0xc   :  { %s3014_s19 = sld [smem:[%s4286_s0 + %s2923_s15]]   ;;  %s2927_s7 = smov 14  }
   0xd   :  { %s3019_s24 = sld [smem:[%s4286_s0 + %s2924_s20]]   ;;  %s2928_s15 = smov 15  }
   0xe   :  { %s3024_s30 = sld [smem:[%s4286_s0 + %s2925_s26]]   ;;  %s2929_s22 = smov 16  }
   0xf   :  { %s3029_s6 = sld [smem:[%s4286_s0 + %s2926_s1]]   ;;  %s2930_s28 = smov 17  }
  0x10   :  { %s3034_s12 = sld [smem:[%s4286_s0 + %s2927_s7]]   ;;  %s2931_s10 = smov 18  }
  0x11   :  { %s2591_s20 = sld [smem:[%s4286_s0 + %s2928_s15]]   ;;  %s2932_s16 = smov 19  }
  0x12   :  { %s3042_s27 = sld [smem:[%s4286_s0 + %s2929_s22]]   ;;  %s2933_s22 = smov 20  }
  0x13   :  { %s3047_s4 = sld [smem:[%s4286_s0 + %s2930_s28]]   ;;  %s2934_s28 = smov 21  }
  0x14   :  { %s3052_s9 = sld [smem:[%s4286_s0 + %s2931_s10]]   ;;  %s2935_s10 = smov 22  }
  0x15   :  { %s3072_s15 = sld [smem:[%s4286_s0 + %s2935_s10]]   ;;  %s2937_s23 = smov 24  }
  0x16   :  { %4343 = sst [smem:[#allocation7_spill]] %s3034_s12  ;;  %s2939_s10 = smov 26  }
  0x17   :  { %s3057_s12 = sld [smem:[%s4286_s0 + %s2932_s16]]   ;;  %v79_v0 = vstv %s2591_s20  ;;  %s2936_s16 = smov 23  }
  0x18   :  { %4344 = sst [smem:[#allocation8_spill]] %s3042_s27  ;;  %80 = vst [vmem:[#allocation2] sm:$0x1] %v79_v0  ;;  %s2938_s20 = smov 25  }
  0x19   :  { %4345 = sst [smem:[#allocation9_spill]] %s3047_s4 }
  0x1a   :  { %s3062_s27 = sld [smem:[%s4286_s0 + %s2933_s22]]  }
  0x1b   :  { %s3067_s4 = sld [smem:[%s4286_s0 + %s2934_s28]]  }
  0x1c   :  { %4349 = sst [smem:[#allocation13_spill]] %s3072_s15 }
  0x1d   :  { %4346 = sst [smem:[#allocation10_spill]] %s3057_s12  ;;  %s2940_s12 = smov 27  }
  0x1e   :  { %s3077_s22 = sld [smem:[%s4286_s0 + %s2936_s16]]  }
  0x1f   :  { %s3082_s28 = sld [smem:[%s4286_s0 + %s2937_s23]]  }
  0x20   :  { %4347 = sst [smem:[#allocation11_spill]] %s3062_s27  ;;  %s2941_s27 = smov 28  }
  0x21   :  { %4348 = sst [smem:[#allocation12_spill]] %s3067_s4  ;;  %s2943_s4 = smov 30  }
  0x22   :  { %s3087_s7 = sld [smem:[%s4286_s0 + %s2938_s20]]   ;;  %s2942_s20 = smov 29  }
  0x23   :  { %s3092_s15 = sld [smem:[%s4286_s0 + %s2939_s10]]  }
  0x24   :  { %4350 = sst [smem:[#allocation14_spill]] %s3077_s22 }
  0x25   :  { %4351 = sst [smem:[#allocation15_spill]] %s3082_s28 }
  0x26   :  { %s3097_s22 = sld [smem:[%s4286_s0 + %s2940_s12]]   ;;  %s2944_s12 = smov 31  }
  0x27   :  { %s3102_s28 = sld [smem:[%s4286_s0 + %s2941_s27]]   ;;  %s2945_s27 = smov 32  }
  0x28   :  { %4352 = sst [smem:[#allocation16_spill]] %s3087_s7 }
  0x29   :  { %4353 = sst [smem:[#allocation17_spill]] %s3092_s15 }
  0x2a   :  { %s3107_s7 = sld [smem:[%s4286_s0 + %s2942_s20]]   ;;  %s2946_s20 = smov 33  }
  0x2b   :  { %s3112_s15 = sld [smem:[%s4286_s0 + %s2943_s4]]   ;;  %s2947_s4 = smov 34  }
  0x2c   :  { %4354 = sst [smem:[#allocation18_spill]] %s3097_s22 }
  0x2d   :  { %4355 = sst [smem:[#allocation19_spill]] %s3102_s28 }
  0x2e   :  { %s3117_s22 = sld [smem:[%s4286_s0 + %s2944_s12]]   ;;  %s2948_s12 = smov 35  }
  0x2f   :  { %s3122_s28 = sld [smem:[%s4286_s0 + %s2945_s27]]   ;;  %s2949_s27 = smov 36  }
  0x30   :  { %4356 = sst [smem:[#allocation20_spill]] %s3107_s7 }
  0x31   :  { %4357 = sst [smem:[#allocation21_spill]] %s3112_s15 }
  0x32   :  { %s3127_s7 = sld [smem:[%s4286_s0 + %s2946_s20]]  }
  0x33   :  { %s3132_s15 = sld [smem:[%s4286_s0 + %s2947_s4]]  }
  0x34   :  { %4358 = sst [smem:[#allocation22_spill]] %s3117_s22 }
  0x35   :  { %4359 = sst [smem:[#allocation23_spill]] %s3122_s28 }
  0x36   :  { %s3137_s22 = sld [smem:[%s4286_s0 + %s2948_s12]]  }
  0x37   :  { %s3142_s28 = sld [smem:[%s4286_s0 + %s2949_s27]]  }
  0x38   :  { %v185_v1 = vld [vmem:[%s2974_s13 + $0x38] sm:$0xff]  ;;  %v184_v2 = vld [vmem:[%s2974_s13 + $0x30] sm:$0xff]  ;;  %v183_v3 = vld [vmem:[%s2974_s13 + $0x28] sm:$0xff] }
  0x39   :  { %283 = vmatpush.msra.mxu0 %v185_v1  ;;  %v182_v4 = vld [vmem:[%s2974_s13 + $0x20] sm:$0xff]  ;;  %v181_v5 = vld [vmem:[%s2974_s13 + $0x18] sm:$0xff]  ;;  %v180_v6 = vld [vmem:[%s2974_s13 + $0x10] sm:$0xff] }
  0x3a   :  { %v179_v7 = vld [vmem:[%s2974_s13 + $0x8] sm:$0xff] }
  0x3b   :  { %284 = vmatpush.msra.mxu0 %v184_v2 }
  0x3d   :  { %285 = vmatpush.msra.mxu0 %v183_v3 }
  0x3f   :  { %286 = vmatpush.msra.mxu0 %v182_v4 }
  0x41   :  { %287 = vmatpush.msra.mxu0 %v181_v5 }
  0x42   :  { %81 = vsyncpa [#allocation4], 0  ;;  %v178_v8 = vld [vmem:[%s2974_s13] sm:$0xff]  ;;  %vm190_vm0 = vcmask 523264   ;;  %v151_v10 = vld [vmem:[%s2964_s5 + $0x8] sm:$0xff]  ;;  %s2950_s0 = smov 64  }
  0x43   :  { %288 = vmatpush.msra.mxu0 %v180_v6  ;;  %v150_v9 = vld [vmem:[%s2964_s5] sm:$0xff]  ;;  %v152_v11 = vld [vmem:[%s2964_s5 + $0x10] sm:$0xff]  ;;  %v153_v12 = vld [vmem:[%s2964_s5 + $0x18] sm:$0xff]  ;;  %vm741_vm1 = vcmask 654336   ;;  %vm942_vm3 = vcmask 1041409   ;;  %vm1093_vm4 = vcmask 261120  }
  0x44   :  { %v154_v13 = vld [vmem:[%s2964_s5 + $0x20] sm:$0xff]  ;;  %v155_v14 = vld [vmem:[%s2964_s5 + $0x28] sm:$0xff]  ;;  %v156_v15 = vld [vmem:[%s2964_s5 + $0x30] sm:$0xff]  ;;  %vm1247_vm5 = vcmask 130112   ;;  %vm1251_vm6 = vcmask 195712   ;;  %vm1255_vm7 = vcmask 261312  }
  0x45   :  { %289 = vmatpush.msra.mxu0 %v179_v7  ;;  %v157_v16 = vld [vmem:[%s2964_s5 + $0x38] sm:$0xff]  ;;  %v158_v17 = vld [vmem:[%s2964_s5 + $0x40] sm:$0xff]  ;;  %v159_v18 = vld [vmem:[%s2964_s5 + $0x48] sm:$0xff]  ;;  %vm1259_vm8 = vcmask 326912   ;;  %vm1263_vm9 = vcmask 392512   ;;  %vm1267_vm10 = vcmask 458112  }
  0x46   :  { %v160_v19 = vld [vmem:[%s2964_s5 + $0x50] sm:$0xff]  ;;  %v411_v20 = vld [vmem:[%s2984_s21 + $0x38] sm:$0xff]  ;;  %v409_v22 = vld [vmem:[%s2984_s21 + $0x28] sm:$0xff]  ;;  %vm1285_vm12 = vcmask 451584   ;;  %s4393_s13 = sld [smem:[#allocation8_spill]]  ;;  %vm1456_vm13 = vcmask 785408  }
  0x47   :  { %290 = vmatpush.msra.mxu0 %v178_v8  ;;  %v410_v21 = vld [vmem:[%s2984_s21 + $0x30] sm:$0xff]  ;;  %508 = vmatpush.msra.mxu1 %v411_v20  ;;  %v161_v23 = vld [vmem:[%s2964_s5 + $0x58] sm:$0xff]  ;;  %v408_v24 = vld [vmem:[%s2984_s21 + $0x20] sm:$0xff]  ;;  %s4421_s20 = sld [smem:[#allocation21_spill]]  ;;  %s2560_s11 = sshll.u32 %s3132_s15, 4  ;;  %s2561_s11 = int_to_ptr.hbm [resolvable:$true] %s2560_s11 }
  0x48   :  { %2613 = vmatmul.msk.f32.vlgmr.msra.gmra.mxu0 %vm190_vm0, %v150_v9  ;;  %v407_v25 = vld [vmem:[%s2984_s21 + $0x18] sm:$0xff]  ;;  %v406_v26 = vld [vmem:[%s2984_s21 + $0x10] sm:$0xff]  ;;  %v162_v27 = vld [vmem:[%s2964_s5 + $0x60] sm:$0xff]  ;;  %s4422_s1 = sld [smem:[#allocation20_spill]]  ;;  %s2955_s12 = smov [#allocation3]  }
  0x49   :  { %509 = vmatpush.msra.mxu1 %v410_v21  ;;  %v405_v28 = vld [vmem:[%s2984_s21 + $0x8] sm:$0xff]  ;;  %v404_v29 = vld [vmem:[%s2984_s21] sm:$0xff]  ;;  %v164_v31 = vld [vmem:[%s2964_s5 + $0x70] sm:$0xff]  ;;  %s2953_s21 = smov 32   ;;  %s4423_s2 = sld [smem:[#allocation18_spill]] }
  0x4a   :  { %v163_v30 = vld [vmem:[%s2964_s5 + $0x68] sm:$0xff]  ;;  %v165_v32 = vld [vmem:[%s2964_s5 + $0x78] sm:$0xff]  ;;  %v3193_v33 = vld [vmem:[%s2979_s17] ss:$0 sm:$0xff]  ;;  %s4396_s17 = sld [smem:[#allocation9_spill]]  ;;  %s2558_s16 = sshll.u32 %s2955_s12, 4  ;;  %s2559_s16 = int_to_ptr.vmem [resolvable:$true] %s2558_s16 }
  0x4b   :  { %510 = vmatpush.msra.mxu1 %v409_v22  ;;  %v166_v35 = vld [vmem:[%s2964_s5 + $0x80] sm:$0xff]  ;;  %v167_v39 = vld [vmem:[%s2964_s5 + $0x88] sm:$0xff]  ;;  %v168_v43 = vld [vmem:[%s2964_s5 + $0x90] sm:$0xff]  ;;  %s4424_s4 = sld [smem:[#allocation22_spill]]  ;;  %s2900_s18 = sshra.s32 %s2561_s11, 4  ;;  %s2901_s18 = int_to_ptr.hbm [resolvable:$true] %s2900_s18 }
  0x4c   :  { %v169_v47 = vld [vmem:[%s2964_s5 + $0x98] sm:$0xff]  ;;  %v170_v51 = vld [vmem:[%s2964_s5 + $0xa0] sm:$0xff]  ;;  %v171_v55 = vld [vmem:[%s2964_s5 + $0xa8] sm:$0xff]  ;;  %s4426_s10 = sld [smem:[#allocation23_spill]]  ;;  %s2902_s27 = scalar_lea.hbm %s2901_s18, 2 }
  0x4d   :  { %511 = vmatpush.msra.mxu1 %v408_v24  ;;  %v172_v59 = vld [vmem:[%s2964_s5 + $0xb0] sm:$0xff]  ;;  %v173_v63 = vld [vmem:[%s2964_s5 + $0xb8] sm:$0xff]  ;;  %v174_v3 = vld [vmem:[%s2964_s5 + $0xc0] sm:$0xff]  ;;  %p2903_p0 = scmp.ne.s32.totalorder %s2901_s18, %s2902_s27  ;;  %s2904_s23 = scalar_lea.hbm %s3132_s15, 2 }
  0x4e   :  { %v175_v7 = vld [vmem:[%s2964_s5 + $0xc8] sm:$0xff]  ;;  %p2905_p1 = scmp.lt.s32.totalorder %s2901_s18, %s3132_s15  ;;  %p2906_p2 = scmp.lt.s32.totalorder %s2904_s23, %s2902_s27 }
  0x4f   :  { %512 = vmatpush.msra.mxu1 %v407_v25 }
  0x50   :  { %2614 = vmatmul.msk.f32.gmra.mxu0 %vm190_vm0, %v151_v10  ;;  %p2907_p3 = por %p2906_p2, %p2905_p1 }
  0x51   :  { %513 = vmatpush.msra.mxu1 %v406_v26 }
  0x52   :  { %p2908_p4 = pnand %p2907_p3, %p2903_p0 }
  0x53   :  { %514 = vmatpush.msra.mxu1 %v405_v28 }
  0x55   :  { %515 = vmatpush.msra.mxu1 %v404_v29 }
  0x58   :  { %2615 = vmatmul.msk.f32.gmra.mxu0 %vm190_vm0, %v152_v11  ;;  %v176_v11 = vld [vmem:[%s2964_s5 + $0xd0] sm:$0xff] }
  0x60   :  { %2616 = vmatmul.msk.f32.gmra.mxu0 %vm190_vm0, %v153_v12 }
  0x68   :  { %2617 = vmatmul.msk.f32.gmra.mxu0 %vm190_vm0, %v154_v13 }
  0x70   :  { %2618 = vmatmul.msk.f32.gmra.mxu0 %vm190_vm0, %v155_v14 }
  0x78   :  { %2619 = vmatmul.msk.f32.gmra.mxu0 %vm190_vm0, %v156_v15  ;;  %v177_v15 = vld [vmem:[%s2964_s5 + $0xd8] sm:$0xff]  ;;  %s4382_s5 = sld [smem:[#allocation7_spill]] }
  0x80   :  { %2620 = vmatmul.msk.f32.gmra.mxu0 %vm190_vm0, %v157_v16 }
  0x88   :  { %2621 = vmatmul.msk.f32.gmra.mxu0 %vm190_vm0, %v158_v17 }
  0x90   :  { %2622 = vmatmul.msk.f32.gmra.mxu0 %vm190_vm0, %v159_v18 }
  0x98   :  { %2623 = vmatmul.msk.f32.gmra.mxu0 %vm190_vm0, %v160_v19 }
  0xa0   :  { %2624 = vmatmul.msk.f32.gmra.mxu0 %vm190_vm0, %v161_v23 }
  0xa8   :  { %2625 = vmatmul.msk.f32.gmra.mxu0 %vm190_vm0, %v162_v27 }
  0xb0   :  { %2626 = vmatmul.msk.f32.gmra.mxu0 %vm190_vm0, %v163_v30 }
  0xb8   :  { %2627 = vmatmul.msk.f32.gmra.mxu0 %vm190_vm0, %v164_v31 }
  0xc0   :  { %2628 = vmatmul.msk.f32.gmra.mxu0 %vm190_vm0, %v165_v32 }
  0xc5   :  { %v292_v34 = vpop.f32.mrf.mxu0 }
  0xc6   :  { %v3197_v36 = vadd.f32 %v3193_v33, %v292_v34 }
  0xc8   :  { %v376_v37 = vmax.f32 %v3197_v36, 0.0  ;;  %2629 = vmatmul.msk.f32.gmra.mxu0 %vm190_vm0, %v166_v35 }
  0xca   :  { %2641 = vmatmul.msk.f32.vlgmr.msra.gmra.mxu1 %vm190_vm0, %v376_v37 }
  0xcd   :  { %v295_v38 = vpop.f32.mrf.mxu0 }
  0xce   :  { %v3206_v40 = vadd.f32 %v3193_v33, %v295_v38 }
  0xd0   :  { %v377_v41 = vmax.f32 %v3206_v40, 0.0  ;;  %2630 = vmatmul.msk.f32.gmra.mxu0 %vm190_vm0, %v167_v39 }
  0xd2   :  { %2642 = vmatmul.msk.f32.gmra.mxu1 %vm190_vm0, %v377_v41 }
  0xd5   :  { %v298_v42 = vpop.f32.mrf.mxu0 }
  0xd6   :  { %v3215_v44 = vadd.f32 %v3193_v33, %v298_v42 }
  0xd8   :  { %v378_v45 = vmax.f32 %v3215_v44, 0.0  ;;  %2631 = vmatmul.msk.f32.gmra.mxu0 %vm190_vm0, %v168_v43 }
  0xda   :  { %2643 = vmatmul.msk.f32.gmra.mxu1 %vm190_vm0, %v378_v45 }
  0xdd   :  { %v301_v46 = vpop.f32.mrf.mxu0 }
  0xde   :  { %v3224_v48 = vadd.f32 %v3193_v33, %v301_v46 }
  0xe0   :  { %v379_v49 = vmax.f32 %v3224_v48, 0.0  ;;  %2632 = vmatmul.msk.f32.gmra.mxu0 %vm190_vm0, %v169_v47 }
  0xe2   :  { %2644 = vmatmul.msk.f32.gmra.mxu1 %vm190_vm0, %v379_v49 }
  0xe5   :  { %v304_v50 = vpop.f32.mrf.mxu0 }
  0xe6   :  { %v3233_v52 = vadd.f32 %v3193_v33, %v304_v50 }
  0xe8   :  { %v380_v53 = vmax.f32 %v3233_v52, 0.0  ;;  %2633 = vmatmul.msk.f32.gmra.mxu0 %vm190_vm0, %v170_v51 }
  0xea   :  { %2645 = vmatmul.msk.f32.gmra.mxu1 %vm190_vm0, %v380_v53 }
  0xed   :  { %v307_v54 = vpop.f32.mrf.mxu0 }
  0xee   :  { %v3242_v56 = vadd.f32 %v3193_v33, %v307_v54 }
  0xf0   :  { %v4313_v57 = vmax.f32 %v3242_v56, 0.0  ;;  %2634 = vmatmul.msk.f32.gmra.mxu0 %vm190_vm0, %v171_v55 }
  0xf2   :  { %2646 = vmatmul.msk.f32.gmra.mxu1 %vm190_vm0, %v4313_v57 }
  0xf5   :  { %v310_v58 = vpop.f32.mrf.mxu0 }
  0xf6   :  { %v3251_v60 = vadd.f32 %v3193_v33, %v310_v58 }
  0xf8   :  { %v4311_v61 = vmax.f32 %v3251_v60, 0.0  ;;  %2635 = vmatmul.msk.f32.gmra.mxu0 %vm190_vm0, %v172_v59 }
  0xfa   :  { %2647 = vmatmul.msk.f32.gmra.mxu1 %vm190_vm0, %v4311_v61 }
  0xfd   :  { %v313_v62 = vpop.f32.mrf.mxu0 }
  0xfe   :  { %v3260_v0 = vadd.f32 %v3193_v33, %v313_v62 }
 0x100   :  { %v4306_v1 = vmax.f32 %v3260_v0, 0.0  ;;  %2636 = vmatmul.msk.f32.gmra.mxu0 %vm190_vm0, %v173_v63 }
 0x102   :  { %2648 = vmatmul.msk.f32.gmra.mxu1 %vm190_vm0, %v4306_v1 }
 0x105   :  { %v316_v2 = vpop.f32.mrf.mxu0 }
 0x106   :  { %v3269_v4 = vadd.f32 %v3193_v33, %v316_v2 }
 0x108   :  { %v4308_v5 = vmax.f32 %v3269_v4, 0.0  ;;  %2637 = vmatmul.msk.f32.gmra.mxu0 %vm190_vm0, %v174_v3 }
 0x10a   :  { %2649 = vmatmul.msk.f32.gmra.mxu1 %vm190_vm0, %v4308_v5 }
 0x10d   :  { %v319_v6 = vpop.f32.mrf.mxu0 }
 0x10e   :  { %v3278_v8 = vadd.f32 %v3193_v33, %v319_v6 }
 0x110   :  { %v4303_v9 = vmax.f32 %v3278_v8, 0.0  ;;  %2638 = vmatmul.msk.f32.gmra.mxu0 %vm190_vm0, %v175_v7 }
 0x112   :  { %2650 = vmatmul.msk.f32.gmra.mxu1 %vm190_vm0, %v4303_v9 }
 0x115   :  { %v322_v10 = vpop.f32.mrf.mxu0 }
 0x116   :  { %v3287_v12 = vadd.f32 %v3193_v33, %v322_v10 }
 0x118   :  { %v4300_v13 = vmax.f32 %v3287_v12, 0.0  ;;  %2639 = vmatmul.msk.f32.gmra.mxu0 %vm190_vm0, %v176_v11 }
 0x11a   :  { %2651 = vmatmul.msk.f32.gmra.mxu1 %vm190_vm0, %v4300_v13 }
 0x11d   :  { %v325_v14 = vpop.f32.mrf.mxu0 }
 0x11e   :  { %v3296_v16 = vadd.f32 %v3193_v33, %v325_v14 }
 0x120   :  { %v4298_v17 = vmax.f32 %v3296_v16, 0.0  ;;  %2640 = vmatmul.msk.f32.gmra.mxu0 %vm190_vm0, %v177_v15 }
 0x122   :  { %2652 = vmatmul.msk.f32.gmra.mxu1 %vm190_vm0, %v4298_v17 }
 0x125   :  { %v328_v18 = vpop.f32.mrf.mxu0 }
 0x126   :  { %v3304_v19 = vadd.f32 %v3193_v33, %v328_v18 }
 0x128   :  { %v4297_v20 = vmax.f32 %v3304_v19, 0.0 }
 0x12a   :  { %2653 = vmatmul.msk.f32.gmra.mxu1 %vm190_vm0, %v4297_v20 }
 0x12d   :  { %v331_v21 = vpop.f32.mrf.mxu0 }
 0x12e   :  { %v3311_v22 = vadd.f32 %v3193_v33, %v331_v21 }
 0x130   :  { %v4296_v23 = vmax.f32 %v3311_v22, 0.0 }
 0x132   :  { %2654 = vmatmul.msk.f32.gmra.mxu1 %vm190_vm0, %v4296_v23 }
 0x135   :  { %v334_v24 = vpop.f32.mrf.mxu0 }
 0x136   :  { %v3318_v25 = vadd.f32 %v3193_v33, %v334_v24 }
 0x138   :  { %v390_v26 = vmax.f32 %v3318_v25, 0.0 }
 0x13a   :  { %2655 = vmatmul.msk.f32.gmra.mxu1 %vm190_vm0, %v390_v26 }
 0x13d   :  { %v337_v27 = vpop.f32.mrf.mxu0 }
 0x13e   :  { %v3325_v28 = vadd.f32 %v3193_v33, %v337_v27 }
 0x140   :  { %v391_v29 = vmax.f32 %v3325_v28, 0.0 }
 0x142   :  { %2656 = vmatmul.msk.f32.gmra.mxu1 %vm190_vm0, %v391_v29 }
 0x145   :  { %v340_v30 = vpop.f32.mrf.mxu0 }
 0x146   :  { %v3332_v31 = vadd.f32 %v3193_v33, %v340_v30 }
 0x147   :  { %v517_v32 = vpop.f32.mrf.mxu1 }
 0x148   :  { %v392_v34 = vmax.f32 %v3332_v31, 0.0 }
 0x14a   :  { %2657 = vmatmul.msk.f32.gmra.mxu1 %vm190_vm0, %v392_v34  ;;  %v631_v40 = vadd.f32 %v392_v34, %v378_v45  ;;  %v4361_v34 = vmax.f32 %v3242_v56, 0.0 }
 0x14d   :  { %v343_v35 = vpop.f32.mrf.mxu0 }
 0x14e   :  { %v3339_v38 = vadd.f32 %v3193_v33, %v343_v35 }
 0x14f   :  { %v520_v39 = vpop.f32.mrf.mxu1 }
 0x150   :  { %v393_v42 = vmax.f32 %v3339_v38, 0.0 }
 0x152   :  { %2658 = vmatmul.msk.f32.gmra.mxu1 %vm190_vm0, %v393_v42 }
 0x155   :  { %v346_v43 = vpop.f32.mrf.mxu0 }
 0x156   :  { %v3346_v46 = vadd.f32 %v3193_v33, %v346_v43 }
 0x157   :  { %v3348_v47 = vpop.f32.mrf.mxu1 }
 0x158   :  { %v4314_v50 = vmax.f32 %v3346_v46, 0.0  ;;  %v4360_v44 = vmax.f32 %v3346_v46, 0.0 }
 0x15a   :  { %2659 = vmatmul.msk.f32.gmra.mxu1 %vm190_vm0, %v4314_v50 }
 0x15d   :  { %v349_v51 = vpop.f32.mrf.mxu0 }
 0x15e   :  { %v3355_v54 = vadd.f32 %v3193_v33, %v349_v51 }
 0x15f   :  { %v3357_v55 = vpop.f32.mrf.mxu1 }
 0x160   :  { %v4312_v58 = vmax.f32 %v3355_v54, 0.0 }
 0x162   :  { %2660 = vmatmul.msk.f32.gmra.mxu1 %vm190_vm0, %v4312_v58 }
 0x165   :  { %v352_v59 = vpop.f32.mrf.mxu0 }
 0x166   :  { %v3364_v62 = vadd.f32 %v3193_v33, %v352_v59 }
 0x167   :  { %v3366_v63 = vpop.f32.mrf.mxu1 }
 0x168   :  { %v4309_v2 = vmax.f32 %v3364_v62, 0.0 }
 0x16a   :  { %2661 = vmatmul.msk.f32.gmra.mxu1 %vm190_vm0, %v4309_v2 }
 0x16d   :  { %v355_v3 = vpop.f32.mrf.mxu0 }
 0x16e   :  { %v3373_v6 = vadd.f32 %v3193_v33, %v355_v3 }
 0x16f   :  { %v3375_v7 = vpop.f32.mrf.mxu1 }
 0x170   :  { %v4304_v10 = vmax.f32 %v3373_v6, 0.0 }
 0x172   :  { %2662 = vmatmul.msk.f32.gmra.mxu1 %vm190_vm0, %v4304_v10  ;;  %v3440_v10 = vld [vmem:[%s2989_s25] ss:$0 sm:$0xff]  ;;  %s4397_s25 = sld [smem:[#allocation10_spill]] }
 0x173   :  { %v521_v2 = vadd.f32 %v3440_v10, %v520_v39 }
 0x175   :  { %v358_v11 = vpop.f32.mrf.mxu0  ;;  %v602_v58 = vmax.f32 %v521_v2, 0.0 }
 0x176   :  { %v3382_v14 = vadd.f32 %v3193_v33, %v358_v11 }
 0x177   :  { %v3384_v15 = vpop.f32.mrf.mxu1 }
 0x178   :  { %v4307_v18 = vmax.f32 %v3382_v14, 0.0 }
 0x17a   :  { %2663 = vmatmul.msk.f32.gmra.mxu1 %vm190_vm0, %v4307_v18 }
 0x17d   :  { %v361_v21 = vpop.f32.mrf.mxu0 }
 0x17e   :  { %v3391_v24 = vadd.f32 %v3193_v33, %v361_v21 }
 0x17f   :  { %v3393_v27 = vpop.f32.mrf.mxu1 }
 0x180   :  { %v4301_v30 = vmax.f32 %v3391_v24, 0.0 }
 0x182   :  { %2664 = vmatmul.msk.f32.gmra.mxu1 %vm190_vm0, %v4301_v30 }
 0x185   :  { %v364_v35 = vpop.f32.mrf.mxu0 }
 0x186   :  { %v3400_v43 = vadd.f32 %v3193_v33, %v364_v35 }
 0x187   :  { %v3402_v51 = vpop.f32.mrf.mxu1 }
 0x188   :  { %v4299_v59 = vmax.f32 %v3400_v43, 0.0 }
 0x18a   :  { %2665 = vmatmul.msk.f32.gmra.mxu1 %vm190_vm0, %v4299_v59 }
 0x18d   :  { %v367_v3 = vpop.f32.mrf.mxu0 }
 0x18e   :  { %v3409_v11 = vadd.f32 %v3193_v33, %v367_v3 }
 0x18f   :  { %v3411_v21 = vpop.f32.mrf.mxu1 }
 0x190   :  { %v4302_v23 = vmax.f32 %v3409_v11, 0.0 }
 0x192   :  { %2666 = vmatmul.msk.f32.gmra.mxu1 %vm190_vm0, %v4302_v23 }
 0x195   :  { %v370_v35 = vpop.f32.mrf.mxu0 }
 0x196   :  { %v3418_v20 = vadd.f32 %v3193_v33, %v370_v35 }
 0x197   :  { %v3420_v17 = vpop.f32.mrf.mxu1 }
 0x198   :  { %v4305_v59 = vmax.f32 %v3418_v20, 0.0 }
 0x19a   :  { %2667 = vmatmul.msk.f32.gmra.mxu1 %vm190_vm0, %v4305_v59  ;;  %v518_v59 = vadd.f32 %v3440_v10, %v517_v32  ;;  %v524_v32 = vadd.f32 %v3440_v10, %v3348_v47  ;;  %v530_v47 = vadd.f32 %v3440_v10, %v3366_v63  ;;  %v536_v63 = vadd.f32 %v3440_v10, %v3384_v15 }
 0x19d   :  { %v373_v3 = vpop.f32.mrf.mxu0 }
 0x19e   :  { %v3427_v13 = vadd.f32 %v3193_v33, %v373_v3  ;;  %v601_v3 = vmax.f32 %v518_v59, 0.0 }
 0x19f   :  { %v3429_v30 = vpop.f32.mrf.mxu1 }
 0x1a0   :  { %v4310_v23 = vmax.f32 %v3427_v13, 0.0 }
 0x1a2   :  { %2668 = vmatmul.msk.f32.gmra.mxu1 %vm190_vm0, %v4310_v23 }
 0x1a7   :  { %v3435_v35 = vpop.f32.mrf.mxu1 }
 0x1af   :  { %v3437_v9 = vpop.f32.mrf.mxu1 }
 0x1b7   :  { %v559_v1 = vpop.f32.mrf.mxu1 }
 0x1b8   :  { %v560_v33 = vadd.f32 %v3440_v10, %v559_v1 }
 0x1ba   :  { %v615_v18 = vmax.f32 %v560_v33, 0.0 }
 0x1bc   :  { %v643_v5 = vadd.f32 %v615_v18, %v601_v3  ;;  %v603_v18 = vmax.f32 %v524_v32, 0.0  ;;  %v605_v32 = vmax.f32 %v530_v47, 0.0 }
 0x1be   :  { %671 = vrot.lane.b32.xlu0 %v643_v5, %s2950_s0  ;;  %v527_v5 = vadd.f32 %v3440_v10, %v3357_v55  ;;  %v533_v55 = vadd.f32 %v3440_v10, %v3375_v7  ;;  %v539_v7 = vadd.f32 %v3440_v10, %v3393_v27 }
 0x1bf   :  { %v562_v23 = vpop.f32.mrf.mxu1 }
 0x1c0   :  { %v563_v61 = vadd.f32 %v3440_v10, %v562_v23 }
 0x1c2   :  { %v616_v57 = vmax.f32 %v563_v61, 0.0 }
 0x1c4   :  { %v644_v50 = vadd.f32 %v616_v57, %v602_v58  ;;  %v604_v57 = vmax.f32 %v527_v5, 0.0 }
 0x1c6   :  { %673 = vrot.lane.b32.xlu0 %v644_v50, %s2950_s0 }
 0x1c7   :  { %v565_v1 = vpop.f32.mrf.mxu1 }
 0x1c8   :  { %v566_v59 = vadd.f32 %v3440_v10, %v565_v1 }
 0x1ca   :  { %v617_v33 = vmax.f32 %v566_v59, 0.0 }
 0x1cc   :  { %v645_v39 = vadd.f32 %v617_v33, %v603_v18 }
 0x1ce   :  { %675 = vrot.lane.b32.xlu1 %v645_v39, %s2950_s0  ;;  %v606_v39 = vmax.f32 %v533_v55, 0.0 }
 0x1cf   :  { %v568_v23 = vpop.f32.mrf.mxu1 }
 0x1d0   :  { %v569_v61 = vadd.f32 %v3440_v10, %v568_v23 }
 0x1d2   :  { %v618_v58 = vmax.f32 %v569_v61, 0.0 }
 0x1d4   :  { %v646_v2 = vadd.f32 %v618_v58, %v604_v57  ;;  %v607_v58 = vmax.f32 %v536_v63, 0.0 }
 0x1d6   :  { %677 = vrot.lane.b32.xlu1 %v646_v2, %s2950_s0 }
 0x1d7   :  { %v571_v50 = vpop.f32.mrf.mxu1 }
 0x1d8   :  { %v572_v3 = vadd.f32 %v3440_v10, %v571_v50 }
 0x1da   :  { %v619_v1 = vmax.f32 %v572_v3, 0.0 }
 0x1dc   :  { %v647_v59 = vadd.f32 %v619_v1, %v605_v32  ;;  %v608_v32 = vmax.f32 %v539_v7, 0.0  ;;  %v733_v7 = vld [vmem:[%s2994_s29 + $0x30] sm:$0xff] }
 0x1de   :  { %679 = vrot.lane.b32.xlu2 %v647_v59, %s2950_s0  ;;  %v542_v59 = vadd.f32 %v3440_v10, %v3402_v51 }
 0x1df   :  { %v574_v18 = vpop.f32.mrf.mxu1 }
 0x1e0   :  { %v575_v33 = vadd.f32 %v3440_v10, %v574_v18  ;;  %v609_v27 = vmax.f32 %v542_v59, 0.0 }
 0x1e2   :  { %v620_v5 = vmax.f32 %v575_v33, 0.0 }
 0x1e4   :  { %v648_v23 = vadd.f32 %v620_v5, %v606_v39  ;;  %v545_v5 = vadd.f32 %v3440_v10, %v3411_v21  ;;  %v548_v21 = vadd.f32 %v3440_v10, %v3420_v17  ;;  %v551_v17 = vadd.f32 %v3440_v10, %v3429_v30 }
 0x1e6   :  { %681 = vrot.lane.b32.xlu2 %v648_v23, %s2950_s0  ;;  %v736_v23 = vld [vmem:[%s2994_s29 + $0x48] sm:$0xff]  ;;  %v611_v59 = vmax.f32 %v548_v21, 0.0  ;;  %v557_v21 = vadd.f32 %v3440_v10, %v3437_v9  ;;  %v630_v9 = vadd.f32 %v391_v29, %v377_v41 }
 0x1e7   :  { %v577_v61 = vpop.f32.mrf.mxu1  ;;  %790 = vmatpush.msra.mxu2 %v736_v23  ;;  %v727_v23 = vld [vmem:[%s2994_s29] sm:$0xff] }
 0x1e8   :  { %v578_v57 = vadd.f32 %v3440_v10, %v577_v61  ;;  %v735_v61 = vld [vmem:[%s2994_s29 + $0x40] sm:$0xff] }
 0x1e9   :  { %791 = vmatpush.msra.mxu2 %v735_v61 }
 0x1ea   :  { %v621_v2 = vmax.f32 %v578_v57, 0.0  ;;  %v610_v57 = vmax.f32 %v545_v5, 0.0 }
 0x1ec   :  { %v649_v47 = vadd.f32 %v621_v2, %v607_v58  ;;  %v734_v2 = vld [vmem:[%s2994_s29 + $0x38] sm:$0xff] }
 0x1ed   :  { %792 = vmatpush.msra.mxu2 %v734_v2 }
 0x1ee   :  { %683 = vrot.lane.b32.xlu0 %v649_v47, %s2950_s0 }
 0x1ef   :  { %v580_v50 = vpop.f32.mrf.mxu1  ;;  %793 = vmatpush.msra.mxu2 %v733_v7 }
 0x1f0   :  { %v581_v3 = vadd.f32 %v3440_v10, %v580_v50  ;;  %v732_v50 = vld [vmem:[%s2994_s29 + $0x28] sm:$0xff] }
 0x1f1   :  { %794 = vmatpush.msra.mxu2 %v732_v50 }
 0x1f2   :  { %v622_v15 = vmax.f32 %v581_v3, 0.0  ;;  %v731_v3 = vld [vmem:[%s2994_s29 + $0x20] sm:$0xff] }
 0x1f3   :  { %795 = vmatpush.msra.mxu2 %v731_v3 }
 0x1f4   :  { %v650_v1 = vadd.f32 %v622_v15, %v608_v32 }
 0x1f6   :  { %685 = vrot.lane.b32.xlu1 %v650_v1, %s2950_s0  ;;  %v730_v1 = vld [vmem:[%s2994_s29 + $0x18] sm:$0xff] }
 0x1f7   :  { %v583_v55 = vpop.f32.mrf.mxu1  ;;  %796 = vmatpush.msra.mxu2 %v730_v1 }
 0x1f8   :  { %v584_v18 = vadd.f32 %v3440_v10, %v583_v55 }
 0x1fa   :  { %v623_v33 = vmax.f32 %v584_v18, 0.0  ;;  %v729_v18 = vld [vmem:[%s2994_s29 + $0x10] sm:$0xff] }
 0x1fb   :  { %797 = vmatpush.msra.mxu2 %v729_v18 }
 0x1fc   :  { %v651_v39 = vadd.f32 %v623_v33, %v609_v27  ;;  %v728_v33 = vld [vmem:[%s2994_s29 + $0x8] sm:$0xff]  ;;  %s4413_s29 = sld [smem:[#allocation11_spill]] }
 0x1fd   :  { %798 = vmatpush.msra.mxu2 %v728_v33 }
 0x1fe   :  { %687 = vrot.lane.b32.xlu2 %v651_v39, %s2950_s0 }
 0x1ff   :  { %v586_v63 = vpop.f32.mrf.mxu1  ;;  %799 = vmatpush.msra.mxu2 %v727_v23  ;;  %v4362_v23 = vmax.f32 %v3355_v54, 0.0 }
 0x200   :  { %v587_v51 = vadd.f32 %v3440_v10, %v586_v63  ;;  %v612_v63 = vmax.f32 %v551_v17, 0.0 }
 0x202   :  { %v624_v58 = vmax.f32 %v587_v51, 0.0 }
 0x204   :  { %v652_v47 = vadd.f32 %v624_v58, %v610_v57  ;;  %v554_v57 = vadd.f32 %v3440_v10, %v3435_v35  ;;  %v629_v35 = vadd.f32 %v390_v26, %v376_v37  ;;  %v843_v37 = vlaneseq }
 0x206   :  { %689 = vrot.lane.b32.xlu0 %v652_v47, %s2950_s0  ;;  %v613_v30 = vmax.f32 %v554_v57, 0.0  ;;  %v3521_v26 = vshrl.u32 %v843_v37, 7  ;;  %v4364_v57 = vmax.f32 %v3251_v60, 0.0  ;;  %v4366_v60 = vmax.f32 %v3269_v4, 0.0 }
 0x207   :  { %v589_v32 = vpop.f32.mrf.mxu1 }
 0x208   :  { %v590_v15 = vadd.f32 %v3440_v10, %v589_v32  ;;  %v614_v32 = vmax.f32 %v557_v21, 0.0  ;;  %2766 = vset.pattern.permute.xlu0 %v3521_v26  ;;  %v3552_v54 = vadd.s32 48, %v3521_v26 }
 0x20a   :  { %v625_v55 = vmax.f32 %v590_v15, 0.0  ;;  %4363 = vst [vmem:[#allocation24_spill] sm:$0xff] %v3552_v54  ;;  %vm857_vm2 = vcmp.lt.s32.totalorder %v3552_v54, 49 }
 0x20c   :  { %v653_v27 = vadd.f32 %v625_v55, %v611_v59 }
 0x20e   :  { %691 = vrot.lane.b32.xlu1 %v653_v27, %s2950_s0 }
 0x20f   :  { %v592_v39 = vpop.f32.mrf.mxu1 }
 0x210   :  { %v593_v5 = vadd.f32 %v3440_v10, %v592_v39  ;;  %v632_v39 = vadd.f32 %v393_v42, %v379_v49 }
 0x212   :  { %v626_v51 = vmax.f32 %v593_v5, 0.0  ;;  %v633_v5 = vadd.f32 %v4360_v44, %v380_v53  ;;  %v931_v44 = vld [vmem:[%s3004_s8 + $0x28] sm:$0xff] }
 0x214   :  { %v654_v61 = vadd.f32 %v626_v51, %v612_v63  ;;  %v634_v63 = vadd.f32 %v4362_v23, %v4361_v34  ;;  %v4375_v34 = vmax.f32 %v3409_v11, 0.0  ;;  %v928_v11 = vld [vmem:[%s3004_s8 + $0x10] sm:$0xff] }
 0x216   :  { %693 = vrot.lane.b32.xlu2 %v654_v61, %s2950_s0  ;;  %v1086_v61 = vld [vmem:[%s3024_s30 + $0x18] sm:$0xff] }
 0x217   :  { %v595_v58 = vpop.f32.mrf.mxu1  ;;  %1109 = vmatpush.msrb.mxu2 %v1086_v61  ;;  %v973_v61 = vld [vmem:[%s3014_s19 + $0x30] sm:$0xff] }
 0x218   :  { %v596_v2 = vadd.f32 %v3440_v10, %v595_v58  ;;  %v4365_v58 = vmax.f32 %v3364_v62, 0.0  ;;  %v4367_v62 = vmax.f32 %v3382_v14, 0.0 }
 0x21a   :  { %v627_v47 = vmax.f32 %v596_v2, 0.0  ;;  %v635_v2 = vadd.f32 %v4365_v58, %v4364_v57  ;;  %v972_v57 = vld [vmem:[%s3014_s19 + $0x28] sm:$0xff]  ;;  %v971_v58 = vld [vmem:[%s3014_s19 + $0x20] sm:$0xff] }
 0x21c   :  { %v655_v7 = vadd.f32 %v627_v47, %v613_v30  ;;  %v2951_v30 = vmov 0.0  }
 0x21d   :  { %v3562_v47 = vsel %vm857_vm2, 1.0, %v2951_v30 }
 0x21e   :  { %695 = vrot.lane.b32.xlu0 %v655_v7, %s2950_s0 }
 0x21f   :  { %v598_v50 = vpop.f32.mrf.mxu1 }
 0x220   :  { %v599_v3 = vadd.f32 %v3440_v10, %v598_v50 }
 0x222   :  { %v628_v15 = vmax.f32 %v599_v3, 0.0 }
 0x224   :  { %v656_v1 = vadd.f32 %v628_v15, %v614_v32  ;;  %v637_v15 = vadd.f32 %v4367_v62, %v4366_v60  ;;  %v969_v60 = vld [vmem:[%s3014_s19 + $0x10] sm:$0xff] }
 0x226   :  { %697 = vrot.lane.b32.xlu1 %v656_v1, %s2950_s0 }
 0x230   :  { %v672_v59 = vpop.permute.xlu0 %671 }
 0x231   :  { %v713_v55 = vsel %vm190_vm0, %v629_v35, %v672_v59  ;;  %v4368_v35 = vmax.f32 %v3260_v0, 0.0  ;;  %v4369_v59 = vmax.f32 %v3373_v6, 0.0  ;;  %v935_v0 = vld [vmem:[%s3004_s8 + $0x48] sm:$0xff]  ;;  %v934_v6 = vld [vmem:[%s3004_s8 + $0x40] sm:$0xff] }
 0x232   :  { %2669 = vmatmul.msk.f32.vlgmr.msra.gmra.mxu2 %vm741_vm1, %v713_v55  ;;  %v886_v27 = vsel %vm741_vm1, %v713_v55, 0.0  ;;  %952 = vmatpush.msra.mxu3 %v935_v0 }
 0x233   :  { %v636_v55 = vadd.f32 %v4369_v59, %v4368_v35  ;;  %v3639_v59 = vld [vmem:[%s3024_s30] sm:$0xff] }
 0x234   :  { %953 = vmatpush.msra.mxu3 %v934_v6 }
 0x238   :  { %v674_v10 = vpop.permute.xlu0 %673  ;;  %v680_v33 = vpop.permute.xlu2 %679 }
 0x239   :  { %v714_v18 = vsel %vm190_vm0, %v630_v9, %v674_v10  ;;  %v717_v48 = vsel %vm190_vm0, %v633_v5, %v680_v33  ;;  %v4373_v5 = vmax.f32 %v3400_v43, 0.0  ;;  %v3611_v43 = vld [vmem:[%s3024_s30 + $0x10] sm:$0xff] }
 0x23a   :  { %2670 = vmatmul.msk.f32.gmra.mxu2 %vm741_vm1, %v714_v18  ;;  %v887_v36 = vsel %vm741_vm1, %v714_v18, 0.0  ;;  %v893_v53 = vsel %vm741_vm1, %v717_v48, 0.0 }
 0x23b   :  { %v888_v25 = vadd.f32 %v887_v36, %v886_v27  ;;  %v4370_v36 = vmax.f32 %v3278_v8, 0.0  ;;  %1110 = vmatpush.msrb.mxu2 %v3611_v43 }
 0x240   :  { %v676_v41 = vpop.permute.xlu1 %675  ;;  %v682_v31 = vpop.permute.xlu2 %681 }
 0x241   :  { %v715_v28 = vsel %vm190_vm0, %v631_v40, %v676_v41  ;;  %v718_v38 = vsel %vm190_vm0, %v634_v63, %v682_v31  ;;  %v930_v63 = vld [vmem:[%s3004_s8 + $0x20] sm:$0xff] }
 0x242   :  { %2671 = vmatmul.msk.f32.gmra.mxu2 %vm741_vm1, %v715_v28  ;;  %v889_v29 = vsel %vm741_vm1, %v715_v28, 0.0  ;;  %v895_v46 = vsel %vm741_vm1, %v718_v38, 0.0  ;;  %v933_v28 = vld [vmem:[%s3004_s8 + $0x38] sm:$0xff] }
 0x243   :  { %v890_v17 = vadd.f32 %v889_v29, %v888_v25  ;;  %v4371_v25 = vmax.f32 %v3391_v24, 0.0  ;;  %954 = vmatpush.msra.mxu3 %v933_v28  ;;  %v4372_v24 = vmax.f32 %v3287_v12, 0.0 }
 0x245   :  { %v638_v33 = vadd.f32 %v4371_v25, %v4370_v36  ;;  %v639_v31 = vadd.f32 %v4373_v5, %v4372_v24 }
 0x248   :  { %v678_v45 = vpop.permute.xlu1 %677 }
 0x249   :  { %v716_v51 = vsel %vm190_vm0, %v632_v39, %v678_v45  ;;  %v932_v39 = vld [vmem:[%s3004_s8 + $0x30] sm:$0xff]  ;;  %v4374_v45 = vmax.f32 %v3296_v16, 0.0 }
 0x24a   :  { %2672 = vmatmul.msk.f32.gmra.mxu2 %vm741_vm1, %v716_v51  ;;  %v891_v49 = vsel %vm741_vm1, %v716_v51, 0.0  ;;  %955 = vmatpush.msra.mxu3 %v932_v39 }
 0x24b   :  { %v892_v52 = vadd.f32 %v891_v49, %v890_v17  ;;  %v640_v23 = vadd.f32 %v4375_v34, %v4374_v45 }
 0x24c   :  { %956 = vmatpush.msra.mxu3 %v931_v44 }
 0x24d   :  { %v894_v42 = vadd.f32 %v893_v53, %v892_v52  ;;  %v929_v52 = vld [vmem:[%s3004_s8 + $0x18] sm:$0xff] }
 0x24e   :  { %957 = vmatpush.msra.mxu3 %v930_v63 }
 0x24f   :  { %v896_v56 = vadd.f32 %v895_v46, %v894_v42  ;;  %v926_v46 = vld [vmem:[%s3004_s8] sm:$0xff] }
 0x250   :  { %958 = vmatpush.msra.mxu3 %v929_v52 }
 0x252   :  { %2673 = vmatmul.msk.f32.gmra.mxu2 %vm741_vm1, %v717_v48  ;;  %959 = vmatpush.msra.mxu3 %v928_v11 }
 0x258   :  { %v688_v3 = vpop.permute.xlu2 %687 }
 0x259   :  { %v721_v9 = vsel %vm190_vm0, %v637_v15, %v688_v3  ;;  %v3629_v3 = vld [vmem:[%s3024_s30 + $0x8] sm:$0xff] }
 0x25a   :  { %2674 = vmatmul.msk.f32.gmra.mxu2 %vm741_vm1, %v718_v38  ;;  %v906_v14 = vsel %vm741_vm1, %v721_v9, 0.0  ;;  %v927_v38 = vld [vmem:[%s3004_s8 + $0x8] sm:$0xff]  ;;  %s4415_s8 = sld [smem:[#allocation15_spill]] }
 0x25b   :  { %960 = vmatpush.msra.mxu3 %v927_v38  ;;  %1111 = vmatpush.msrb.mxu2 %v3629_v3 }
 0x25d   :  { %961 = vmatpush.msra.mxu3 %v926_v46  ;;  %1112 = vmatpush.msrb.mxu2 %v3639_v59 }
 0x260   :  { %v684_v7 = vpop.permute.xlu0 %683 }
 0x261   :  { %v719_v21 = vsel %vm190_vm0, %v635_v2, %v684_v7  ;;  %v970_v2 = vld [vmem:[%s3014_s19 + $0x18] sm:$0xff]  ;;  %v4376_v7 = vmax.f32 %v3304_v19, 0.0 }
 0x262   :  { %2675 = vmatmul.msk.f32.gmra.mxu2 %vm741_vm1, %v719_v21  ;;  %v878_v50 = vmul.f32 %v3562_v47, %v719_v21  ;;  %v4377_v21 = vmax.f32 %v3418_v20, 0.0  ;;  %v968_v20 = vld [vmem:[%s3014_s19 + $0x8] sm:$0xff] }
 0x264   :  { %v897_v32 = vsel %vm741_vm1, %v878_v50, 0.0  ;;  %v641_v50 = vadd.f32 %v4377_v21, %v4376_v7 }
 0x265   :  { %v3572_v1 = vadd.f32 %v897_v32, %v896_v56  ;;  %v974_v56 = vld [vmem:[%s3014_s19 + $0x38] sm:$0xff] }
 0x266   :  { %1029 = vmatpush.msrb.mxu3 %v974_v56 }
 0x267   :  { %v899_v19 = vrot.slane %v3572_v1, 4 }
 0x268   :  { %v686_v10 = vpop.permute.xlu1 %685  ;;  %1030 = vmatpush.msrb.mxu3 %v973_v61 }
 0x269   :  { %v720_v18 = vsel %vm190_vm0, %v636_v55, %v686_v10  ;;  %v967_v55 = vld [vmem:[%s3014_s19] sm:$0xff]  ;;  %v4379_v10 = vmax.f32 %v3427_v13, 0.0  ;;  %s4417_s19 = sld [smem:[#allocation12_spill]] }
 0x26a   :  { %2676 = vmatmul.msk.f32.gmra.mxu2 %vm741_vm1, %v720_v18  ;;  %v905_v4 = vsel %vm741_vm1, %v720_v18, 0.0  ;;  %1031 = vmatpush.msrb.mxu3 %v972_v57 }
 0x26b   :  { %v907_v27 = vadd.f32 %v906_v14, %v905_v4  ;;  %v900_v4 = vadd.f32 %v899_v19, %v3572_v1 }
 0x26c   :  { %1032 = vmatpush.msrb.mxu3 %v971_v58 }
 0x26d   :  { %v901_v6 = vrot.slane %v900_v4, 2 }
 0x26e   :  { %1033 = vmatpush.msrb.mxu3 %v970_v2 }
 0x270   :  { %v694_v8 = vpop.permute.xlu2 %693  ;;  %1034 = vmatpush.msrb.mxu3 %v969_v60  ;;  %v2799_v60 = vld [vmem:[#allocation2] ss:$0 sm:$0xff] }
 0x271   :  { %v724_v49 = vsel %vm190_vm0, %v640_v23, %v694_v8  ;;  %v2794_v8 = vld [vmem:[%s2999_s3] ss:$0 sm:$0xff]  ;;  %s4414_s3 = sld [smem:[#allocation13_spill]] }
 0x272   :  { %2677 = vmatmul.msk.f32.gmra.mxu2 %vm741_vm1, %v721_v9  ;;  %v912_v53 = vsel %vm741_vm1, %v724_v49, 0.0  ;;  %1035 = vmatpush.msrb.mxu3 %v968_v20  ;;  %v4378_v9 = vmax.f32 %v3311_v22, 0.0  ;;  %v902_v22 = vadd.f32 %v901_v6, %v900_v4  ;;  %v3715_v20 = vld [vmem:[%s3029_s6] ss:$0 sm:$0xff]  ;;  %s4420_s6 = sld [smem:[#allocation16_spill]] }
 0x274   :  { %v642_v18 = vadd.f32 %v4379_v10, %v4378_v9  ;;  %1036 = vmatpush.msrb.mxu3 %v967_v55  ;;  %v903_v1 = vrot.slane %v902_v22, 1  ;;  %v3719_v10 = vld [vmem:[%s3019_s24] ss:$0 sm:$0xff]  ;;  %s4418_s24 = sld [smem:[#allocation17_spill]] }
 0x276   :  { %v904_v28 = vadd.f32 %v903_v1, %v902_v22 }
 0x278   :  { %v690_v40 = vpop.permute.xlu0 %689  ;;  %v924_v39 = vmul.f32 0.020408163, %v904_v28 }
 0x279   :  { %v722_v41 = vsel %vm190_vm0, %v638_v33, %v690_v40 }
 0x27a   :  { %2678 = vmatmul.msk.f32.gmra.mxu2 %vm741_vm1, %v722_v41  ;;  %v908_v29 = vsel %vm741_vm1, %v722_v41, 0.0 }
 0x27b   :  { %v909_v17 = vadd.f32 %v908_v29, %v907_v27 }
 0x280   :  { %v692_v51 = vpop.permute.xlu1 %691 }
 0x281   :  { %v723_v48 = vsel %vm190_vm0, %v639_v31, %v692_v51 }
 0x282   :  { %2679 = vmatmul.msk.f32.gmra.mxu2 %vm741_vm1, %v723_v48  ;;  %v910_v12 = vsel %vm741_vm1, %v723_v48, 0.0 }
 0x283   :  { %v911_v16 = vadd.f32 %v910_v12, %v909_v17 }
 0x285   :  { %v913_v42 = vadd.f32 %v912_v53, %v911_v16 }
 0x28a   :  { %2680 = vmatmul.msk.f32.gmra.mxu2 %vm741_vm1, %v724_v49 }
 0x290   :  { %v696_v32 = vpop.permute.xlu0 %695 }
 0x291   :  { %v725_v62 = vsel %vm190_vm0, %v641_v50, %v696_v32 }
 0x292   :  { %2681 = vmatmul.msk.f32.gmra.mxu2 %vm741_vm1, %v725_v62  ;;  %v914_v15 = vsel %vm741_vm1, %v725_v62, 0.0  ;;  %v2952_v62 = vmov 0  }
 0x293   :  { %v915_v35 = vadd.f32 %v914_v15, %v913_v42  ;;  %2765 = vset.pattern.permute.xlu1 %v2952_v62  ;;  %v2795_v15 = vld [vmem:[%s3009_s14] ss:$0 sm:$0xff]  ;;  %s4416_s14 = sld [smem:[#allocation19_spill]] }
 0x294   :  { %1213 = vperm.xlu1 %2765, %v2799_v60  }
 0x298   :  { %v698_v14 = vpop.permute.xlu1 %697 }
 0x299   :  { %v726_v27 = vsel %vm190_vm0, %v642_v18, %v698_v14 }
 0x29a   :  { %2682 = vmatmul.msk.f32.gmra.mxu2 %vm741_vm1, %v726_v27  ;;  %v885_v0 = vmul.f32 %v3562_v47, %v726_v27 }
 0x29c   :  { %v916_v36 = vsel %vm741_vm1, %v885_v0, 0.0  ;;  %2768 = vset.pattern.permute.xlu1 %v3521_v26  ;;  %v3726_v0 = vld [vmem:[%s4382_s5] ss:$0 sm:$0xff] }
 0x29d   :  { %v917_v25 = vadd.f32 %v916_v36, %v915_v35 }
 0x29f   :  { %v918_v33 = vrot.slane %v917_v25, 4 }
 0x2a1   :  { %v919_v40 = vadd.f32 %v918_v33, %v917_v25 }
 0x2a2   :  { %1113 = vmatmul.f32.vlgmr.msrb.gmra.mxu2 %v2951_v30 }
 0x2a3   :  { %v920_v13 = vrot.slane %v919_v40, 2 }
 0x2a5   :  { %v921_v41 = vadd.f32 %v920_v13, %v919_v40 }
 0x2a7   :  { %v922_v29 = vrot.slane %v921_v41, 1 }
 0x2a9   :  { %v923_v17 = vadd.f32 %v922_v29, %v921_v41 }
 0x2ab   :  { %v925_v44 = vmul.f32 0.020408163, %v923_v17 }
 0x2ad   :  { %v943_v47 = vsel %vm942_vm3, %v925_v44, %v924_v39 }
 0x2ae   :  { %2684 = vmatmul.msk.f32.vlgmr.msra.gmra.mxu3 %vm741_vm1, %v943_v47 }
 0x2b5   :  { %v801_v24 = vpop.f32.mrf.mxu2 }
 0x2b6   :  { %v3656_v5 = vadd.f32 %v2794_v8, %v801_v24 }
 0x2b8   :  { %4380 = vst [vmem:[#allocation25_spill] sm:$0xff] %v3656_v5  ;;  %2685 = vmatmul.msk.f32.vlgmr.msrb.gmra.mxu3 %vm190_vm0, %v3656_v5 }
 0x2bd   :  { %v804_v30 = vpop.f32.mrf.mxu2 }
 0x2be   :  { %v3660_v31 = vadd.f32 %v2794_v8, %v804_v30 }
 0x2c0   :  { %4381 = vst [vmem:[#allocation26_spill] sm:$0xff] %v3660_v31  ;;  %2686 = vmatmul.msk.f32.gmra.mxu3 %vm190_vm0, %v3660_v31 }
 0x2c5   :  { %v807_v45 = vpop.f32.mrf.mxu2 }
 0x2c6   :  { %v3664_v34 = vadd.f32 %v2794_v8, %v807_v45 }
 0x2c8   :  { %2687 = vmatmul.msk.f32.gmra.mxu3 %vm190_vm0, %v3664_v34 }
 0x2cd   :  { %v810_v23 = vpop.f32.mrf.mxu2 }
 0x2ce   :  { %v3668_v63 = vadd.f32 %v2794_v8, %v810_v23 }
 0x2d0   :  { %2688 = vmatmul.msk.f32.gmra.mxu3 %vm190_vm0, %v3668_v63 }
 0x2d5   :  { %v813_v51 = vpop.f32.mrf.mxu2 }
 0x2d6   :  { %v3672_v48 = vadd.f32 %v2794_v8, %v813_v51 }
 0x2d8   :  { %2689 = vmatmul.msk.f32.gmra.mxu3 %vm190_vm0, %v3672_v48 }
 0x2dd   :  { %v816_v49 = vpop.f32.mrf.mxu2 }
 0x2de   :  { %v3676_v52 = vadd.f32 %v2794_v8, %v816_v49 }
 0x2e0   :  { %2690 = vmatmul.msk.f32.gmra.mxu3 %vm190_vm0, %v3676_v52 }
 0x2e5   :  { %v819_v12 = vpop.f32.mrf.mxu2 }
 0x2e6   :  { %v3680_v16 = vadd.f32 %v2794_v8, %v819_v12 }
 0x2e8   :  { %2691 = vmatmul.msk.f32.gmra.mxu3 %vm190_vm0, %v3680_v16 }
 0x2ed   :  { %v822_v11 = vpop.f32.mrf.mxu2 }
 0x2ee   :  { %v3684_v38 = vadd.f32 %v2794_v8, %v822_v11 }
 0x2f0   :  { %2692 = vmatmul.msk.f32.gmra.mxu3 %vm190_vm0, %v3684_v38 }
 0x2f5   :  { %v825_v53 = vpop.f32.mrf.mxu2 }
 0x2f6   :  { %v3688_v42 = vadd.f32 %v2794_v8, %v825_v53 }
 0x2f8   :  { %2693 = vmatmul.msk.f32.gmra.mxu3 %vm190_vm0, %v3688_v42 }
 0x2fd   :  { %v828_v46 = vpop.f32.mrf.mxu2 }
 0x2fe   :  { %v3692_v56 = vadd.f32 %v2794_v8, %v828_v46 }
 0x300   :  { %2694 = vmatmul.msk.f32.gmra.mxu3 %vm190_vm0, %v3692_v56 }
 0x305   :  { %v831_v61 = vpop.f32.mrf.mxu2 }
 0x306   :  { %v3696_v57 = vadd.f32 %v2794_v8, %v831_v61 }
 0x308   :  { %2695 = vmatmul.msk.f32.gmra.mxu3 %vm190_vm0, %v3696_v57 }
 0x30d   :  { %v834_v58 = vpop.f32.mrf.mxu2 }
 0x30e   :  { %v3700_v2 = vadd.f32 %v2794_v8, %v834_v58 }
 0x310   :  { %2696 = vmatmul.msk.f32.gmra.mxu3 %vm190_vm0, %v3700_v2 }
 0x315   :  { %v837_v7 = vpop.f32.mrf.mxu2 }
 0x316   :  { %v3704_v21 = vadd.f32 %v2794_v8, %v837_v7 }
 0x318   :  { %2697 = vmatmul.msk.f32.gmra.mxu3 %vm190_vm0, %v3704_v21 }
 0x31d   :  { %v840_v50 = vpop.f32.mrf.mxu2 }
 0x31e   :  { %v3708_v32 = vadd.f32 %v2794_v8, %v840_v50 }
 0x320   :  { %2698 = vmatmul.msk.f32.gmra.mxu3 %vm190_vm0, %v3708_v32 }
 0x325   :  { %v1114_v55 = vpop.f32.mrf.mxu2 }
 0x326   :  { %v1115_v9 = vadd.f32 %v3715_v20, %v1114_v55 }
 0x328   :  { %v1119_v18 = vperm.slane %v1115_v9, 0 }
 0x331   :  { %v963_v19 = vpop.f32.mrf.mxu3 }
 0x332   :  { %v964_v35 = vadd.f32 %v2795_v15, %v963_v19 }
 0x334   :  { %966 = vst [vmem:[#allocation3] sm:$0x3] %v964_v35  ;;  %v1118_v35 = vrot.slane %v1115_v9, 1 }
 0x336   :  { %v1120_v55 = vperm.slane %v1118_v35, 0 }
 0x33b   :  { %v1038_v4 = vpop.f32.mrf.mxu3 }
 0x33c   :  { %v3722_v14 = vadd.f32 %v3719_v10, %v1038_v4 }
 0x33e   :  { %v1123_v27 = vadd.f32 %v1119_v18, %v3722_v14 }
 0x340   :  { %v1137_v6 = vmax.f32 %v1123_v27, 0.0 }
 0x342   :  { %v1154_v36 = vmul.f32 %v3726_v0, %v1137_v6 }
 0x343   :  { %v1041_v25 = vpop.f32.mrf.mxu3 }
 0x344   :  { %v3730_v33 = vadd.f32 %v3719_v10, %v1041_v25  ;;  %v1168_v22 = vsel %vm1093_vm4, %v1154_v36, 0.0 }
 0x345   :  { %1169 = vadd.xlane.f32.xlu2 %v1168_v22 }
 0x346   :  { %v1124_v40 = vadd.f32 %v1119_v18, %v3730_v33 }
 0x348   :  { %v1138_v13 = vmax.f32 %v1124_v40, 0.0 }
 0x34a   :  { %v1155_v1 = vmul.f32 %v3726_v0, %v1138_v13 }
 0x34b   :  { %v1044_v41 = vpop.f32.mrf.mxu3 }
 0x34c   :  { %v3736_v28 = vadd.f32 %v3719_v10, %v1044_v41  ;;  %v1171_v29 = vsel %vm1093_vm4, %v1155_v1, 0.0 }
 0x34d   :  { %1172 = vadd.xlane.f32.xlu0 %v1171_v29 }
 0x34e   :  { %v1125_v17 = vadd.f32 %v1119_v18, %v3736_v28 }
 0x350   :  { %v1139_v39 = vmax.f32 %v1125_v17, 0.0 }
 0x352   :  { %v1156_v44 = vmul.f32 %v3726_v0, %v1139_v39 }
 0x353   :  { %v1047_v47 = vpop.f32.mrf.mxu3 }
 0x354   :  { %v3742_v8 = vadd.f32 %v3719_v10, %v1047_v47  ;;  %v1174_v24 = vsel %vm1093_vm4, %v1156_v44, 0.0 }
 0x355   :  { %1175 = vadd.xlane.f32.xlu2 %v1174_v24 }
 0x356   :  { %v1126_v30 = vadd.f32 %v1119_v18, %v3742_v8 }
 0x358   :  { %v1140_v45 = vmax.f32 %v1126_v30, 0.0 }
 0x35a   :  { %v1157_v23 = vmul.f32 %v3726_v0, %v1140_v45 }
 0x35b   :  { %v1050_v51 = vpop.f32.mrf.mxu3 }
 0x35c   :  { %v3748_v49 = vadd.f32 %v3719_v10, %v1050_v51  ;;  %v1177_v12 = vsel %vm1093_vm4, %v1157_v23, 0.0 }
 0x35d   :  { %1178 = vadd.xlane.f32.xlu2 %v1177_v12 }
 0x35e   :  { %v1127_v11 = vadd.f32 %v1119_v18, %v3748_v49 }
 0x360   :  { %v1141_v53 = vmax.f32 %v1127_v11, 0.0 }
 0x362   :  { %v1158_v46 = vmul.f32 %v3726_v0, %v1141_v53 }
 0x363   :  { %v1053_v61 = vpop.f32.mrf.mxu3 }
 0x364   :  { %v3754_v58 = vadd.f32 %v3719_v10, %v1053_v61  ;;  %v1180_v7 = vsel %vm1093_vm4, %v1158_v46, 0.0 }
 0x365   :  { %1181 = vadd.xlane.f32.xlu2 %v1180_v7 }
 0x366   :  { %v1128_v50 = vadd.f32 %v1119_v18, %v3754_v58 }
 0x368   :  { %v1142_v60 = vmax.f32 %v1128_v50, 0.0 }
 0x36a   :  { %v1159_v62 = vmul.f32 %v3726_v0, %v1142_v60 }
 0x36b   :  { %v1056_v15 = vpop.f32.mrf.mxu3 }
 0x36c   :  { %v1183_v19 = vsel %vm1093_vm4, %v1159_v62, 0.0  ;;  %v3761_v27 = vadd.f32 %v3719_v10, %v1056_v15 }
 0x36d   :  { %1184 = vadd.xlane.f32.xlu2 %v1183_v19 }
 0x36e   :  { %4383 = vst [vmem:[#allocation27_spill] sm:$0xff] %v3761_v27  ;;  %v1129_v25 = vadd.f32 %v1119_v18, %v3761_v27 }
 0x370   :  { %v1143_v1 = vmax.f32 %v1129_v25, 0.0 }
 0x372   :  { %v1160_v39 = vmul.f32 %v3726_v0, %v1143_v1 }
 0x373   :  { %v1059_v4 = vpop.f32.mrf.mxu3 }
 0x374   :  { %v3764_v6 = vadd.f32 %v3719_v10, %v1059_v4  ;;  %v1186_v30 = vsel %vm1093_vm4, %v1160_v39, 0.0 }
 0x376   :  { %v1130_v36 = vadd.f32 %v1120_v55, %v3764_v6 }
 0x378   :  { %v1144_v22 = vmax.f32 %v1130_v36, 0.0 }
 0x37a   :  { %v1161_v40 = vmul.f32 %v3726_v0, %v1144_v22 }
 0x37b   :  { %v1062_v13 = vpop.f32.mrf.mxu3 }
 0x37c   :  { %v3770_v41 = vadd.f32 %v3719_v10, %v1062_v13  ;;  %v1189_v9 = vsel %vm1093_vm4, %v1161_v40, 0.0 }
 0x37d   :  { %1190 = vadd.xlane.f32.xlu1 %v1189_v9 }
 0x37e   :  { %v1131_v29 = vadd.f32 %v1120_v55, %v3770_v41 }
 0x380   :  { %v1145_v17 = vmax.f32 %v1131_v29, 0.0 }
 0x382   :  { %v1162_v44 = vmul.f32 %v3726_v0, %v1145_v17 }
 0x383   :  { %v1065_v47 = vpop.f32.mrf.mxu3 }
 0x384   :  { %v3777_v18 = vadd.f32 %v3719_v10, %v1065_v47  ;;  %v1192_v24 = vsel %vm1093_vm4, %v1162_v44, 0.0 }
 0x385   :  { %1193 = vadd.xlane.f32.xlu2 %v1192_v24  ;;  %1187 = vadd.xlane.f32.xlu1 %v1186_v30 }
 0x386   :  { %v1132_v45 = vadd.f32 %v1120_v55, %v3777_v18 }
 0x388   :  { %v1146_v23 = vmax.f32 %v1132_v45, 0.0 }
 0x38a   :  { %v1163_v51 = vmul.f32 %v3726_v0, %v1146_v23 }
 0x38b   :  { %v1068_v12 = vpop.f32.mrf.mxu3 }
 0x38c   :  { %v3784_v11 = vadd.f32 %v3719_v10, %v1068_v12  ;;  %v1195_v53 = vsel %vm1093_vm4, %v1163_v51, 0.0 }
 0x38d   :  { %1196 = vadd.xlane.f32.xlu0 %v1195_v53  ;;  %v3808_v53 = vpop.permute.xlu1 %1213 }
 0x38e   :  { %v1133_v46 = vadd.f32 %v1120_v55, %v3784_v11 }
 0x390   :  { %v1147_v61 = vmax.f32 %v1133_v46, 0.0 }
 0x392   :  { %v1164_v7 = vmul.f32 %v3726_v0, %v1147_v61 }
 0x393   :  { %v1071_v50 = vpop.f32.mrf.mxu3 }
 0x394   :  { %v3790_v60 = vadd.f32 %v3719_v10, %v1071_v50  ;;  %v1198_v62 = vsel %vm1093_vm4, %v1164_v7, 0.0 }
 0x395   :  { %1199 = vadd.xlane.f32.xlu0 %v1198_v62 }
 0x396   :  { %v1134_v15 = vadd.f32 %v1120_v55, %v3790_v60 }
 0x398   :  { %v1148_v19 = vmax.f32 %v1134_v15, 0.0 }
 0x39a   :  { %v1165_v35 = vmul.f32 %v3726_v0, %v1148_v19 }
 0x39b   :  { %v1074_v4 = vpop.f32.mrf.mxu3 }
 0x39c   :  { %v3796_v36 = vadd.f32 %v3719_v10, %v1074_v4  ;;  %v1201_v25 = vsel %vm1093_vm4, %v1165_v35, 0.0 }
 0x39d   :  { %1202 = vadd.xlane.f32.xlu0 %v1201_v25 }
 0x39e   :  { %v1135_v22 = vadd.f32 %v1120_v55, %v3796_v36 }
 0x3a0   :  { %v1149_v40 = vmax.f32 %v1135_v22, 0.0 }
 0x3a2   :  { %v1166_v13 = vmul.f32 %v3726_v0, %v1149_v40 }
 0x3a3   :  { %v1077_v1 = vpop.f32.mrf.mxu3 }
 0x3a4   :  { %v3802_v9 = vadd.f32 %v3719_v10, %v1077_v1  ;;  %v1204_v29 = vsel %vm1093_vm4, %v1166_v13, 0.0 }
 0x3a5   :  { %1205 = vadd.xlane.f32.xlu0 %v1204_v29 }
 0x3a6   :  { %v1136_v17 = vadd.f32 %v1120_v55, %v3802_v9  ;;  %v3811_v55 = vand.u32 127, %v843_v37 }
 0x3a8   :  { %v1150_v39 = vmax.f32 %v1136_v17, 0.0  ;;  %4384 = vst [vmem:[#allocation28_spill] sm:$0xff] %v3811_v55  ;;  %v3814_v62 = vadd.s32 4294967288, %v3811_v55  ;;  %v3818_v19 = vadd.s32 4294967280, %v3811_v55  ;;  %v3823_v25 = vadd.s32 4294967272, %v3811_v55 }
 0x3a9   :  { %vm1082_vm11 = vcmp.lt.s32.totalorder %v3811_v55, 49 }
 0x3aa   :  { %v1167_v44 = vmul.f32 %v3726_v0, %v1150_v39  ;;  %4385 = vst [vmem:[#allocation29_spill] sm:$0xff] %v3814_v62  ;;  %v3831_v39 = vadd.s32 4294967264, %v3811_v55 }
 0x3ab   :  { %4386 = vst [vmem:[#allocation30_spill] sm:$0xff] %v3818_v19 }
 0x3ac   :  { %v1207_v47 = vsel %vm1093_vm4, %v1167_v44, 0.0  ;;  %4387 = vst [vmem:[#allocation31_spill] sm:$0xff] %v3823_v25 }
 0x3ad   :  { %1208 = vadd.xlane.f32.xlu2 %v1207_v47  ;;  %4388 = vst [vmem:[#allocation32_spill] sm:$0xff] %v3831_v39  ;;  %v3835_v47 = vadd.s32 4294967256, %v3811_v55 }
 0x3af   :  { %4389 = vst [vmem:[#allocation33_spill] sm:$0xff] %v3835_v47 }
 0x3b8   :  { %v1170_v24 = vpop.xlane.xlu2 %1169 }
 0x3b9   :  { %v1216_v40 = vadd.f32 %v3808_v53, %v1170_v24 }
 0x3bb   :  { %v1244_v27 = vperm.slane %v1216_v40, %v3811_v55 }
 0x3c0   :  { %v1173_v45 = vpop.xlane.xlu0 %1172 }
 0x3c1   :  { %v1217_v15 = vadd.f32 %v3808_v53, %v1173_v45 }
 0x3c3   :  { %v1246_v45 = vperm.slane %v1217_v15, %v3814_v62 }
 0x3c8   :  { %v1176_v30 = vpop.xlane.xlu2 %1175 }
 0x3c9   :  { %v1218_v4 = vadd.f32 %v3808_v53, %v1176_v30 }
 0x3d0   :  { %v1179_v23 = vpop.xlane.xlu2 %1178 }
 0x3d1   :  { %v1219_v13 = vadd.f32 %v3808_v53, %v1179_v23 }
 0x3d8   :  { %v1182_v12 = vpop.xlane.xlu2 %1181 }
 0x3d9   :  { %v1220_v44 = vadd.f32 %v3808_v53, %v1182_v12 }
 0x3e0   :  { %v1185_v46 = vpop.xlane.xlu2 %1184 }
 0x3e1   :  { %v1221_v24 = vadd.f32 %v3808_v53, %v1185_v46 }
 0x3f0   :  { %v1191_v61 = vpop.xlane.xlu1 %1190 }
 0x3f1   :  { %v1223_v1 = vadd.f32 %v3808_v53, %v1191_v61  ;;  %v3844_v61 = vadd.s32 4294967248, %v3811_v55 }
 0x3f3   :  { %4390 = vst [vmem:[#allocation34_spill] sm:$0xff] %v3844_v61  ;;  %v1269_v15 = vperm.slane %v1223_v1, %v3811_v55  ;;  %v1441_v55 = vld [vmem:[%s4393_s13 + $0x8] sm:$0xff] }
 0x3f8   :  { %v1194_v50 = vpop.xlane.xlu2 %1193  ;;  %v1188_v29 = vpop.xlane.xlu1 %1187 }
 0x3f9   :  { %v1224_v35 = vadd.f32 %v3808_v53, %v1194_v50  ;;  %v1222_v12 = vadd.f32 %v3808_v53, %v1188_v29  ;;  %v1262_v29 = vperm.slane %v1221_v24, %v3835_v47 }
 0x3fb   :  { %v1270_v23 = vperm.slane %v1224_v35, %v3814_v62  ;;  %v1258_v35 = vperm.slane %v1220_v44, %v3831_v39  ;;  %v1266_v1 = vperm.slane %v1222_v12, %v3844_v61  ;;  %v1440_v62 = vld [vmem:[%s4393_s13] sm:$0xff] }
 0x400   :  { %v1197_v51 = vpop.xlane.xlu0 %1196 }
 0x401   :  { %v1225_v37 = vadd.f32 %v3808_v53, %v1197_v51 }
 0x403   :  { %v1272_v50 = vperm.slane %v1225_v37, %v3818_v19  ;;  %v1271_v37 = vsel %vm1247_vm5, %v1270_v23, %v1269_v15 }
 0x408   :  { %v1200_v10 = vpop.xlane.xlu0 %1199 }
 0x409   :  { %v1226_v17 = vadd.f32 %v3808_v53, %v1200_v10  ;;  %v1250_v10 = vperm.slane %v1218_v4, %v3818_v19 }
 0x40b   :  { %v1274_v46 = vperm.slane %v1226_v17, %v3823_v25  ;;  %v1273_v17 = vsel %vm1251_vm6, %v1272_v50, %v1271_v37 }
 0x410   :  { %v1203_v7 = vpop.xlane.xlu0 %1202 }
 0x411   :  { %v1227_v30 = vadd.f32 %v3808_v53, %v1203_v7  ;;  %v1254_v7 = vperm.slane %v1219_v13, %v3823_v25 }
 0x413   :  { %v1276_v4 = vperm.slane %v1227_v30, %v3831_v39  ;;  %v1275_v39 = vsel %vm1255_vm7, %v1274_v46, %v1273_v17  ;;  %v3879_v17 = vadd.s32 24, %v3521_v26 }
 0x415   :  { %4391 = vst [vmem:[#allocation35_spill] sm:$0xff] %v3879_v17 }
 0x418   :  { %v1206_v22 = vpop.xlane.xlu0 %1205 }
 0x419   :  { %v1228_v51 = vadd.f32 %v3808_v53, %v1206_v22  ;;  %v1248_v22 = vsel %vm1247_vm5, %v1246_v45, %v1244_v27  ;;  %v1277_v45 = vsel %vm1259_vm8, %v1276_v4, %v1275_v39 }
 0x41a   :  { %v1252_v13 = vsel %vm1251_vm6, %v1250_v10, %v1248_v22  ;;  %v1306_v22 = vadd.s32 8, %v3521_v26 }
 0x41b   :  { %v1278_v40 = vperm.slane %v1228_v51, %v3835_v47  ;;  %v1256_v30 = vsel %vm1255_vm7, %v1254_v7, %v1252_v13 }
 0x41c   :  { %v1260_v27 = vsel %vm1259_vm8, %v1258_v35, %v1256_v30  ;;  %2767 = vset.pattern.permute.xlu2 %v1306_v22  ;;  %v3888_v30 = vadd.s32 40, %v3521_v26 }
 0x41d   :  { %v1264_v23 = vsel %vm1263_vm9, %v1262_v29, %v1260_v27  ;;  %v1279_v51 = vsel %vm1263_vm9, %v1278_v40, %v1277_v45  ;;  %v3891_v27 = vadd.s32 32, %v3521_v26  ;;  %v1451_v45 = vld [vmem:[%s4393_s13 + $0x58] sm:$0xff] }
 0x41e   :  { %v1268_v10 = vsel %vm1267_vm10, %v1266_v1, %v1264_v23  ;;  %4394 = vst [vmem:[#allocation37_spill] sm:$0xff] %v3888_v30  ;;  %1464 = vmatpush.msra.mxu3 %v1451_v45  ;;  %v3906_v23 = vld [vmem:[%s4393_s13 + $0x48] sm:$0xff] }
 0x41f   :  { %4395 = vst [vmem:[#allocation38_spill] sm:$0xff] %v3891_v27 }
 0x420   :  { %v1209_v19 = vpop.xlane.xlu2 %1208 }
 0x421   :  { %v1229_v44 = vadd.f32 %v3808_v53, %v1209_v19 }
 0x423   :  { %v1280_v24 = vperm.slane %v1229_v44, %v3844_v61  ;;  %v3882_v44 = vadd.s32 16, %v3521_v26 }
 0x425   :  { %v1281_v19 = vsel %vm1267_vm10, %v1280_v24, %v1279_v51  ;;  %4392 = vst [vmem:[#allocation36_spill] sm:$0xff] %v3882_v44  ;;  %v3901_v24 = vld [vmem:[%s4393_s13 + $0x50] sm:$0xff]  ;;  %v3909_v51 = vld [vmem:[%s4393_s13 + $0x40] sm:$0xff] }
 0x426   :  { %v1282_v12 = vsel %vm942_vm3, %v1281_v19, %v1268_v10  ;;  %1465 = vmatpush.msra.mxu3 %v3901_v24  ;;  %v3915_v10 = vld [vmem:[%s4393_s13 + $0x38] sm:$0xff]  ;;  %v3920_v19 = vld [vmem:[%s4393_s13 + $0x30] sm:$0xff] }
 0x427   :  { %v1284_v50 = vsel %vm1082_vm11, %v1282_v12, -1e+30  ;;  %v3923_v12 = vld [vmem:[%s4393_s13 + $0x28] sm:$0xff] }
 0x428   :  { %v1286_v39 = vsel %vm1285_vm12, %v1284_v50, -inf  ;;  %1466 = vmatpush.msra.mxu3 %v3906_v23 }
 0x429   :  { %1287 = vmax.xlane.f32.xlu0 %v1286_v39  ;;  %v3931_v39 = vld [vmem:[%s4393_s13 + $0x18] sm:$0xff] }
 0x42a   :  { %1467 = vmatpush.msra.mxu3 %v3909_v51 }
 0x42c   :  { %1468 = vmatpush.msra.mxu3 %v3915_v10 }
 0x42e   :  { %1469 = vmatpush.msra.mxu3 %v3920_v19 }
 0x430   :  { %1470 = vmatpush.msra.mxu3 %v3923_v12 }
 0x49c   :  { %v1288_v7 = vpop.xlane.xlu0 %1287 }
 0x49d   :  { %v1289_v15 = vsub.f32 %v1284_v50, %v1288_v7  ;;  %v3928_v50 = vld [vmem:[%s4393_s13 + $0x20] sm:$0xff] }
 0x49e   :  { %1471 = vmatpush.msra.mxu3 %v3928_v50 }
 0x49f   :  { %v1290_v46 = vmul.f32 1.442695, %v1289_v15 }
 0x4a0   :  { %1472 = vmatpush.msra.mxu3 %v3931_v39 }
 0x4a1   :  { %2809 = vpow2.f32 %v1290_v46 }
 0x4a7   :  { %v2810_v35 = vpop.eup %2809 }
 0x4a8   :  { %v1292_v4 = vsel %vm1285_vm12, %v2810_v35, 0.0 }
 0x4a9   :  { %1293 = vadd.xlane.f32.xlu2 %v1292_v4 }
 0x51c   :  { %v1294_v29 = vpop.xlane.xlu2 %1293 }
 0x51d   :  { %2811 = vrcp.f32 %v1294_v29  ;;  %v3936_v29 = vld [vmem:[%s4393_s13 + $0x10] sm:$0xff] }
 0x51e   :  { %1473 = vmatpush.msra.mxu3 %v3936_v29 }
 0x520   :  { %1474 = vmatpush.msra.mxu3 %v1441_v55 }
 0x522   :  { %1475 = vmatpush.msra.mxu3 %v1440_v62 }
 0x523   :  { %v2812_v37 = vpop.eup %2811 }
 0x524   :  { %v1296_v40 = vmul.f32 %v2812_v37, %v2810_v35  ;;  %1930 = vmatpush.msrb.mxu3 %v1451_v45 }
 0x526   :  { %v1297_v13 = vperm.slane %v1296_v40, 0  ;;  %v1340_v1 = vperm.slane %v1296_v40, 1  ;;  %1931 = vmatpush.msrb.mxu3 %v3901_v24 }
 0x528   :  { %1345 = vperm.xlu1 %2768, %v1340_v1   ;;  %1308 = vperm.xlu2 %2767, %v1297_v13  }
 0x529   :  { %1302 = vperm.xlu0 %2766, %v1297_v13   ;;  %1932 = vmatpush.msrb.mxu3 %v3906_v23 }
 0x52b   :  { %1933 = vmatpush.msrb.mxu3 %v3909_v51 }
 0x52d   :  { %1934 = vmatpush.msrb.mxu3 %v3915_v10 }
 0x52f   :  { %1935 = vmatpush.msrb.mxu3 %v3920_v19 }
 0x530   :  { %2772 = vset.pattern.permute.xlu1 %v3879_v17  ;;  %1351 = vperm.xlu2 %2767, %v1340_v1  }
 0x531   :  { %2770 = vset.pattern.permute.xlu0 %v3882_v44  ;;  %1936 = vmatpush.msrb.mxu3 %v3923_v12 }
 0x533   :  { %1937 = vmatpush.msrb.mxu3 %v3928_v50 }
 0x535   :  { %1938 = vmatpush.msrb.mxu3 %v3931_v39 }
 0x537   :  { %1939 = vmatpush.msrb.mxu3 %v3936_v29  ;;  %v3985_v29 = vld [vmem:[%s4396_s17] ss:$0 sm:$0xff] }
 0x538   :  { %1363 = vperm.xlu1 %2772, %v1340_v1   ;;  %2769 = vset.pattern.permute.xlu2 %v3882_v44 }
 0x539   :  { %1357 = vperm.xlu0 %2770, %v1340_v1   ;;  %1940 = vmatpush.msrb.mxu3 %v1441_v55 }
 0x53b   :  { %1941 = vmatpush.msrb.mxu3 %v1440_v62 }
 0x540   :  { %2775 = vset.pattern.permute.xlu1 %v3888_v30  ;;  %1314 = vperm.xlu2 %2769, %v1297_v13  }
 0x541   :  { %2774 = vset.pattern.permute.xlu0 %v3891_v27 }
 0x548   :  { %1332 = vperm.xlu1 %2775, %v1297_v13   ;;  %2771 = vset.pattern.permute.xlu2 %v3879_v17 }
 0x549   :  { %1369 = vperm.xlu0 %2774, %v1340_v1  }
 0x550   :  { %2777 = vset.pattern.permute.xlu1 %v3552_v54  ;;  %1320 = vperm.xlu2 %2771, %v1297_v13  }
 0x551   :  { %2779 = vset.pattern.permute.xlu0 %v3521_v26 }
 0x558   :  { %1338 = vperm.xlu1 %2777, %v1297_v13   ;;  %2773 = vset.pattern.permute.xlu2 %v3891_v27 }
 0x560   :  { %1326 = vperm.xlu2 %2773, %v1297_v13   ;;  %2780 = vset.pattern.permute.xlu1 %v1306_v22 }
 0x568   :  { %2776 = vset.pattern.permute.xlu2 %v3888_v30 }
 0x570   :  { %1375 = vperm.xlu2 %2776, %v1340_v1  }
 0x578   :  { %2778 = vset.pattern.permute.xlu2 %v3552_v54 }
 0x580   :  { %1381 = vperm.xlu2 %2778, %v1340_v1  }
 0x582   :  { %v1309_v7 = vpop.permute.xlu2 %1308 }
 0x583   :  { %v1384_v40 = vmul.f32 %v1309_v7, %v3660_v31 }
 0x585   :  { %v1398_v27 = vsel %vm190_vm0, %v1384_v40, 0.0 }
 0x588   :  { %2781 = vset.pattern.permute.xlu2 %v3521_v26 }
 0x58a   :  { %v1352_v15 = vpop.permute.xlu2 %1351 }
 0x59a   :  { %v1346_v26 = vpop.permute.xlu1 %1345  ;;  %v1315_v46 = vpop.permute.xlu2 %1314 }
 0x59b   :  { %v1303_v35 = vpop.permute.xlu0 %1302  ;;  %v1385_v54 = vmul.f32 %v1315_v46, %v3664_v34  ;;  %v1390_v40 = vmul.f32 %v1346_v26, %v3684_v38 }
 0x59c   :  { %v1383_v37 = vmul.f32 %v1303_v35, %v3656_v5 }
 0x59d   :  { %v1400_v47 = vsel %vm190_vm0, %v1385_v54, 0.0  ;;  %v1391_v54 = vmul.f32 %v1352_v15, %v3688_v42 }
 0x59e   :  { %v1397_v13 = vsel %vm190_vm0, %v1383_v37, 0.0 }
 0x59f   :  { %v1399_v44 = vadd.f32 %v1398_v27, %v1397_v13 }
 0x5a1   :  { %v1401_v7 = vadd.f32 %v1400_v47, %v1399_v44  ;;  %v1416_v47 = vsel %vm190_vm0, %v1390_v40, 0.0 }
 0x5aa   :  { %v1364_v4 = vpop.permute.xlu1 %1363  ;;  %v1321_v22 = vpop.permute.xlu2 %1320 }
 0x5ab   :  { %v1386_v17 = vmul.f32 %v1321_v22, %v3668_v63  ;;  %v1358_v5 = vpop.permute.xlu0 %1357 }
 0x5ad   :  { %v1402_v35 = vsel %vm190_vm0, %v1386_v17, 0.0  ;;  %v1392_v17 = vmul.f32 %v1358_v5, %v3692_v56  ;;  %v1393_v5 = vmul.f32 %v1364_v4, %v3696_v57 }
 0x5ae   :  { %v1403_v31 = vadd.f32 %v1402_v35, %v1401_v7 }
 0x5af   :  { %v1421_v24 = vsel %vm190_vm0, %v1393_v5, 0.0 }
 0x5ba   :  { %v1333_v1 = vpop.permute.xlu1 %1332  ;;  %v1327_v30 = vpop.permute.xlu2 %1326 }
 0x5bb   :  { %v1387_v61 = vmul.f32 %v1327_v30, %v3672_v48  ;;  %v1388_v46 = vmul.f32 %v1333_v1, %v3676_v52  ;;  %v1370_v22 = vpop.permute.xlu0 %1369 }
 0x5bc   :  { %v1394_v45 = vmul.f32 %v1370_v22, %v3700_v2 }
 0x5bd   :  { %v1404_v37 = vsel %vm190_vm0, %v1387_v61, 0.0  ;;  %v1406_v61 = vsel %vm190_vm0, %v1388_v46, 0.0 }
 0x5be   :  { %v1405_v30 = vadd.f32 %v1404_v37, %v1403_v31  ;;  %v1419_v31 = vsel %vm190_vm0, %v1392_v17, 0.0  ;;  %v1423_v40 = vsel %vm190_vm0, %v1394_v45, 0.0 }
 0x5c0   :  { %v1407_v26 = vadd.f32 %v1406_v61, %v1405_v30 }
 0x5ca   :  { %v1339_v25 = vpop.permute.xlu1 %1338  ;;  %v1376_v1 = vpop.permute.xlu2 %1375 }
 0x5cb   :  { %v1389_v27 = vmul.f32 %v1339_v25, %v3680_v16  ;;  %v1417_v25 = vsel %vm190_vm0, %v1391_v54, 0.0  ;;  %v1395_v7 = vmul.f32 %v1376_v1, %v3704_v21 }
 0x5cc   :  { %v1418_v13 = vadd.f32 %v1417_v25, %v1416_v47 }
 0x5cd   :  { %v1408_v44 = vsel %vm190_vm0, %v1389_v27, 0.0  ;;  %v1425_v23 = vsel %vm190_vm0, %v1395_v7, 0.0 }
 0x5ce   :  { %v1409_v15 = vadd.f32 %v1408_v44, %v1407_v26  ;;  %v1420_v35 = vadd.f32 %v1419_v31, %v1418_v13 }
 0x5d0   :  { %v1410_v37 = vrot.slane %v1409_v15, 4  ;;  %v1422_v46 = vadd.f32 %v1421_v24, %v1420_v35 }
 0x5d2   :  { %v1424_v4 = vadd.f32 %v1423_v40, %v1422_v46  ;;  %v1411_v27 = vadd.f32 %v1410_v37, %v1409_v15 }
 0x5d4   :  { %v1426_v54 = vadd.f32 %v1425_v23, %v1424_v4  ;;  %v1412_v17 = vrot.slane %v1411_v27, 2 }
 0x5d6   :  { %v1413_v19 = vadd.f32 %v1412_v17, %v1411_v27 }
 0x5d8   :  { %v1414_v12 = vrot.slane %v1413_v19, 1 }
 0x5da   :  { %v1382_v30 = vpop.permute.xlu2 %1381  ;;  %v1415_v31 = vadd.f32 %v1414_v12, %v1413_v19  ;;  %v1529_v19 = vld [vmem:[%s3052_s9 + $0x38] sm:$0xff]  ;;  %v1526_v12 = vld [vmem:[%s3052_s9 + $0x20] sm:$0xff] }
 0x5db   :  { %v1396_v51 = vmul.f32 %v1382_v30, %v3708_v32  ;;  %1545 = vmatpush.msra.mxu2 %v1529_v19 }
 0x5dd   :  { %v1427_v10 = vsel %vm190_vm0, %v1396_v51, 0.0 }
 0x5de   :  { %v1428_v47 = vadd.f32 %v1427_v10, %v1426_v54 }
 0x5e0   :  { %v1429_v61 = vrot.slane %v1428_v47, 4 }
 0x5e2   :  { %v1430_v44 = vadd.f32 %v1429_v61, %v1428_v47 }
 0x5e4   :  { %v1431_v22 = vrot.slane %v1430_v44, 2 }
 0x5e6   :  { %v1432_v26 = vadd.f32 %v1431_v22, %v1430_v44  ;;  %v1528_v44 = vld [vmem:[%s3052_s9 + $0x30] sm:$0xff]  ;;  %v1527_v22 = vld [vmem:[%s3052_s9 + $0x28] sm:$0xff] }
 0x5e7   :  { %1546 = vmatpush.msra.mxu2 %v1528_v44 }
 0x5e8   :  { %v1433_v25 = vrot.slane %v1432_v26, 1 }
 0x5e9   :  { %1547 = vmatpush.msra.mxu2 %v1527_v22 }
 0x5ea   :  { %v1434_v50 = vadd.f32 %v1433_v25, %v1432_v26  ;;  %v1525_v26 = vld [vmem:[%s3052_s9 + $0x18] sm:$0xff]  ;;  %v1524_v25 = vld [vmem:[%s3052_s9 + $0x10] sm:$0xff] }
 0x5eb   :  { %1548 = vmatpush.msra.mxu2 %v1526_v12 }
 0x5ec   :  { %v3979_v13 = vsel %vm942_vm3, %v1434_v50, %v1415_v31  ;;  %v1523_v31 = vld [vmem:[%s3052_s9 + $0x8] sm:$0xff] }
 0x5ed   :  { %v1439_v39 = vsel %vm190_vm0, %v3979_v13, 0.0  ;;  %1549 = vmatpush.msra.mxu2 %v1525_v26 }
 0x5ee   :  { %2699 = vmatmul.msk.f32.vlgmr.msra.gmra.mxu3 %vm1456_vm13, %v1439_v39 }
 0x5ef   :  { %1550 = vmatpush.msra.mxu2 %v1524_v25 }
 0x5f1   :  { %1551 = vmatpush.msra.mxu2 %v1523_v31 }
 0x671   :  { %v1477_v15 = vpop.f32.mrf.mxu3 }
 0x672   :  { %v1478_v55 = vadd.f32 %v3985_v29, %v1477_v15  ;;  %v1522_v15 = vld [vmem:[%s3052_s9] sm:$0xff]  ;;  %s2954_s9 = smov 96  }
 0x673   :  { %1552 = vmatpush.msra.mxu2 %v1522_v15 }
 0x674   :  { %2813 = vtanh.f32 %v1478_v55  ;;  %v2700_v1 = vmul.f32 -1.442695, %v1478_v55  ;;  %v2887_v55 = vld [vmem:[%s3024_s30 + $0x18] sm:$0xff]  ;;  %s4419_s30 = sld [smem:[#allocation14_spill]] }
 0x675   :  { %1611 = vmatpush.msrb.mxu2 %v2887_v55 }
 0x676   :  { %2815 = vpow2.f32 %v2700_v1 }
 0x677   :  { %1612 = vmatpush.msrb.mxu2 %v3611_v43 }
 0x679   :  { %1613 = vmatpush.msrb.mxu2 %v3629_v3 }
 0x67a   :  { %v2814_v62 = vpop.eup %2813 }
 0x67b   :  { %1502 = vrot.lane.b32.xlu0 %v2814_v62, %s2950_s0  ;;  %1614 = vmatpush.msrb.mxu2 %v3639_v59 }
 0x67c   :  { %v2816_v5 = vpop.eup %2815 }
 0x67d   :  { %v1483_v45 = vadd.f32 1.0, %v2816_v5  ;;  %v4013_v5 = vld [vmem:[%s4397_s25] ss:$0 sm:$0xff] }
 0x67f   :  { %2817 = vrcp.f32 %v1483_v45  ;;  %v1495_v46 = vand.u32 2147483648, %v1483_v45  ;;  %vm1489_vm15 = vweird.f32 %v1483_v45  ;;  %v1493_v23 = vand.u32 2147483647, %v1483_v45 }
 0x681   :  { %v1496_v27 = vor.u32 1.1754944e-38, %v1495_v46  ;;  %vm1494_vm2 = vcmp.eq.f32.partialorder %v1493_v23, 8.507059e+37 }
 0x685   :  { %v2818_v35 = vpop.eup %2817 }
 0x686   :  { %v1485_v7 = vmul.f32 %v2818_v35, %v1483_v45  ;;  %vm1490_vm14 = vweird.f32 %v2818_v35 }
 0x687   :  { %vm1491_vm1 = vmor %vm1489_vm15, %vm1490_vm14 }
 0x688   :  { %v1486_v37 = vsub.f32 1.0, %v1485_v7 }
 0x68a   :  { %v1487_v24 = vmul.f32 %v2818_v35, %v1486_v37 }
 0x68c   :  { %v1488_v40 = vadd.f32 %v2818_v35, %v1487_v24 }
 0x68e   :  { %v1492_v4 = vsel %vm1491_vm1, %v2818_v35, %v1488_v40 }
 0x68f   :  { %v1497_v51 = vsel %vm1494_vm2, %v1496_v27, %v1492_v4 }
 0x690   :  { %v1500_v10 = vmul.f32 0.0, %v1497_v51 }
 0x6ed   :  { %v1503_v30 = vpop.permute.xlu0 %1502 }
 0x6ee   :  { %v1505_v54 = vmul.f32 %v1503_v30, %v1497_v51 }
 0x6f0   :  { %1507 = vrot.lane.b32.xlu1 %v1505_v54, %s2953_s21 }
 0x762   :  { %v1508_v17 = vpop.permute.xlu1 %1507 }
 0x763   :  { %v3990_v47 = vadd.f32 %v1508_v17, %v1500_v10 }
 0x765   :  { %2819 = vtanh.f32 %v3990_v47 }
 0x76b   :  { %v2820_v61 = vpop.eup %2819 }
 0x76c   :  { %1513 = vrot.lane.b32.xlu2 %v2820_v61, %s2950_s0 }
 0x7c6   :  { %v1514_v50 = vpop.permute.xlu2 %1513 }
 0x7c7   :  { %v4001_v39 = vmul.f32 %v1514_v50, %v1497_v51 }
 0x7c9   :  { %1518 = vrot.lane.b32.xlu0 %v4001_v39, %s2953_s21 }
 0x83b   :  { %v1519_v62 = vpop.permute.xlu0 %1518 }
 0x83c   :  { %v1521_v1 = vsel %vm1093_vm4, %v1519_v62, 0.0 }
 0x83d   :  { %2701 = vmatmul.msk.f32.vlgmr.msra.gmra.mxu2 %vm190_vm0, %v1521_v1 }
 0x83e   :  { %2002 = vmatpush.msra.mxu2 %v1529_v19 }
 0x840   :  { %2003 = vmatpush.msra.mxu2 %v1528_v44 }
 0x842   :  { %2004 = vmatpush.msra.mxu2 %v1527_v22 }
 0x844   :  { %2005 = vmatpush.msra.mxu2 %v1526_v12 }
 0x846   :  { %2006 = vmatpush.msra.mxu2 %v1525_v26 }
 0x848   :  { %2007 = vmatpush.msra.mxu2 %v1524_v25 }
 0x84a   :  { %2008 = vmatpush.msra.mxu2 %v1523_v31 }
 0x84c   :  { %2009 = vmatpush.msra.mxu2 %v1522_v15 }
 0x8c0   :  { %v1554_v43 = vpop.f32.mrf.mxu2 }
 0x8c1   :  { %v1555_v3 = vadd.f32 %v4013_v5, %v1554_v43 }
 0x8c3   :  { %2821 = vtanh.f32 %v1555_v3  ;;  %v2702_v45 = vmul.f32 -1.442695, %v1555_v3 }
 0x8c5   :  { %2823 = vpow2.f32 %v2702_v45 }
 0x8c9   :  { %v2822_v59 = vpop.eup %2821 }
 0x8ca   :  { %1579 = vrot.lane.b32.xlu1 %v2822_v59, %s2950_s0 }
 0x8cb   :  { %v2824_v35 = vpop.eup %2823 }
 0x8cc   :  { %v1560_v7 = vadd.f32 1.0, %v2824_v35 }
 0x8ce   :  { %2825 = vrcp.f32 %v1560_v7  ;;  %v1572_v4 = vand.u32 2147483648, %v1560_v7  ;;  %vm1566_vm15 = vweird.f32 %v1560_v7  ;;  %v1570_v27 = vand.u32 2147483647, %v1560_v7 }
 0x8d0   :  { %v1573_v51 = vor.u32 1.1754944e-38, %v1572_v4  ;;  %vm1571_vm2 = vcmp.eq.f32.partialorder %v1570_v27, 8.507059e+37 }
 0x8d4   :  { %v2826_v37 = vpop.eup %2825 }
 0x8d5   :  { %v1562_v24 = vmul.f32 %v2826_v37, %v1560_v7  ;;  %vm1567_vm14 = vweird.f32 %v2826_v37 }
 0x8d6   :  { %vm1568_vm1 = vmor %vm1566_vm15, %vm1567_vm14  ;;  %vm2054_vm14 = vcmask 1041408  }
 0x8d7   :  { %v1563_v40 = vsub.f32 1.0, %v1562_v24 }
 0x8d9   :  { %v1564_v46 = vmul.f32 %v2826_v37, %v1563_v40 }
 0x8db   :  { %v1565_v23 = vadd.f32 %v2826_v37, %v1564_v46 }
 0x8dd   :  { %v1569_v30 = vsel %vm1568_vm1, %v2826_v37, %v1565_v23 }
 0x8de   :  { %v1574_v10 = vsel %vm1571_vm2, %v1573_v51, %v1569_v30 }
 0x8df   :  { %v1577_v61 = vmul.f32 0.0, %v1574_v10 }
 0x93c   :  { %v1580_v54 = vpop.permute.xlu1 %1579 }
 0x93d   :  { %v1582_v17 = vmul.f32 %v1580_v54, %v1574_v10 }
 0x93f   :  { %1584 = vrot.lane.b32.xlu2 %v1582_v17, %s2953_s21 }
 0x999   :  { %v1585_v19 = vpop.permute.xlu2 %1584 }
 0x99a   :  { %v4018_v44 = vadd.f32 %v1585_v19, %v1577_v61 }
 0x99c   :  { %2827 = vtanh.f32 %v4018_v44 }
 0x9a2   :  { %v2828_v22 = vpop.eup %2827 }
 0x9a3   :  { %1590 = vrot.lane.b32.xlu0 %v2828_v22, %s2950_s0 }
 0xa15   :  { %v1591_v12 = vpop.permute.xlu0 %1590 }
 0xa16   :  { %v4022_v26 = vmul.f32 %v1591_v12, %v1574_v10 }
 0xa18   :  { %1595 = vrot.lane.b32.xlu1 %v4022_v26, %s2953_s21 }
 0xa8a   :  { %v1596_v25 = vpop.permute.xlu1 %1595 }
 0xa8b   :  { %2703 = vmatmul.msk.f32.vlgmr.msrb.gmra.mxu2 %vm1093_vm4, %v1596_v25 }
 0xb0e   :  { %v1616_v31 = vpop.f32.mrf.mxu2 }
 0xb0f   :  { %v1617_v50 = vadd.f32 %v3715_v20, %v1616_v31 }
 0xb11   :  { %v1620_v15 = vrot.slane %v1617_v50, 1  ;;  %v1621_v55 = vperm.slane %v1617_v50, 0 }
 0xb13   :  { %v1622_v62 = vperm.slane %v1620_v15, 0  ;;  %v1629_v1 = vadd.f32 %v1621_v55, %v3748_v49  ;;  %v1626_v43 = vadd.f32 %v1621_v55, %v3730_v33  ;;  %v1625_v3 = vadd.f32 %v1621_v55, %v3722_v14 }
 0xb14   :  { %v1627_v59 = vadd.f32 %v1621_v55, %v3736_v28  ;;  %v1628_v24 = vadd.f32 %v1621_v55, %v3742_v8  ;;  %v1630_v27 = vadd.f32 %v1621_v55, %v3754_v58 }
 0xb15   :  { %v1643_v45 = vmax.f32 %v1629_v1, 0.0  ;;  %v1640_v35 = vmax.f32 %v1626_v43, 0.0  ;;  %v1639_v7 = vmax.f32 %v1625_v3, 0.0  ;;  %v1632_v37 = vadd.f32 %v1622_v62, %v3764_v6 }
 0xb16   :  { %v1641_v49 = vmax.f32 %v1627_v59, 0.0  ;;  %v1642_v4 = vmax.f32 %v1628_v24, 0.0  ;;  %v1634_v30 = vadd.f32 %v1622_v62, %v3777_v18  ;;  %v1633_v54 = vadd.f32 %v1622_v62, %v3770_v41 }
 0xb17   :  { %v1657_v20 = vmul.f32 %v3726_v0, %v1643_v45  ;;  %v1654_v40 = vmul.f32 %v3726_v0, %v1640_v35  ;;  %v1653_v46 = vmul.f32 %v3726_v0, %v1639_v7  ;;  %v1646_v23 = vmax.f32 %v1632_v37, 0.0  ;;  %v4398_v7 = vld [vmem:[#allocation27_spill] sm:$0xff] }
 0xb18   :  { %v1655_v8 = vmul.f32 %v3726_v0, %v1641_v49  ;;  %v1656_v51 = vmul.f32 %v3726_v0, %v1642_v4  ;;  %v1644_v61 = vmax.f32 %v1630_v27, 0.0  ;;  %v1648_v19 = vmax.f32 %v1634_v30, 0.0 }
 0xb19   :  { %v1679_v33 = vsel %vm1093_vm4, %v1657_v20, 0.0  ;;  %v1670_v14 = vsel %vm1093_vm4, %v1654_v40, 0.0  ;;  %v1667_v28 = vsel %vm1093_vm4, %v1653_v46, 0.0  ;;  %v1660_v6 = vmul.f32 %v3726_v0, %v1646_v23 }
 0xb1a   :  { %1680 = vadd.xlane.f32.xlu1 %v1679_v33  ;;  %1671 = vadd.xlane.f32.xlu0 %v1670_v14  ;;  %v1673_v10 = vsel %vm1093_vm4, %v1655_v8, 0.0  ;;  %v1676_v22 = vsel %vm1093_vm4, %v1656_v51, 0.0  ;;  %v1647_v12 = vmax.f32 %v1633_v54, 0.0  ;;  %v1658_v58 = vmul.f32 %v3726_v0, %v1644_v61 }
 0xb1b   :  { %1668 = vadd.xlane.f32.xlu2 %v1667_v28  ;;  %v1688_v17 = vsel %vm1093_vm4, %v1660_v6, 0.0  ;;  %v1662_v18 = vmul.f32 %v3726_v0, %v1648_v19  ;;  %v1635_v25 = vadd.f32 %v1622_v62, %v3784_v11  ;;  %v1637_v41 = vadd.f32 %v1622_v62, %v3796_v36 }
 0xb1c   :  { %v1661_v31 = vmul.f32 %v3726_v0, %v1647_v12  ;;  %v1636_v50 = vadd.f32 %v1622_v62, %v3790_v60  ;;  %v1682_v15 = vsel %vm1093_vm4, %v1658_v58, 0.0  ;;  %v1638_v35 = vadd.f32 %v1622_v62, %v3802_v9 }
 0xb1d   :  { %v1694_v1 = vsel %vm1093_vm4, %v1662_v18, 0.0  ;;  %v1649_v43 = vmax.f32 %v1635_v25, 0.0  ;;  %v1651_v3 = vmax.f32 %v1637_v41, 0.0  ;;  %v1631_v37 = vadd.f32 %v1621_v55, %v4398_v7  ;;  %v4400_v18 = vld [vmem:[#allocation28_spill] sm:$0xff] }
 0xb1e   :  { %v1691_v59 = vsel %vm1093_vm4, %v1661_v31, 0.0  ;;  %v1650_v45 = vmax.f32 %v1636_v50, 0.0  ;;  %v1652_v40 = vmax.f32 %v1638_v35, 0.0 }
 0xb1f   :  { %v1663_v11 = vmul.f32 %v3726_v0, %v1649_v43  ;;  %v1665_v36 = vmul.f32 %v3726_v0, %v1651_v3  ;;  %v1645_v49 = vmax.f32 %v1631_v37, 0.0 }
 0xb20   :  { %v1664_v60 = vmul.f32 %v3726_v0, %v1650_v45  ;;  %v1666_v33 = vmul.f32 %v3726_v0, %v1652_v40  ;;  %v4403_v40 = vld [vmem:[#allocation32_spill] sm:$0xff] }
 0xb21   :  { %v1697_v24 = vsel %vm1093_vm4, %v1663_v11, 0.0  ;;  %v1703_v20 = vsel %vm1093_vm4, %v1665_v36, 0.0  ;;  %v1659_v14 = vmul.f32 %v3726_v0, %v1645_v49  ;;  %v4402_v36 = vld [vmem:[#allocation31_spill] sm:$0xff] }
 0xb22   :  { %1674 = vadd.xlane.f32.xlu0 %v1673_v10  ;;  %1689 = vadd.xlane.f32.xlu1 %v1688_v17  ;;  %v1700_v46 = vsel %vm1093_vm4, %v1664_v60, 0.0  ;;  %v1706_v9 = vsel %vm1093_vm4, %v1666_v33, 0.0 }
 0xb23   :  { %1677 = vadd.xlane.f32.xlu2 %v1676_v22  ;;  %v1685_v55 = vsel %vm1093_vm4, %v1659_v14, 0.0  ;;  %v4399_v22 = vld [vmem:[#allocation29_spill] sm:$0xff] }
 0xb2a   :  { %1683 = vadd.xlane.f32.xlu0 %v1682_v15  ;;  %1695 = vadd.xlane.f32.xlu1 %v1694_v1  ;;  %v4401_v15 = vld [vmem:[#allocation30_spill] sm:$0xff] }
 0xb2b   :  { %1692 = vadd.xlane.f32.xlu2 %v1691_v59 }
 0xb32   :  { %1698 = vadd.xlane.f32.xlu0 %v1697_v24  ;;  %1704 = vadd.xlane.f32.xlu1 %v1703_v20 }
 0xb33   :  { %1701 = vadd.xlane.f32.xlu2 %v1700_v46 }
 0xb3a   :  { %1707 = vadd.xlane.f32.xlu0 %v1706_v9 }
 0xb3b   :  { %1686 = vadd.xlane.f32.xlu2 %v1685_v55 }
 0xb8d   :  { %v1681_v62 = vpop.xlane.xlu1 %1680  ;;  %v1672_v28 = vpop.xlane.xlu0 %1671 }
 0xb8e   :  { %v1669_v23 = vpop.xlane.xlu2 %1668  ;;  %v1710_v10 = vadd.f32 %v1672_v28, %v3808_v53  ;;  %v1713_v49 = vadd.f32 %v1681_v62, %v3808_v53 }
 0xb8f   :  { %v1709_v0 = vadd.f32 %v1669_v23, %v3808_v53  ;;  %v4404_v23 = vld [vmem:[#allocation33_spill] sm:$0xff] }
 0xb90   :  { %v1738_v58 = vperm.slane %v1710_v10, %v4399_v22 }
 0xb91   :  { %v1737_v25 = vperm.slane %v1709_v0, %v4400_v18 }
 0xb93   :  { %v1739_v7 = vsel %vm1247_vm5, %v1738_v58, %v1737_v25 }
 0xb95   :  { %v1675_v4 = vpop.xlane.xlu0 %1674  ;;  %v1690_v8 = vpop.xlane.xlu1 %1689 }
 0xb96   :  { %v1678_v6 = vpop.xlane.xlu2 %1677  ;;  %v1716_v17 = vadd.f32 %v1690_v8, %v3808_v53  ;;  %v1711_v19 = vadd.f32 %v1675_v4, %v3808_v53 }
 0xb97   :  { %v1712_v50 = vadd.f32 %v1678_v6, %v3808_v53 }
 0xb98   :  { %v1750_v41 = vperm.slane %v1716_v17, %v4400_v18  ;;  %v1740_v59 = vperm.slane %v1711_v19, %v4401_v15  ;;  %v4406_v18 = vld [vmem:[#allocation36_spill] sm:$0xff] }
 0xb99   :  { %v1742_v37 = vperm.slane %v1712_v50, %v4402_v36 }
 0xb9a   :  { %v1741_v33 = vsel %vm1251_vm6, %v1740_v59, %v1739_v7  ;;  %v4410_v7 = vld [vmem:[#allocation37_spill] sm:$0xff] }
 0xb9b   :  { %v1743_v28 = vsel %vm1255_vm7, %v1742_v37, %v1741_v33  ;;  %v4411_v33 = vld [vmem:[#allocation26_spill] sm:$0xff] }
 0xb9d   :  { %v1684_v27 = vpop.xlane.xlu0 %1683  ;;  %v1696_v51 = vpop.xlane.xlu1 %1695 }
 0xb9e   :  { %v1693_v30 = vpop.xlane.xlu2 %1692  ;;  %v1718_v61 = vadd.f32 %v1696_v51, %v3808_v53  ;;  %v1714_v24 = vadd.f32 %v1684_v27, %v3808_v53 }
 0xb9f   :  { %v1717_v54 = vadd.f32 %v1693_v30, %v3808_v53  ;;  %v1744_v30 = vperm.slane %v1713_v49, %v4403_v40 }
 0xba0   :  { %v1753_v1 = vperm.slane %v1718_v61, %v4401_v15  ;;  %v1746_v4 = vperm.slane %v1714_v24, %v4404_v23 }
 0xba1   :  { %v1751_v12 = vperm.slane %v1717_v54, %v4399_v22  ;;  %v4405_v54 = vld [vmem:[#allocation34_spill] sm:$0xff]  ;;  %v1745_v17 = vsel %vm1259_vm8, %v1744_v30, %v1743_v28 }
 0xba2   :  { %v1747_v19 = vsel %vm1263_vm9, %v1746_v4, %v1745_v17 }
 0xba3   :  { %v1752_v45 = vsel %vm1247_vm5, %v1751_v12, %v1750_v41  ;;  %vm2056_vm5 = vcmask 1043459  }
 0xba4   :  { %v1754_v20 = vsel %vm1251_vm6, %v1753_v1, %v1752_v45 }
 0xba5   :  { %v1699_v31 = vpop.xlane.xlu0 %1698  ;;  %v1705_v60 = vpop.xlane.xlu1 %1704 }
 0xba6   :  { %v1719_v43 = vadd.f32 %v1699_v31, %v3808_v53  ;;  %v1702_v3 = vpop.xlane.xlu2 %1701  ;;  %v1721_v9 = vadd.f32 %v1705_v60, %v3808_v53  ;;  %v4409_v60 = vld [vmem:[#allocation38_spill] sm:$0xff] }
 0xba7   :  { %v1720_v11 = vadd.f32 %v1702_v3, %v3808_v53 }
 0xba8   :  { %v1755_v35 = vperm.slane %v1719_v43, %v4402_v36  ;;  %v1759_v62 = vperm.slane %v1721_v9, %v4404_v23  ;;  %v4407_v36 = vld [vmem:[#allocation35_spill] sm:$0xff]  ;;  %v4412_v9 = vld [vmem:[#allocation25_spill] sm:$0xff] }
 0xba9   :  { %v1757_v46 = vperm.slane %v1720_v11, %v4403_v40 }
 0xbaa   :  { %v1756_v14 = vsel %vm1255_vm7, %v1755_v35, %v1754_v20  ;;  %v4408_v35 = vld [vmem:[#allocation24_spill] sm:$0xff] }
 0xbab   :  { %v1758_v8 = vsel %vm1259_vm8, %v1757_v46, %v1756_v14 }
 0xbac   :  { %v1760_v61 = vsel %vm1263_vm9, %v1759_v62, %v1758_v8 }
 0xbad   :  { %v1708_v55 = vpop.xlane.xlu0 %1707 }
 0xbae   :  { %v1722_v6 = vadd.f32 %v1708_v55, %v3808_v53  ;;  %v1687_v27 = vpop.xlane.xlu2 %1686 }
 0xbaf   :  { %v1715_v51 = vadd.f32 %v1687_v27, %v3808_v53 }
 0xbb0   :  { %v1761_v10 = vperm.slane %v1722_v6, %v4405_v54 }
 0xbb1   :  { %v1748_v0 = vperm.slane %v1715_v51, %v4405_v54 }
 0xbb2   :  { %v1762_v22 = vsel %vm1267_vm10, %v1761_v10, %v1760_v61 }
 0xbb3   :  { %v1749_v12 = vsel %vm1267_vm10, %v1748_v0, %v1747_v19 }
 0xbb4   :  { %v1763_v58 = vsel %vm942_vm3, %v1762_v22, %v1749_v12 }
 0xbb5   :  { %v1765_v25 = vsel %vm1082_vm11, %v1763_v58, -1e+30 }
 0xbb6   :  { %v1766_v53 = vsel %vm1285_vm12, %v1765_v25, -inf }
 0xbb7   :  { %1767 = vmax.xlane.f32.xlu1 %v1766_v53 }
 0xc2a   :  { %v1768_v41 = vpop.xlane.xlu1 %1767 }
 0xc2b   :  { %v1769_v31 = vsub.f32 %v1765_v25, %v1768_v41 }
 0xc2d   :  { %v1770_v50 = vmul.f32 1.442695, %v1769_v31 }
 0xc2f   :  { %2829 = vpow2.f32 %v1770_v50 }
 0xc35   :  { %v2830_v15 = vpop.eup %2829 }
 0xc36   :  { %v1772_v1 = vsel %vm1285_vm12, %v2830_v15, 0.0 }
 0xc37   :  { %1773 = vadd.xlane.f32.xlu2 %v1772_v1 }
 0xcaa   :  { %v1774_v43 = vpop.xlane.xlu2 %1773 }
 0xcab   :  { %2831 = vrcp.f32 %v1774_v43 }
 0xcb1   :  { %v2832_v3 = vpop.eup %2831 }
 0xcb2   :  { %v1776_v59 = vmul.f32 %v2832_v3, %v2830_v15 }
 0xcb4   :  { %v1777_v45 = vperm.slane %v1776_v59, 0  ;;  %v1820_v11 = vperm.slane %v1776_v59, 1 }
 0xcb6   :  { %1825 = vperm.xlu2 %2781, %v1820_v11   ;;  %1788 = vperm.xlu1 %2780, %v1777_v45  }
 0xcb7   :  { %1782 = vperm.xlu0 %2779, %v1777_v45  }
 0xcbe   :  { %2782 = vset.pattern.permute.xlu2 %v4406_v18  ;;  %1831 = vperm.xlu1 %2780, %v1820_v11  }
 0xcbf   :  { %2785 = vset.pattern.permute.xlu0 %v4407_v36 }
 0xcc6   :  { %1794 = vperm.xlu2 %2782, %v1777_v45   ;;  %2783 = vset.pattern.permute.xlu1 %v4406_v18 }
 0xcc7   :  { %1843 = vperm.xlu0 %2785, %v1820_v11  }
 0xcce   :  { %2784 = vset.pattern.permute.xlu2 %v4407_v36  ;;  %1837 = vperm.xlu1 %2783, %v1820_v11  }
 0xccf   :  { %2790 = vset.pattern.permute.xlu0 %v4408_v35 }
 0xcd6   :  { %1800 = vperm.xlu2 %2784, %v1777_v45   ;;  %2786 = vset.pattern.permute.xlu1 %v4409_v60 }
 0xcd7   :  { %1818 = vperm.xlu0 %2790, %v1777_v45  }
 0xcde   :  { %2787 = vset.pattern.permute.xlu2 %v4409_v60  ;;  %1806 = vperm.xlu1 %2786, %v1777_v45  }
 0xce6   :  { %1849 = vperm.xlu2 %2787, %v1820_v11   ;;  %2788 = vset.pattern.permute.xlu1 %v4410_v7 }
 0xcee   :  { %2789 = vset.pattern.permute.xlu2 %v4410_v7  ;;  %1812 = vperm.xlu1 %2788, %v1777_v45  }
 0xcf6   :  { %1855 = vperm.xlu2 %2789, %v1820_v11   ;;  %2791 = vset.pattern.permute.xlu1 %v4408_v35 }
 0xcfe   :  { %1919 = vrot.lane.b32.xlu2 %v4001_v39, %s2954_s9  ;;  %1861 = vperm.xlu1 %2791, %v1820_v11  }
 0xd10   :  { %v1826_v24 = vpop.permute.xlu2 %1825 }
 0xd20   :  { %v1795_v40 = vpop.permute.xlu2 %1794 }
 0xd21   :  { %v1865_v39 = vmul.f32 %v1795_v40, %v3664_v34  ;;  %v1870_v34 = vmul.f32 %v1826_v24, %v3684_v38 }
 0xd23   :  { %v1880_v51 = vsel %vm190_vm0, %v1865_v39, 0.0  ;;  %v1896_v31 = vsel %vm190_vm0, %v1870_v34, 0.0 }
 0xd28   :  { %v1789_v37 = vpop.permute.xlu1 %1788 }
 0xd29   :  { %v1783_v46 = vpop.permute.xlu0 %1782  ;;  %v1864_v14 = vmul.f32 %v1789_v37, %v4411_v33 }
 0xd2a   :  { %v1863_v55 = vmul.f32 %v1783_v46, %v4412_v9 }
 0xd2b   :  { %v1878_v23 = vsel %vm190_vm0, %v1864_v14, 0.0 }
 0xd2c   :  { %v1877_v4 = vsel %vm190_vm0, %v1863_v55, 0.0 }
 0xd2d   :  { %v1879_v30 = vadd.f32 %v1878_v23, %v1877_v4 }
 0xd2f   :  { %v1881_v10 = vadd.f32 %v1880_v51, %v1879_v30 }
 0xd30   :  { %v1832_v20 = vpop.permute.xlu1 %1831  ;;  %v1801_v28 = vpop.permute.xlu2 %1800 }
 0xd31   :  { %v1866_v27 = vmul.f32 %v1801_v28, %v3668_v63  ;;  %v1871_v0 = vmul.f32 %v1832_v20, %v3688_v42 }
 0xd33   :  { %v1882_v54 = vsel %vm190_vm0, %v1866_v27, 0.0  ;;  %v1897_v25 = vsel %vm190_vm0, %v1871_v0, 0.0 }
 0xd34   :  { %v1883_v19 = vadd.f32 %v1882_v54, %v1881_v10  ;;  %v1898_v15 = vadd.f32 %v1897_v25, %v1896_v31 }
 0xd39   :  { %v1844_v8 = vpop.permute.xlu0 %1843 }
 0xd3a   :  { %v1873_v1 = vmul.f32 %v1844_v8, %v3696_v57 }
 0xd3c   :  { %v1901_v3 = vsel %vm190_vm0, %v1873_v1, 0.0 }
 0xd40   :  { %v1838_v49 = vpop.permute.xlu1 %1837  ;;  %v1850_v17 = vpop.permute.xlu2 %1849 }
 0xd41   :  { %v1872_v63 = vmul.f32 %v1838_v49, %v3692_v56  ;;  %v1874_v59 = vmul.f32 %v1850_v17, %v3700_v2 }
 0xd43   :  { %v1899_v50 = vsel %vm190_vm0, %v1872_v63, 0.0  ;;  %v1903_v18 = vsel %vm190_vm0, %v1874_v59, 0.0 }
 0xd44   :  { %v1900_v56 = vadd.f32 %v1899_v50, %v1898_v15 }
 0xd46   :  { %v1902_v45 = vadd.f32 %v1901_v3, %v1900_v56 }
 0xd48   :  { %v1904_v35 = vadd.f32 %v1903_v18, %v1902_v45 }
 0xd49   :  { %v1819_v22 = vpop.permute.xlu0 %1818 }
 0xd4a   :  { %v1869_v53 = vmul.f32 %v1819_v22, %v3680_v16 }
 0xd4c   :  { %v1888_v38 = vsel %vm190_vm0, %v1869_v53, 0.0 }
 0xd50   :  { %v1807_v6 = vpop.permute.xlu1 %1806  ;;  %v1856_v43 = vpop.permute.xlu2 %1855 }
 0xd51   :  { %v1867_v62 = vmul.f32 %v1807_v6, %v3672_v48  ;;  %v1875_v16 = vmul.f32 %v1856_v43, %v3704_v21 }
 0xd53   :  { %v1884_v61 = vsel %vm190_vm0, %v1867_v62, 0.0  ;;  %v1905_v36 = vsel %vm190_vm0, %v1875_v16, 0.0 }
 0xd54   :  { %v1885_v48 = vadd.f32 %v1884_v61, %v1883_v19  ;;  %v1906_v37 = vadd.f32 %v1905_v36, %v1904_v35 }
 0xd58   :  { %v1920_v23 = vpop.permute.xlu2 %1919 }
 0xd60   :  { %v1813_v12 = vpop.permute.xlu1 %1812 }
 0xd61   :  { %v1868_v58 = vmul.f32 %v1813_v12, %v3676_v52 }
 0xd63   :  { %v1886_v41 = vsel %vm190_vm0, %v1868_v58, 0.0 }
 0xd64   :  { %v1887_v42 = vadd.f32 %v1886_v41, %v1885_v48 }
 0xd66   :  { %v1889_v52 = vadd.f32 %v1888_v38, %v1887_v42 }
 0xd68   :  { %v1890_v11 = vrot.slane %v1889_v52, 4 }
 0xd6a   :  { %v1891_v60 = vadd.f32 %v1890_v11, %v1889_v52 }
 0xd6c   :  { %v1892_v20 = vrot.slane %v1891_v60, 2 }
 0xd6e   :  { %v1893_v2 = vadd.f32 %v1892_v20, %v1891_v60 }
 0xd70   :  { %v1862_v57 = vpop.permute.xlu1 %1861  ;;  %v1894_v33 = vrot.slane %v1893_v2, 1 }
 0xd71   :  { %v1876_v7 = vmul.f32 %v1862_v57, %v3708_v32 }
 0xd72   :  { %v1895_v55 = vadd.f32 %v1894_v33, %v1893_v2  ;;  %v2078_v33 = vld [vmem:[%s4413_s29 + $0x48] sm:$0xff] }
 0xd73   :  { %v1907_v24 = vsel %vm190_vm0, %v1876_v7, 0.0 }
 0xd74   :  { %v1908_v40 = vadd.f32 %v1907_v24, %v1906_v37 }
 0xd76   :  { %v1909_v46 = vrot.slane %v1908_v40, 4 }
 0xd78   :  { %v1910_v49 = vadd.f32 %v1909_v46, %v1908_v40 }
 0xd7a   :  { %v1911_v21 = vrot.slane %v1910_v49, 2 }
 0xd7c   :  { %v1912_v14 = vadd.f32 %v1911_v21, %v1910_v49  ;;  %v2080_v49 = vld [vmem:[%s4413_s29 + $0x58] sm:$0xff]  ;;  %v2079_v21 = vld [vmem:[%s4413_s29 + $0x50] sm:$0xff] }
 0xd7d   :  { %2092 = vmatpush.msrb.mxu2 %v2080_v49  ;;  %v2244_v49 = vld [vmem:[%s4421_s20] sm:$0xff] }
 0xd7e   :  { %v1913_v9 = vrot.slane %v1912_v14, 1 }
 0xd7f   :  { %2093 = vmatpush.msrb.mxu2 %v2079_v21 }
 0xd80   :  { %v1914_v28 = vadd.f32 %v1913_v9, %v1912_v14  ;;  %v2076_v14 = vld [vmem:[%s4413_s29 + $0x38] sm:$0xff]  ;;  %v2074_v9 = vld [vmem:[%s4413_s29 + $0x28] sm:$0xff] }
 0xd81   :  { %2094 = vmatpush.msrb.mxu2 %v2078_v33 }
 0xd82   :  { %v1917_v4 = vsel %vm942_vm3, %v1914_v28, %v1895_v55  ;;  %v4155_v8 = vsel %vm2056_vm5, %v1914_v28, %v1895_v55  ;;  %v2073_v55 = vld [vmem:[%s4413_s29 + $0x20] sm:$0xff]  ;;  %v2072_v28 = vld [vmem:[%s4413_s29 + $0x18] sm:$0xff] }
 0xd83   :  { %v1922_v32 = vsel %vm190_vm0, %v1917_v4, %v1920_v23  ;;  %v2059_v24 = vsel %vm2054_vm14, %v3979_v13, %v4155_v8  ;;  %v2077_v13 = vld [vmem:[%s4413_s29 + $0x40] sm:$0xff]  ;;  %v2071_v23 = vld [vmem:[%s4413_s29 + $0x10] sm:$0xff]  ;;  %v2070_v4 = vld [vmem:[%s4413_s29 + $0x8] sm:$0xff] }
 0xd84   :  { %2704 = vmatmul.msk.f32.vlgmr.msrb.gmra.mxu3 %vm1456_vm13, %v1922_v32  ;;  %2095 = vmatpush.msrb.mxu2 %v2077_v13  ;;  %v4241_v13 = vld [vmem:[%s4424_s4] ss:$0 sm:$0xff] }
 0xd86   :  { %2096 = vmatpush.msrb.mxu2 %v2076_v14 }
 0xe07   :  { %v1943_v6 = vpop.f32.mrf.mxu3 }
 0xe08   :  { %v1944_v39 = vadd.f32 %v3985_v29, %v1943_v6 }
 0xe0a   :  { %2833 = vtanh.f32 %v1944_v39  ;;  %v2705_v30 = vmul.f32 -1.442695, %v1944_v39 }
 0xe0c   :  { %2835 = vpow2.f32 %v2705_v30 }
 0xe10   :  { %v2834_v27 = vpop.eup %2833 }
 0xe11   :  { %1968 = vrot.lane.b32.xlu1 %v2834_v27, %s2950_s0  ;;  %v2069_v27 = vld [vmem:[%s4413_s29] sm:$0xff] }
 0xe12   :  { %v2836_v62 = vpop.eup %2835 }
 0xe13   :  { %v1949_v51 = vadd.f32 1.0, %v2836_v62 }
 0xe15   :  { %2837 = vrcp.f32 %v1949_v51  ;;  %v1961_v19 = vand.u32 2147483648, %v1949_v51  ;;  %vm1955_vm6 = vweird.f32 %v1949_v51  ;;  %v1959_v22 = vand.u32 2147483647, %v1949_v51 }
 0xe17   :  { %v1962_v12 = vor.u32 1.1754944e-38, %v1961_v19  ;;  %vm1960_vm8 = vcmp.eq.f32.partialorder %v1959_v22, 8.507059e+37  ;;  %v2141_v19 = vld [vmem:[%s4415_s8 + $0x8] sm:$0xff]  ;;  %v2140_v22 = vld [vmem:[%s4415_s8] sm:$0xff] }
 0xe1b   :  { %v2838_v54 = vpop.eup %2837 }
 0xe1c   :  { %v1951_v10 = vmul.f32 %v2838_v54, %v1949_v51  ;;  %vm1956_vm3 = vweird.f32 %v2838_v54 }
 0xe1d   :  { %vm1957_vm7 = vmor %vm1955_vm6, %vm1956_vm3 }
 0xe1e   :  { %v1952_v0 = vsub.f32 1.0, %v1951_v10  ;;  %v2111_v10 = vld [vmem:[%s4414_s3 + $0x10] sm:$0xff] }
 0xe20   :  { %v1953_v17 = vmul.f32 %v2838_v54, %v1952_v0  ;;  %v2109_v0 = vld [vmem:[%s4414_s3] sm:$0xff] }
 0xe22   :  { %v1954_v61 = vadd.f32 %v2838_v54, %v1953_v17  ;;  %v2143_v17 = vld [vmem:[%s4415_s8 + $0x18] sm:$0xff] }
 0xe24   :  { %v1958_v29 = vsel %vm1957_vm7, %v2838_v54, %v1954_v61  ;;  %v2112_v54 = vld [vmem:[%s4414_s3 + $0x18] sm:$0xff]  ;;  %v2142_v61 = vld [vmem:[%s4415_s8 + $0x10] sm:$0xff] }
 0xe25   :  { %v1963_v63 = vsel %vm1960_vm8, %v1962_v12, %v1958_v29  ;;  %2132 = vmatpush.msra.mxu3 %v2112_v54  ;;  %v2210_v29 = vld [vmem:[%s4416_s14 + $0x18] sm:$0xff]  ;;  %v2209_v12 = vld [vmem:[%s4416_s14 + $0x10] sm:$0xff] }
 0xe26   :  { %v1966_v48 = vmul.f32 %v1963_v63, %v3990_v47 }
 0xe27   :  { %2133 = vmatpush.msra.mxu3 %v2111_v10 }
 0xe83   :  { %v1969_v34 = vpop.permute.xlu1 %1968 }
 0xe84   :  { %v1971_v58 = vmul.f32 %v1969_v34, %v1963_v63  ;;  %v2208_v34 = vld [vmem:[%s4416_s14 + $0x8] sm:$0xff] }
 0xe86   :  { %1973 = vrot.lane.b32.xlu2 %v1971_v58, %s2953_s21 }
 0xe8e   :  { %1987 = vrot.lane.b32.xlu2 %v4022_v26, %s2950_s0 }
 0xee0   :  { %v1974_v25 = vpop.permute.xlu2 %1973 }
 0xee1   :  { %v1976_v53 = vadd.f32 %v1974_v25, %v1966_v48 }
 0xee3   :  { %2839 = vtanh.f32 %v1976_v53  ;;  %v2207_v53 = vld [vmem:[%s4416_s14] sm:$0xff] }
 0xee8   :  { %v1988_v50 = vpop.permute.xlu2 %1987 }
 0xee9   :  { %v2840_v41 = vpop.eup %2839 }
 0xeea   :  { %1979 = vrot.lane.b32.xlu0 %v2840_v41, %s2950_s0  ;;  %v2178_v41 = vld [vmem:[%s4418_s24 + $0x38] sm:$0xff] }
 0xf5c   :  { %v1980_v42 = vpop.permute.xlu0 %1979 }
 0xf5d   :  { %v1982_v31 = vmul.f32 %v1980_v42, %v1963_v63  ;;  %v2802_v63 = vld [vmem:[%s4417_s19] ss:$0 sm:$0xff]  ;;  %v2177_v42 = vld [vmem:[%s4418_s24 + $0x30] sm:$0xff] }
 0xf5f   :  { %1984 = vrot.lane.b32.xlu1 %v1982_v31, %s2953_s21  ;;  %v2176_v31 = vld [vmem:[%s4418_s24 + $0x28] sm:$0xff] }
 0xfd1   :  { %v1985_v15 = vpop.permute.xlu1 %1984 }
 0xfd2   :  { %v1990_v1 = vsel %vm1093_vm4, %v1985_v15, %v1988_v50  ;;  %v2175_v50 = vld [vmem:[%s4418_s24 + $0x20] sm:$0xff]  ;;  %v2174_v15 = vld [vmem:[%s4418_s24 + $0x18] sm:$0xff] }
 0xfd3   :  { %2706 = vmatmul.msk.f32.vlgmr.msra.gmra.mxu2 %vm190_vm0, %v1990_v1  ;;  %v2173_v1 = vld [vmem:[%s4418_s24 + $0x10] sm:$0xff] }
0x1056   :  { %v2011_v38 = vpop.f32.mrf.mxu2 }
0x1057   :  { %v2012_v56 = vadd.f32 %v4013_v5, %v2011_v38  ;;  %v2172_v38 = vld [vmem:[%s4418_s24 + $0x8] sm:$0xff] }
0x1059   :  { %2841 = vtanh.f32 %v2012_v56  ;;  %v2707_v43 = vmul.f32 -1.442695, %v2012_v56  ;;  %v2171_v56 = vld [vmem:[%s4418_s24] sm:$0xff] }
0x105b   :  { %2843 = vpow2.f32 %v2707_v43 }
0x105f   :  { %v2842_v47 = vpop.eup %2841 }
0x1060   :  { %2036 = vrot.lane.b32.xlu0 %v2842_v47, %s2950_s0  ;;  %v2803_v47 = vld [vmem:[%s4419_s30] ss:$0 sm:$0xff] }
0x1061   :  { %v2844_v52 = vpop.eup %2843 }
0x1062   :  { %v2017_v3 = vadd.f32 1.0, %v2844_v52 }
0x1064   :  { %2845 = vrcp.f32 %v2017_v3  ;;  %v2029_v36 = vand.u32 2147483648, %v2017_v3  ;;  %vm2023_vm10 = vweird.f32 %v2017_v3  ;;  %v2027_v35 = vand.u32 2147483647, %v2017_v3 }
0x1066   :  { %v2030_v60 = vor.u32 1.1754944e-38, %v2029_v36  ;;  %vm2028_vm12 = vcmp.eq.f32.partialorder %v2027_v35, 8.507059e+37  ;;  %v2249_v36 = vld [vmem:[%s4421_s20 + $0x28] sm:$0xff]  ;;  %v2248_v35 = vld [vmem:[%s4421_s20 + $0x20] sm:$0xff] }
0x106a   :  { %v2846_v59 = vpop.eup %2845 }
0x106b   :  { %v2019_v16 = vmul.f32 %v2846_v59, %v2017_v3  ;;  %vm2024_vm9 = vweird.f32 %v2846_v59  ;;  %v2804_v3 = vld [vmem:[%s4420_s6] ss:$0 sm:$0xff] }
0x106c   :  { %vm2025_vm11 = vmor %vm2023_vm10, %vm2024_vm9 }
0x106d   :  { %v2020_v45 = vsub.f32 1.0, %v2019_v16 }
0x106f   :  { %v2021_v11 = vmul.f32 %v2846_v59, %v2020_v45 }
0x1071   :  { %v2022_v18 = vadd.f32 %v2846_v59, %v2021_v11  ;;  %v2251_v11 = vld [vmem:[%s4421_s20 + $0x38] sm:$0xff] }
0x1073   :  { %v2026_v5 = vsel %vm2025_vm11, %v2846_v59, %v2022_v18  ;;  %v2250_v18 = vld [vmem:[%s4421_s20 + $0x30] sm:$0xff] }
0x1074   :  { %v2031_v7 = vsel %vm2028_vm12, %v2030_v60, %v2026_v5  ;;  %v2247_v5 = vld [vmem:[%s4421_s20 + $0x18] sm:$0xff]  ;;  %v2246_v60 = vld [vmem:[%s4421_s20 + $0x10] sm:$0xff] }
0x1075   :  { %v2034_v20 = vmul.f32 %v2031_v7, %v4018_v44  ;;  %v2075_v44 = vld [vmem:[%s4413_s29 + $0x30] sm:$0xff] }
0x1076   :  { %2097 = vmatpush.msrb.mxu2 %v2075_v44 }
0x1078   :  { %2098 = vmatpush.msrb.mxu2 %v2074_v9 }
0x107a   :  { %2099 = vmatpush.msrb.mxu2 %v2073_v55 }
0x107c   :  { %2100 = vmatpush.msrb.mxu2 %v2072_v28 }
0x107e   :  { %2101 = vmatpush.msrb.mxu2 %v2071_v23 }
0x1080   :  { %2102 = vmatpush.msrb.mxu2 %v2070_v4 }
0x1082   :  { %2103 = vmatpush.msrb.mxu2 %v2069_v27 }
0x1084   :  { %2230 = vmatpush.msra.mxu2 %v2210_v29 }
0x1086   :  { %2231 = vmatpush.msra.mxu2 %v2209_v12 }
0x1088   :  { %2232 = vmatpush.msra.mxu2 %v2208_v34 }
0x108a   :  { %2233 = vmatpush.msra.mxu2 %v2207_v53 }
0x10d2   :  { %v2037_v57 = vpop.permute.xlu0 %2036 }
0x10d3   :  { %v2039_v37 = vmul.f32 %v2037_v57, %v2031_v7  ;;  %v2245_v57 = vld [vmem:[%s4421_s20 + $0x8] sm:$0xff] }
0x10d5   :  { %2041 = vrot.lane.b32.xlu1 %v2039_v37, %s2953_s21 }
0x10dd   :  { %2065 = vrot.lane.b32.xlu1 %v2059_v24, %s2953_s21 }
0x1147   :  { %v2042_v40 = vpop.permute.xlu1 %2041 }
0x1148   :  { %v2044_v46 = vadd.f32 %v2042_v40, %v2034_v20  ;;  %v2806_v40 = vld [vmem:[%s4423_s2] ss:$0 sm:$0xff] }
0x114a   :  { %2847 = vtanh.f32 %v2044_v46 }
0x114f   :  { %v2066_v30 = vpop.permute.xlu1 %2065 }
0x1150   :  { %v2848_v2 = vpop.eup %2847 }
0x1151   :  { %2047 = vrot.lane.b32.xlu2 %v2848_v2, %s2950_s0 }
0x11ab   :  { %v2048_v8 = vpop.permute.xlu2 %2047 }
0x11ac   :  { %v2050_v32 = vmul.f32 %v2048_v8, %v2031_v7  ;;  %v2805_v7 = vld [vmem:[%s4422_s1] ss:$0 sm:$0xff] }
0x11ae   :  { %v2052_v6 = vrot.slane %v2050_v32, 6 }
0x11b0   :  { %v2055_v39 = vsel %vm2054_vm14, %v4022_v26, %v2052_v6  ;;  %v2110_v26 = vld [vmem:[%s4414_s3 + $0x8] sm:$0xff] }
0x11b1   :  { %2061 = vrot.lane.b32.xlu0 %v2055_v39, %s2953_s21  ;;  %2134 = vmatpush.msra.mxu3 %v2110_v26 }
0x11b3   :  { %2135 = vmatpush.msra.mxu3 %v2109_v0 }
0x11b5   :  { %2162 = vmatpush.msrb.mxu3 %v2143_v17 }
0x11b7   :  { %2163 = vmatpush.msrb.mxu3 %v2142_v61 }
0x11b9   :  { %2164 = vmatpush.msrb.mxu3 %v2141_v19 }
0x11bb   :  { %2165 = vmatpush.msrb.mxu3 %v2140_v22 }
0x1223   :  { %v2062_v62 = vpop.permute.xlu0 %2061 }
0x1224   :  { %v2068_v51 = vsel %vm1093_vm4, %v2062_v62, %v2066_v30 }
0x1225   :  { %2708 = vmatmul.msk.f32.vlgmr.msrb.gmra.mxu2 %vm1456_vm13, %v2068_v51 }
0x1226   :  { %2267 = vmatpush.msrb.mxu2 %v2251_v11 }
0x1228   :  { %2268 = vmatpush.msrb.mxu2 %v2250_v18 }
0x122a   :  { %2269 = vmatpush.msrb.mxu2 %v2249_v36 }
0x122c   :  { %2270 = vmatpush.msrb.mxu2 %v2248_v35 }
0x122e   :  { %2271 = vmatpush.msrb.mxu2 %v2247_v5 }
0x1230   :  { %2272 = vmatpush.msrb.mxu2 %v2246_v60 }
0x1232   :  { %2273 = vmatpush.msrb.mxu2 %v2245_v57 }
0x1234   :  { %2274 = vmatpush.msrb.mxu2 %v2244_v49 }
0x12a8   :  { %v2105_v58 = vpop.f32.mrf.mxu2 }
0x12a9   :  { %v2106_v48 = vadd.f32 %v2802_v63, %v2105_v58 }
0x12ab   :  { %2849 = vtanh.f32 %v2106_v48 }
0x12b1   :  { %v2850_v25 = vpop.eup %2849 }
0x12b2   :  { %2709 = vmatmul.msk.f32.vlgmr.msra.gmra.mxu3 %vm1093_vm4, %v2850_v25 }
0x12b3   :  { %2194 = vmatpush.msra.mxu3 %v2178_v41 }
0x12b5   :  { %2195 = vmatpush.msra.mxu3 %v2177_v42 }
0x12b7   :  { %2196 = vmatpush.msra.mxu3 %v2176_v31 }
0x12b9   :  { %2197 = vmatpush.msra.mxu3 %v2175_v50 }
0x12ba   :  { %2710 = vmatmul.msk.f32.vlgmr.msrb.gmra.mxu3 %vm1093_vm4, %v2062_v62 }
0x12bb   :  { %2198 = vmatpush.msra.mxu3 %v2174_v15 }
0x12bd   :  { %2199 = vmatpush.msra.mxu3 %v2173_v1 }
0x12bf   :  { %2200 = vmatpush.msra.mxu3 %v2172_v38 }
0x12c1   :  { %2201 = vmatpush.msra.mxu3 %v2171_v56 }
0x12c3   :  { %2333 = vmatpush.msrb.mxu3 %v2251_v11 }
0x12c5   :  { %2334 = vmatpush.msrb.mxu3 %v2250_v18 }
0x12c7   :  { %2335 = vmatpush.msrb.mxu3 %v2249_v36 }
0x12c9   :  { %2336 = vmatpush.msrb.mxu3 %v2248_v35 }
0x12cb   :  { %2337 = vmatpush.msrb.mxu3 %v2247_v5 }
0x12cd   :  { %2338 = vmatpush.msrb.mxu3 %v2246_v60 }
0x12cf   :  { %2339 = vmatpush.msrb.mxu3 %v2245_v57 }
0x12d1   :  { %2340 = vmatpush.msrb.mxu3 %v2244_v49 }
0x1335   :  { %v2137_v43 = vpop.f32.mrf.mxu3 }
0x1336   :  { %v4219_v52 = vadd.f32 %v2803_v47, %v2137_v43 }
0x1338   :  { %2712 = vmatmul.msk.f32.vlgmr.msra.gmra.mxu2 %vm1093_vm4, %v4219_v52 }
0x1339   :  { %2398 = vmatpush.msra.mxu2 %v2251_v11 }
0x133b   :  { %2399 = vmatpush.msra.mxu2 %v2250_v18 }
0x133d   :  { %v2167_v59 = vpop.f32.mrf.mxu3  ;;  %2400 = vmatpush.msra.mxu2 %v2249_v36 }
0x133e   :  { %v2168_v16 = vadd.f32 %v2804_v3, %v2167_v59 }
0x133f   :  { %2401 = vmatpush.msra.mxu2 %v2248_v35 }
0x1340   :  { %2851 = vtanh.f32 %v2168_v16 }
0x1341   :  { %2402 = vmatpush.msra.mxu2 %v2247_v5 }
0x1343   :  { %2403 = vmatpush.msra.mxu2 %v2246_v60 }
0x1345   :  { %2404 = vmatpush.msra.mxu2 %v2245_v57 }
0x1346   :  { %v2852_v45 = vpop.eup %2851 }
0x1347   :  { %2711 = vmatmul.msk.f32.vlgmr.msra.gmra.mxu3 %vm190_vm0, %v2852_v45  ;;  %2405 = vmatpush.msra.mxu2 %v2244_v49 }
0x1348   :  { %2465 = vmatpush.msra.mxu3 %v2251_v11 }
0x134a   :  { %2466 = vmatpush.msra.mxu3 %v2250_v18 }
0x134c   :  { %2467 = vmatpush.msra.mxu3 %v2249_v36 }
0x134e   :  { %2468 = vmatpush.msra.mxu3 %v2248_v35 }
0x1350   :  { %2469 = vmatpush.msra.mxu3 %v2247_v5 }
0x1352   :  { %2470 = vmatpush.msra.mxu3 %v2246_v60 }
0x1354   :  { %2471 = vmatpush.msra.mxu3 %v2245_v57 }
0x1356   :  { %2472 = vmatpush.msra.mxu3 %v2244_v49 }
0x13bb   :  { %v2235_v37 = vpop.f32.mrf.mxu2 }
0x13bc   :  { %v2236_v24 = vadd.f32 %v2805_v7, %v2235_v37 }
0x13be   :  { %2853 = vtanh.f32 %v2236_v24 }
0x13c4   :  { %v2854_v20 = vpop.eup %2853 }
0x13c5   :  { %2240 = vrot.lane.b32.xlu2 %v2854_v20, %s2953_s21 }
0x13ca   :  { %v2203_v46 = vpop.f32.mrf.mxu3 }
0x13cb   :  { %v2204_v2 = vadd.f32 %v2806_v40, %v2203_v46 }
0x13cd   :  { %2206 = vst [vmem:[%s3137_s22] sm:$0xf] %v2204_v2  ;;  %s4425_s22 = sld [smem:[#allocation6_spill]] }
0x13d3   :  { %v2316_v12 = vld [vmem:[%s4425_s22] sm:$0xf] }
0x141f   :  { %v2241_v21 = vpop.permute.xlu2 %2240 }
0x1420   :  { %v2243_v33 = vsel %vm1093_vm4, %v4219_v52, %v2241_v21 }
0x1421   :  { %2713 = vmatmul.msk.f32.vlgmr.msrb.gmra.mxu2 %vm190_vm0, %v2243_v33 }
0x14a4   :  { %v2276_v14 = vpop.f32.mrf.mxu2 }
0x14a5   :  { %v2277_v44 = vadd.f32 %v4241_v13, %v2276_v14 }
0x14a7   :  { %2855 = vtanh.f32 %v2277_v44  ;;  %v2714_v55 = vmul.f32 -1.442695, %v2277_v44 }
0x14a9   :  { %2857 = vpow2.f32 %v2714_v55 }
0x14ad   :  { %v2856_v9 = vpop.eup %2855 }
0x14ae   :  { %2301 = vrot.lane.b32.xlu0 %v2856_v9, %s2950_s0 }
0x14af   :  { %v2858_v28 = vpop.eup %2857 }
0x14b0   :  { %v2282_v23 = vadd.f32 1.0, %v2858_v28 }
0x14b2   :  { %2859 = vrcp.f32 %v2282_v23  ;;  %v2294_v27 = vand.u32 2147483648, %v2282_v23  ;;  %vm2288_vm15 = vweird.f32 %v2282_v23  ;;  %v2292_v30 = vand.u32 2147483647, %v2282_v23 }
0x14b4   :  { %v2295_v51 = vor.u32 1.1754944e-38, %v2294_v27  ;;  %vm2293_vm2 = vcmp.eq.f32.partialorder %v2292_v30, 8.507059e+37 }
0x14b8   :  { %v2860_v4 = vpop.eup %2859 }
0x14b9   :  { %v2284_v8 = vmul.f32 %v2860_v4, %v2282_v23  ;;  %vm2289_vm13 = vweird.f32 %v2860_v4 }
0x14ba   :  { %vm2290_vm1 = vmor %vm2288_vm15, %vm2289_vm13  ;;  %vm2517_vm15 = vcmask 1043456  }
0x14bb   :  { %v2285_v32 = vsub.f32 1.0, %v2284_v8 }
0x14bd   :  { %v2286_v6 = vmul.f32 %v2860_v4, %v2285_v32 }
0x14bf   :  { %v2287_v39 = vadd.f32 %v2860_v4, %v2286_v6 }
0x14c1   :  { %v2291_v62 = vsel %vm2290_vm1, %v2860_v4, %v2287_v39 }
0x14c2   :  { %v2296_v10 = vsel %vm2293_vm2, %v2295_v51, %v2291_v62  ;;  %v2719_v51 = vld [vmem:[%s4425_s22 + $0x4] sm:$0xf] }
0x14c3   :  { %v2299_v0 = vmul.f32 %v2854_v20, %v2296_v10 }
0x1520   :  { %v2302_v54 = vpop.permute.xlu0 %2301 }
0x1521   :  { %v2304_v26 = vmul.f32 %v2302_v54, %v2296_v10 }
0x1523   :  { %2306 = vrot.lane.b32.xlu1 %v2304_v26, %s2953_s21 }
0x1595   :  { %v2307_v17 = vpop.permute.xlu1 %2306 }
0x1596   :  { %v2309_v61 = vadd.f32 %v2307_v17, %v2299_v0 }
0x1598   :  { %2861 = vtanh.f32 %v2309_v61 }
0x159e   :  { %v2862_v19 = vpop.eup %2861 }
0x159f   :  { %2312 = vrot.lane.b32.xlu2 %v2862_v19, %s2950_s0 }
0x15f9   :  { %v2313_v22 = vpop.permute.xlu2 %2312 }
0x15fa   :  { %v2315_v29 = vmul.f32 %v2313_v22, %v2296_v10 }
0x15fc   :  { %2318 = vrot.lane.b32.xlu0 %v2315_v29, %s2950_s0  ;;  %v2522_v29 = vld [vmem:[%s4426_s10 + $0x18] sm:$0xff] }
0x15fd   :  { %2544 = vmatpush.msrb.mxu0 %v2522_v29 }
0x166e   :  { %v2319_v34 = vpop.permute.xlu0 %2318 }
0x166f   :  { %v2321_v63 = vsel %vm1093_vm4, %v2316_v12, %v2319_v34 }
0x1670   :  { %2715 = vmatmul.msk.f32.vlgmr.msrb.gmra.mxu3 %vm190_vm0, %v2321_v63 }
0x16f3   :  { %v2342_v58 = vpop.f32.mrf.mxu3 }
0x16f4   :  { %v2343_v48 = vadd.f32 %v4241_v13, %v2342_v58 }
0x16f6   :  { %2863 = vtanh.f32 %v2343_v48  ;;  %v2716_v53 = vmul.f32 -1.442695, %v2343_v48 }
0x16f8   :  { %2865 = vpow2.f32 %v2716_v53 }
0x16fc   :  { %v2864_v25 = vpop.eup %2863 }
0x16fd   :  { %2367 = vrot.lane.b32.xlu1 %v2864_v25, %s2950_s0 }
0x16fe   :  { %v2866_v41 = vpop.eup %2865 }
0x16ff   :  { %v2348_v42 = vadd.f32 1.0, %v2866_v41 }
0x1701   :  { %2867 = vrcp.f32 %v2348_v42  ;;  %v2360_v56 = vand.u32 2147483648, %v2348_v42  ;;  %vm2354_vm3 = vweird.f32 %v2348_v42  ;;  %v2358_v47 = vand.u32 2147483647, %v2348_v42 }
0x1703   :  { %v2361_v3 = vor.u32 1.1754944e-38, %v2360_v56  ;;  %vm2359_vm7 = vcmp.eq.f32.partialorder %v2358_v47, 8.507059e+37 }
0x1707   :  { %v2868_v31 = vpop.eup %2867 }
0x1708   :  { %v2350_v50 = vmul.f32 %v2868_v31, %v2348_v42  ;;  %vm2355_vm5 = vweird.f32 %v2868_v31 }
0x1709   :  { %vm2356_vm6 = vmor %vm2354_vm3, %vm2355_vm5 }
0x170a   :  { %v2351_v15 = vsub.f32 1.0, %v2350_v50 }
0x170c   :  { %v2352_v1 = vmul.f32 %v2868_v31, %v2351_v15  ;;  %v2521_v15 = vld [vmem:[%s4426_s10 + $0x10] sm:$0xff] }
0x170d   :  { %2545 = vmatpush.msrb.mxu0 %v2521_v15 }
0x170e   :  { %v2353_v38 = vadd.f32 %v2868_v31, %v2352_v1 }
0x1710   :  { %v2357_v43 = vsel %vm2356_vm6, %v2868_v31, %v2353_v38 }
0x1711   :  { %v2362_v16 = vsel %vm2359_vm7, %v2361_v3, %v2357_v43  ;;  %v2520_v43 = vld [vmem:[%s4426_s10 + $0x8] sm:$0xff]  ;;  %v2519_v3 = vld [vmem:[%s4426_s10] sm:$0xff] }
0x1712   :  { %v2365_v11 = vmul.f32 %v2362_v16, %v2309_v61  ;;  %2546 = vmatpush.msrb.mxu0 %v2520_v43 }
0x1714   :  { %2547 = vmatpush.msrb.mxu0 %v2519_v3 }
0x176f   :  { %v2368_v59 = vpop.permute.xlu1 %2367 }
0x1770   :  { %v2370_v45 = vmul.f32 %v2368_v59, %v2362_v16 }
0x1772   :  { %2372 = vrot.lane.b32.xlu2 %v2370_v45, %s2953_s21 }
0x17cc   :  { %v2373_v18 = vpop.permute.xlu2 %2372 }
0x17cd   :  { %v2375_v36 = vadd.f32 %v2373_v18, %v2365_v11 }
0x17cf   :  { %2869 = vtanh.f32 %v2375_v36 }
0x17d5   :  { %v2870_v35 = vpop.eup %2869 }
0x17d6   :  { %2378 = vrot.lane.b32.xlu0 %v2870_v35, %s2950_s0 }
0x1848   :  { %v2379_v5 = vpop.permute.xlu0 %2378 }
0x1849   :  { %v4255_v60 = vmul.f32 %v2379_v5, %v2362_v16 }
0x184b   :  { %2383 = vrot.lane.b32.xlu1 %v4255_v60, %s2950_s0 }
0x18bd   :  { %v2384_v57 = vpop.permute.xlu1 %2383 }
0x18be   :  { %v2386_v7 = vsel %vm1093_vm4, %v4219_v52, %v2384_v57 }
0x18bf   :  { %2717 = vmatmul.msk.f32.vlgmr.msra.gmra.mxu2 %vm190_vm0, %v2386_v7 }
0x1942   :  { %v2407_v37 = vpop.f32.mrf.mxu2 }
0x1943   :  { %v2408_v24 = vadd.f32 %v4241_v13, %v2407_v37 }
0x1945   :  { %2871 = vtanh.f32 %v2408_v24  ;;  %v2718_v40 = vmul.f32 -1.442695, %v2408_v24 }
0x1947   :  { %2873 = vpow2.f32 %v2718_v40 }
0x194b   :  { %v2872_v20 = vpop.eup %2871 }
0x194c   :  { %2432 = vrot.lane.b32.xlu2 %v2872_v20, %s2950_s0 }
0x194d   :  { %v2874_v46 = vpop.eup %2873 }
0x194e   :  { %v2413_v2 = vadd.f32 1.0, %v2874_v46 }
0x1950   :  { %2875 = vrcp.f32 %v2413_v2  ;;  %v2425_v52 = vand.u32 2147483648, %v2413_v2  ;;  %vm2419_vm9 = vweird.f32 %v2413_v2  ;;  %v2423_v9 = vand.u32 2147483647, %v2413_v2 }
0x1952   :  { %v2426_v28 = vor.u32 1.1754944e-38, %v2425_v52  ;;  %vm2424_vm11 = vcmp.eq.f32.partialorder %v2423_v9, 8.507059e+37 }
0x1956   :  { %v2876_v49 = vpop.eup %2875 }
0x1957   :  { %v2415_v21 = vmul.f32 %v2876_v49, %v2413_v2  ;;  %vm2420_vm8 = vweird.f32 %v2876_v49 }
0x1958   :  { %vm2421_vm10 = vmor %vm2419_vm9, %vm2420_vm8 }
0x1959   :  { %v2416_v33 = vsub.f32 1.0, %v2415_v21 }
0x195b   :  { %v2417_v14 = vmul.f32 %v2876_v49, %v2416_v33 }
0x195d   :  { %v2418_v44 = vadd.f32 %v2876_v49, %v2417_v14 }
0x195f   :  { %v2422_v55 = vsel %vm2421_vm10, %v2876_v49, %v2418_v44 }
0x1960   :  { %v2427_v4 = vsel %vm2424_vm11, %v2426_v28, %v2422_v55 }
0x1961   :  { %v2430_v32 = vmul.f32 %v2427_v4, %v2375_v36 }
0x19a6   :  { %v2433_v23 = vpop.permute.xlu2 %2432 }
0x19a7   :  { %v2435_v8 = vmul.f32 %v2433_v23, %v2427_v4 }
0x19a9   :  { %2437 = vrot.lane.b32.xlu0 %v2435_v8, %s2953_s21 }
0x1a1b   :  { %v2438_v6 = vpop.permute.xlu0 %2437 }
0x1a1c   :  { %v2440_v39 = vadd.f32 %v2438_v6, %v2430_v32 }
0x1a1e   :  { %2877 = vtanh.f32 %v2440_v39 }
0x1a24   :  { %v2878_v27 = vpop.eup %2877 }
0x1a25   :  { %2443 = vrot.lane.b32.xlu1 %v2878_v27, %s2950_s0 }
0x1a97   :  { %v2444_v30 = vpop.permute.xlu1 %2443 }
0x1a98   :  { %v2446_v62 = vmul.f32 %v2444_v30, %v2427_v4 }
0x1a9a   :  { %2450 = vrot.lane.b32.xlu2 %v2446_v62, %s2950_s0 }
0x1af4   :  { %v2451_v54 = vpop.permute.xlu2 %2450 }
0x1af5   :  { %v2453_v10 = vsel %vm1093_vm4, %v2719_v51, %v2451_v54 }
0x1af6   :  { %2720 = vmatmul.msk.f32.vlgmr.msra.gmra.mxu3 %vm190_vm0, %v2453_v10 }
0x1b79   :  { %v2474_v26 = vpop.f32.mrf.mxu3 }
0x1b7a   :  { %v2475_v0 = vadd.f32 %v4241_v13, %v2474_v26 }
0x1b7c   :  { %2879 = vtanh.f32 %v2475_v0  ;;  %v2721_v61 = vmul.f32 -1.442695, %v2475_v0 }
0x1b7e   :  { %2881 = vpow2.f32 %v2721_v61 }
0x1b82   :  { %v2880_v17 = vpop.eup %2879 }
0x1b83   :  { %2499 = vrot.lane.b32.xlu0 %v2880_v17, %s2950_s0 }
0x1b84   :  { %v2882_v19 = vpop.eup %2881 }
0x1b85   :  { %v2480_v22 = vadd.f32 1.0, %v2882_v19 }
0x1b87   :  { %2883 = vrcp.f32 %v2480_v22  ;;  %v2492_v25 = vand.u32 2147483648, %v2480_v22  ;;  %vm2486_vm12 = vweird.f32 %v2480_v22  ;;  %v2490_v13 = vand.u32 2147483647, %v2480_v22 }
0x1b89   :  { %v2493_v41 = vor.u32 1.1754944e-38, %v2492_v25  ;;  %vm2491_vm13 = vcmp.eq.f32.partialorder %v2490_v13, 8.507059e+37 }
0x1b8d   :  { %v2884_v12 = vpop.eup %2883 }
0x1b8e   :  { %v2482_v34 = vmul.f32 %v2884_v12, %v2480_v22  ;;  %vm2487_vm0 = vweird.f32 %v2884_v12 }
0x1b8f   :  { %vm2488_vm14 = vmor %vm2486_vm12, %vm2487_vm0 }
0x1b90   :  { %v2483_v63 = vsub.f32 1.0, %v2482_v34 }
0x1b92   :  { %v2484_v58 = vmul.f32 %v2884_v12, %v2483_v63 }
0x1b94   :  { %v2485_v48 = vadd.f32 %v2884_v12, %v2484_v58 }
0x1b96   :  { %v2489_v53 = vsel %vm2488_vm14, %v2884_v12, %v2485_v48 }
0x1b97   :  { %v2494_v31 = vsel %vm2491_vm13, %v2493_v41, %v2489_v53 }
0x1b98   :  { %v2497_v1 = vmul.f32 %v2494_v31, %v2440_v39 }
0x1bf5   :  { %v2500_v42 = vpop.permute.xlu0 %2499 }
0x1bf6   :  { %v2502_v50 = vmul.f32 %v2500_v42, %v2494_v31 }
0x1bf8   :  { %2504 = vrot.lane.b32.xlu1 %v2502_v50, %s2953_s21 }
0x1c6a   :  { %v2505_v38 = vpop.permute.xlu1 %2504 }
0x1c6b   :  { %v2507_v56 = vadd.f32 %v2505_v38, %v2497_v1 }
0x1c6d   :  { %2885 = vtanh.f32 %v2507_v56 }
0x1c73   :  { %v2886_v47 = vpop.eup %2885 }
0x1c74   :  { %2510 = vrot.lane.b32.xlu2 %v2886_v47, %s2950_s0 }
0x1cce   :  { %v2511_v59 = vpop.permute.xlu2 %2510 }
0x1ccf   :  { %v2513_v16 = vmul.f32 %v2511_v59, %v2494_v31 }
0x1cd1   :  { %v2515_v45 = vrot.slane %v2513_v16, 4 }
0x1cd3   :  { %v2518_v11 = vsel %vm2517_vm15, %v4255_v60, %v2515_v45 }
0x1cd4   :  { %2528 = vrot.lane.b32.xlu0 %v2518_v11, %s2953_s21 }
0x1d46   :  { %v2529_v18 = vpop.permute.xlu0 %2528 }
0x1d47   :  { %2722 = vmatmul.msk.f32.vlgmr.msrb.gmra.mxu0 %vm1093_vm4, %v2529_v18 }
0x1d48   :  { %2911 = shalt.err (!%p2908_p4)
}
0x1d49   :  { %2563 = dma.vmem_to_hbm [thread:$0]  %s2559_s16, 32, %s2561_s11, [#allocation4]   ;;  %v2808_v36 = vld [vmem:[%s3127_s7] ss:$0 sm:$0xff] }
0x1dc4   :  { %v2549_v35 = vpop.f32.mrf.mxu0 }
0x1dc5   :  { %v2550_v5 = vadd.f32 %v2808_v36, %v2549_v35 }
0x1dc7   :  { %2552 = vst [vmem:[%s3142_s28] sm:$0xff] %v2550_v5 }
0x1dc8   :  { %2912 = dma.done.wait [#allocation4], 32  }
0x1dc9   :  { %2913 = vsyncadd [#allocation4], 4294967264 }
0x1dca   :  { %2576 = vsyncpa [#allocation4], 1 }

</bundles_post_ra>
